<compile_context>
chip_gen: v7x
topology: tpu7x:2x2x1
jax: 0.10.0
libtpu: 0.0.40
codegen_flags: <defaults>
</compile_context>

<pallas_src>
import jax
import jax.numpy as jnp
from jax import lax
from jax.experimental import pallas as pl
from jax.experimental.pallas import tpu as pltpu

# ---- model hyper-parameters (small, consistent with the module's __init__) ----
VOCAB = 32          # vocab_size (= input_dim = output_dim)
EMB = 16            # embedding_dim
HID = 32            # hidden_dim      -> 4*HID = 128 (one lane width)
LAYERS = 2          # num_layers
NUM_LATENTS = 6     # default num_latents
SEQ = 8             # sequence length of x
BATCH = 4           # batch size


# ----------------------------- fused Seq2Seq kernel ----------------------------
def _seq2seq_kernel(src_oh_ref,
                    enc_emb_ref, e0_ih_ref, e0_hh_ref, e0_b_ref,
                    e1_ih_ref, e1_hh_ref, e1_b_ref,
                    dec_emb_ref, d0_ih_ref, d0_hh_ref, d0_b_ref,
                    d1_ih_ref, d1_hh_ref, d1_b_ref,
                    fc_w_ref, fc_b_ref,
                    out_ref, gin_ref):
    """One grid step == one latent Seq2Seq model, weights resident in VMEM."""
    f32 = jnp.float32
    _, T, B, V = out_ref.shape          # block shape (1, T, B, V)
    H = e0_hh_ref.shape[1]              # (1, H, 4H)

    def dot(a, b):
        return jnp.dot(a, b, preferred_element_type=f32)

    def sigmoid(z):                     # numerically stable, EUP tanh
        return 0.5 * jnp.tanh(0.5 * z) + 0.5

    def cell(gates, c):
        # PyTorch gate order [i, f, g, o]; gates: (B, 4H)
        i = sigmoid(gates[:, 0 * H:1 * H])
        f = sigmoid(gates[:, 1 * H:2 * H])
        g = jnp.tanh(gates[:, 2 * H:3 * H])
        o = sigmoid(gates[:, 3 * H:4 * H])
        c_new = f * c + i * g
        h_new = o * jnp.tanh(c_new)
        return h_new, c_new

    src_oh = src_oh_ref[...]                                     # (T*B, V) one-hot tokens

    # ------------------------------- encoder -----------------------------------
    # layer 0: embedding + input projection hoisted out of the recurrence
    emb_seq = dot(src_oh, enc_emb_ref[0])                        # (T*B, E)
    gin_ref[...] = dot(emb_seq, e0_ih_ref[0]) + e0_b_ref[0]      # (T*B, 4H)

    e0_hh = e0_hh_ref[0]
    h = jnp.zeros((B, H), f32)
    c = jnp.zeros((B, H), f32)
    outs0 = []
    for t in range(T):                                           # serial recurrence
        gates = gin_ref[t * B:(t + 1) * B, :] + dot(h, e0_hh)
        h, c = cell(gates, c)
        outs0.append(h)
    h0, c0 = h, c

    # layer 1 (eval-mode inter-layer dropout = identity)
    e1_ih = e1_ih_ref[0]
    e1_hh = e1_hh_ref[0]
    e1_b = jnp.broadcast_to(e1_b_ref[0], (B, 4 * H))             # hoisted broadcast
    h = jnp.zeros((B, H), f32)
    c = jnp.zeros((B, H), f32)
    for t in range(T):
        gates = dot(outs0[t], e1_ih) + dot(h, e1_hh) + e1_b
        h, c = cell(gates, c)
    h1, c1 = h, c

    # ------------------------------- decoder -----------------------------------
    dec_emb = dec_emb_ref[0]
    d0_ih = d0_ih_ref[0]
    d0_hh = d0_hh_ref[0]
    d0_b = jnp.broadcast_to(d0_b_ref[0], (B, 4 * H))
    d1_ih = d1_ih_ref[0]
    d1_hh = d1_hh_ref[0]
    d1_b = jnp.broadcast_to(d1_b_ref[0], (B, 4 * H))
    fc_w = fc_w_ref[0]
    fc_b = jnp.broadcast_to(fc_b_ref[0], (B, V))

    hs = [h0, h1]
    cs = [c0, c1]
    inp_oh = src_oh_ref[0:B, :]                  # one-hot of trg[0] (== src[0])
    iota = lax.broadcasted_iota(jnp.int32, (B, V), 1)

    out_ref[0, 0] = jnp.zeros((B, V), f32)       # outputs[0] stays zero (as in reference)
    for t in range(1, T):
        x = dot(inp_oh, dec_emb)                 # embedding lookup via one-hot matmul (B,E)
        g0 = dot(x, d0_ih) + dot(hs[0], d0_hh) + d0_b
        hs[0], cs[0] = cell(g0, cs[0])
        g1 = dot(hs[0], d1_ih) + dot(hs[1], d1_hh) + d1_b
        hs[1], cs[1] = cell(g1, cs[1])
        logits = dot(hs[1], fc_w) + fc_b         # fc_out: (B, V)
        out_ref[0, t] = logits
        # greedy argmax feedback, first-max tie-break (matches jnp.argmax)
        m = jnp.max(logits, axis=-1, keepdims=True)
        idx = jnp.min(jnp.where(logits == m, iota, V), axis=-1, keepdims=True)
        inp_oh = (iota == idx).astype(f32)


# ----------------------------- parameter init ---------------------------------
def _uniform(key, shape):
    # matches init_weights: nn.init.uniform_(param, -0.08, 0.08)
    return jax.random.uniform(key, shape, jnp.float32, -0.08, 0.08)


def init_seq2seq_params(key):
    """One Seq2Seq model's params, pre-transposed for the kernel (16-tuple)."""
    keys = iter(jax.random.split(key, 24))
    nxt = lambda: next(keys)

    def lstm_layer(in_dim):
        w_ihT = _uniform(nxt(), (4 * HID, in_dim)).T              # (in_dim, 4H)
        w_hhT = _uniform(nxt(), (4 * HID, HID)).T                 # (HID,   4H)
        # PyTorch has b_ih and b_hh; both are added -> pass combined bias.
        b = (_uniform(nxt(), (4 * HID,)) + _uniform(nxt(), (4 * HID,))).reshape(1, 4 * HID)
        return w_ihT, w_hhT, b

    enc_emb = _uniform(nxt(), (VOCAB, EMB))
    e0 = lstm_layer(EMB)
    e1 = lstm_layer(HID)
    dec_emb = _uniform(nxt(), (VOCAB, EMB))
    d0 = lstm_layer(EMB)
    d1 = lstm_layer(HID)
    fc_wT = _uniform(nxt(), (VOCAB, HID)).T                       # (HID, VOCAB)
    fc_b = _uniform(nxt(), (VOCAB,)).reshape(1, VOCAB)
    return (enc_emb, *e0, *e1, dec_emb, *d0, *d1, fc_wT, fc_b)


# ------------------------------- forward pass ---------------------------------
@jax.jit
def unsupervised_lstm_forward(stacked_params, x):
    """UnsupervisedLSTM.forward: sum over num_latents Seq2Seq models. x: (T, B) int32."""
    T, B = x.shape
    L = stacked_params[0].shape[0]
    V = VOCAB

    # Tokens as one-hot rows (T*B, V): shared across all latents; used in-kernel for the
    # encoder/decoder embedding lookups as MXU matmuls (exact row selection).
    src_oh = jax.nn.one_hot(x.reshape(-1), V, dtype=jnp.float32)

    in_specs = [pl.BlockSpec((T * B, V), lambda l: (0, 0))]
    in_specs += [pl.BlockSpec((1,) + tuple(p.shape[1:]), lambda l: (l, 0, 0))
                 for p in stacked_params]

    per_latent = pl.pallas_call(
        _seq2seq_kernel,
        grid=(L,),
        in_specs=in_specs,
        out_specs=pl.BlockSpec((1, T, B, V), lambda l: (l, 0, 0, 0)),
        out_shape=jax.ShapeDtypeStruct((L, T, B, V), jnp.float32),
        scratch_shapes=[pltpu.VMEM((T * B, 4 * HID), jnp.float32)],  # hoisted gate inputs
        compiler_params=pltpu.CompilerParams(dimension_semantics=("parallel",)),
    )(src_oh, *stacked_params)

    # torch.stack(...).sum(dim=0) -> trivial external sum over the (L,T,B,V) slab.
    return per_latent.sum(axis=0)


# ------------------------------------ main -------------------------------------
if __name__ == "__main__":
    key = jax.random.PRNGKey(0)
    pkey, xkey = jax.random.split(key)

    model_keys = jax.random.split(pkey, NUM_LATENTS)
    per_model = [init_seq2seq_params(k) for k in model_keys]
    # Stack each of the 16 params across the latent dimension -> leading dim NUM_LATENTS.
    stacked_params = tuple(jnp.stack(ps) for ps in zip(*per_model))

    x = jax.random.randint(xkey, (SEQ, BATCH), 0, VOCAB, dtype=jnp.int32)

    out = unsupervised_lstm_forward(stacked_params, x)
    out = jax.block_until_ready(out)
    assert out.shape == (SEQ, BATCH, VOCAB) and out.dtype == jnp.float32
    assert bool(jnp.all(jnp.isfinite(out)))

    print("KERNEL_OK")
</pallas_src>

<mosaic_0001>
module attributes {stable_mosaic.version = 11 : i64} {
  func.func @_seq2seq_kernel(%arg0: i32, %arg1: memref<32x32xf32, #tpu.memory_space<vmem>>, %arg2: memref<1x32x16xf32, #tpu.memory_space<vmem>>, %arg3: memref<1x16x128xf32, #tpu.memory_space<vmem>>, %arg4: memref<1x32x128xf32, #tpu.memory_space<vmem>>, %arg5: memref<1x1x128xf32, #tpu.memory_space<vmem>>, %arg6: memref<1x32x128xf32, #tpu.memory_space<vmem>>, %arg7: memref<1x32x128xf32, #tpu.memory_space<vmem>>, %arg8: memref<1x1x128xf32, #tpu.memory_space<vmem>>, %arg9: memref<1x32x16xf32, #tpu.memory_space<vmem>>, %arg10: memref<1x16x128xf32, #tpu.memory_space<vmem>>, %arg11: memref<1x32x128xf32, #tpu.memory_space<vmem>>, %arg12: memref<1x1x128xf32, #tpu.memory_space<vmem>>, %arg13: memref<1x32x128xf32, #tpu.memory_space<vmem>>, %arg14: memref<1x32x128xf32, #tpu.memory_space<vmem>>, %arg15: memref<1x1x128xf32, #tpu.memory_space<vmem>>, %arg16: memref<1x32x32xf32, #tpu.memory_space<vmem>>, %arg17: memref<1x1x32xf32, #tpu.memory_space<vmem>>, %arg18: memref<1x8x4x32xf32, #tpu.memory_space<vmem>>, %arg19: memref<32x128xf32, #tpu.memory_space<vmem>>) attributes {dimension_semantics = [#tpu.dimension_semantics<parallel>], iteration_bounds = array<i64: 6>, scalar_prefetch = 0 : i64, scratch_operands = 1 : i64, tpu.core_type = #tpu.core_type<tc>, window_params = [{pipeline_mode = #tpu.pipeline_mode<synchronous>, transform_indices = @transform_0, window_bounds = array<i64: 32, 32>}, {transform_indices = @transform_1, window_bounds = array<i64: 1, 32, 16>}, {transform_indices = @transform_2, window_bounds = array<i64: 1, 16, 128>}, {transform_indices = @transform_3, window_bounds = array<i64: 1, 32, 128>}, {transform_indices = @transform_4, window_bounds = array<i64: 1, 1, 128>}, {transform_indices = @transform_5, window_bounds = array<i64: 1, 32, 128>}, {transform_indices = @transform_6, window_bounds = array<i64: 1, 32, 128>}, {transform_indices = @transform_7, window_bounds = array<i64: 1, 1, 128>}, {transform_indices = @transform_8, window_bounds = array<i64: 1, 32, 16>}, {transform_indices = @transform_9, window_bounds = array<i64: 1, 16, 128>}, {transform_indices = @transform_10, window_bounds = array<i64: 1, 32, 128>}, {transform_indices = @transform_11, window_bounds = array<i64: 1, 1, 128>}, {transform_indices = @transform_12, window_bounds = array<i64: 1, 32, 128>}, {transform_indices = @transform_13, window_bounds = array<i64: 1, 32, 128>}, {transform_indices = @transform_14, window_bounds = array<i64: 1, 1, 128>}, {transform_indices = @transform_15, window_bounds = array<i64: 1, 32, 32>}, {transform_indices = @transform_16, window_bounds = array<i64: 1, 1, 32>}, {transform_indices = @transform_17, window_bounds = array<i64: 1, 8, 4, 32>}]} {
    %c0 = arith.constant 0 : index
    %c0_0 = arith.constant 0 : index
    %0 = vector.load %arg1[%c0, %c0_0] : memref<32x32xf32, #tpu.memory_space<vmem>>, vector<32x32xf32>
    %c0_1 = arith.constant 0 : index
    %c0_2 = arith.constant 0 : index
    %c0_3 = arith.constant 0 : index
    %1 = vector.load %arg2[%c0_1, %c0_2, %c0_3] : memref<1x32x16xf32, #tpu.memory_space<vmem>>, vector<1x32x16xf32>
    %2 = vector.shape_cast %1 : vector<1x32x16xf32> to vector<32x16xf32>
    %cst = arith.constant dense<0.000000e+00> : vector<32x16xf32>
    %3 = tpu.matmul %0, %2, %cst {dimension_numbers = #tpu.dot_dimension_numbers<[1], [0], [0], [1], [0, 0, 1, 1], [], []>} : vector<32x32xf32>, vector<32x16xf32>, vector<32x16xf32> -> vector<32x16xf32>
    %c0_4 = arith.constant 0 : index
    %c0_5 = arith.constant 0 : index
    %c0_6 = arith.constant 0 : index
    %4 = vector.load %arg3[%c0_4, %c0_5, %c0_6] : memref<1x16x128xf32, #tpu.memory_space<vmem>>, vector<1x16x128xf32>
    %5 = vector.shape_cast %4 : vector<1x16x128xf32> to vector<16x128xf32>
    %cst_7 = arith.constant dense<0.000000e+00> : vector<32x128xf32>
    %6 = tpu.matmul %3, %5, %cst_7 {dimension_numbers = #tpu.dot_dimension_numbers<[1], [0], [0], [1], [0, 0, 1, 1], [], []>} : vector<32x16xf32>, vector<16x128xf32>, vector<32x128xf32> -> vector<32x128xf32>
    %c0_8 = arith.constant 0 : index
    %c0_9 = arith.constant 0 : index
    %c0_10 = arith.constant 0 : index
    %7 = vector.load %arg5[%c0_8, %c0_9, %c0_10] : memref<1x1x128xf32, #tpu.memory_space<vmem>>, vector<1x1x128xf32>
    %8 = vector.shape_cast %7 : vector<1x1x128xf32> to vector<1x128xf32>
    %9 = vector.broadcast %8 : vector<1x128xf32> to vector<32x128xf32>
    %10 = arith.addf %6, %9 : vector<32x128xf32>
    %c0_11 = arith.constant 0 : index
    %c0_12 = arith.constant 0 : index
    %11 = vector.load %arg19[%c0_11, %c0_12] : memref<32x128xf32, #tpu.memory_space<vmem>>, vector<32x128xf32>
    tpu.vector_store %arg19[%c0_11, %c0_12], %10 {strides = array<i32>} : memref<32x128xf32, #tpu.memory_space<vmem>>, vector<32x128xf32>,
    %c0_13 = arith.constant 0 : index
    %c0_14 = arith.constant 0 : index
    %c0_15 = arith.constant 0 : index
    %12 = vector.load %arg4[%c0_13, %c0_14, %c0_15] : memref<1x32x128xf32, #tpu.memory_space<vmem>>, vector<1x32x128xf32>
    %13 = vector.shape_cast %12 : vector<1x32x128xf32> to vector<32x128xf32>
    %cst_16 = arith.constant 0.000000e+00 : f32
    %14 = vector.broadcast %cst_16 : f32 to vector<4x32xf32>
    %cst_17 = arith.constant 0.000000e+00 : f32
    %15 = vector.broadcast %cst_17 : f32 to vector<4x32xf32>
    %c0_18 = arith.constant 0 : index
    %c0_19 = arith.constant 0 : index
    %16 = vector.load %arg19[%c0_18, %c0_19] : memref<32x128xf32, #tpu.memory_space<vmem>>, vector<4x128xf32>
    %cst_20 = arith.constant dense<0.000000e+00> : vector<4x128xf32>
    %17 = tpu.matmul %14, %13, %cst_20 {dimension_numbers = #tpu.dot_dimension_numbers<[1], [0], [0], [1], [0, 0, 1, 1], [], []>} : vector<4x32xf32>, vector<32x128xf32>, vector<4x128xf32> -> vector<4x128xf32>
    %18 = arith.addf %16, %17 : vector<4x128xf32>
    %19 = vector.extract_strided_slice %18 {offsets = [0, 0], sizes = [4, 32], strides = [1, 1]} : vector<4x128xf32> to vector<4x32xf32>
    %cst_21 = arith.constant 5.000000e-01 : f32
    %20 = vector.broadcast %cst_21 : f32 to vector<4x32xf32>
    %21 = arith.mulf %20, %19 : vector<4x32xf32>
    %22 = math.tanh %21 : vector<4x32xf32>
    %cst_22 = arith.constant 5.000000e-01 : f32
    %23 = vector.broadcast %cst_22 : f32 to vector<4x32xf32>
    %24 = arith.mulf %23, %22 : vector<4x32xf32>
    %cst_23 = arith.constant 5.000000e-01 : f32
    %25 = vector.broadcast %cst_23 : f32 to vector<4x32xf32>
    %26 = arith.addf %24, %25 : vector<4x32xf32>
    %27 = vector.extract_strided_slice %18 {offsets = [0, 32], sizes = [4, 32], strides = [1, 1]} : vector<4x128xf32> to vector<4x32xf32>
    %cst_24 = arith.constant 5.000000e-01 : f32
    %28 = vector.broadcast %cst_24 : f32 to vector<4x32xf32>
    %29 = arith.mulf %28, %27 : vector<4x32xf32>
    %30 = math.tanh %29 : vector<4x32xf32>
    %cst_25 = arith.constant 5.000000e-01 : f32
    %31 = vector.broadcast %cst_25 : f32 to vector<4x32xf32>
    %32 = arith.mulf %31, %30 : vector<4x32xf32>
    %cst_26 = arith.constant 5.000000e-01 : f32
    %33 = vector.broadcast %cst_26 : f32 to vector<4x32xf32>
    %34 = arith.addf %32, %33 : vector<4x32xf32>
    %35 = vector.extract_strided_slice %18 {offsets = [0, 64], sizes = [4, 32], strides = [1, 1]} : vector<4x128xf32> to vector<4x32xf32>
    %36 = math.tanh %35 : vector<4x32xf32>
    %37 = vector.extract_strided_slice %18 {offsets = [0, 96], sizes = [4, 32], strides = [1, 1]} : vector<4x128xf32> to vector<4x32xf32>
    %cst_27 = arith.constant 5.000000e-01 : f32
    %38 = vector.broadcast %cst_27 : f32 to vector<4x32xf32>
    %39 = arith.mulf %38, %37 : vector<4x32xf32>
    %40 = math.tanh %39 : vector<4x32xf32>
    %cst_28 = arith.constant 5.000000e-01 : f32
    %41 = vector.broadcast %cst_28 : f32 to vector<4x32xf32>
    %42 = arith.mulf %41, %40 : vector<4x32xf32>
    %cst_29 = arith.constant 5.000000e-01 : f32
    %43 = vector.broadcast %cst_29 : f32 to vector<4x32xf32>
    %44 = arith.addf %42, %43 : vector<4x32xf32>
    %45 = arith.mulf %34, %15 : vector<4x32xf32>
    %46 = arith.mulf %26, %36 : vector<4x32xf32>
    %47 = arith.addf %45, %46 : vector<4x32xf32>
    %48 = math.tanh %47 : vector<4x32xf32>
    %49 = arith.mulf %44, %48 : vector<4x32xf32>
    %c4 = arith.constant 4 : index
    %c0_30 = arith.constant 0 : index
    %50 = vector.load %arg19[%c4, %c0_30] : memref<32x128xf32, #tpu.memory_space<vmem>>, vector<4x128xf32>
    %cst_31 = arith.constant dense<0.000000e+00> : vector<4x128xf32>
    %51 = tpu.matmul %49, %13, %cst_31 {dimension_numbers = #tpu.dot_dimension_numbers<[1], [0], [0], [1], [0, 0, 1, 1], [], []>} : vector<4x32xf32>, vector<32x128xf32>, vector<4x128xf32> -> vector<4x128xf32>
    %52 = arith.addf %50, %51 : vector<4x128xf32>
    %53 = vector.extract_strided_slice %52 {offsets = [0, 0], sizes = [4, 32], strides = [1, 1]} : vector<4x128xf32> to vector<4x32xf32>
    %cst_32 = arith.constant 5.000000e-01 : f32
    %54 = vector.broadcast %cst_32 : f32 to vector<4x32xf32>
    %55 = arith.mulf %54, %53 : vector<4x32xf32>
    %56 = math.tanh %55 : vector<4x32xf32>
    %cst_33 = arith.constant 5.000000e-01 : f32
    %57 = vector.broadcast %cst_33 : f32 to vector<4x32xf32>
    %58 = arith.mulf %57, %56 : vector<4x32xf32>
    %cst_34 = arith.constant 5.000000e-01 : f32
    %59 = vector.broadcast %cst_34 : f32 to vector<4x32xf32>
    %60 = arith.addf %58, %59 : vector<4x32xf32>
    %61 = vector.extract_strided_slice %52 {offsets = [0, 32], sizes = [4, 32], strides = [1, 1]} : vector<4x128xf32> to vector<4x32xf32>
    %cst_35 = arith.constant 5.000000e-01 : f32
    %62 = vector.broadcast %cst_35 : f32 to vector<4x32xf32>
    %63 = arith.mulf %62, %61 : vector<4x32xf32>
    %64 = math.tanh %63 : vector<4x32xf32>
    %cst_36 = arith.constant 5.000000e-01 : f32
    %65 = vector.broadcast %cst_36 : f32 to vector<4x32xf32>
    %66 = arith.mulf %65, %64 : vector<4x32xf32>
    %cst_37 = arith.constant 5.000000e-01 : f32
    %67 = vector.broadcast %cst_37 : f32 to vector<4x32xf32>
    %68 = arith.addf %66, %67 : vector<4x32xf32>
    %69 = vector.extract_strided_slice %52 {offsets = [0, 64], sizes = [4, 32], strides = [1, 1]} : vector<4x128xf32> to vector<4x32xf32>
    %70 = math.tanh %69 : vector<4x32xf32>
    %71 = vector.extract_strided_slice %52 {offsets = [0, 96], sizes = [4, 32], strides = [1, 1]} : vector<4x128xf32> to vector<4x32xf32>
    %cst_38 = arith.constant 5.000000e-01 : f32
    %72 = vector.broadcast %cst_38 : f32 to vector<4x32xf32>
    %73 = arith.mulf %72, %71 : vector<4x32xf32>
    %74 = math.tanh %73 : vector<4x32xf32>
    %cst_39 = arith.constant 5.000000e-01 : f32
    %75 = vector.broadcast %cst_39 : f32 to vector<4x32xf32>
    %76 = arith.mulf %75, %74 : vector<4x32xf32>
    %cst_40 = arith.constant 5.000000e-01 : f32
    %77 = vector.broadcast %cst_40 : f32 to vector<4x32xf32>
    %78 = arith.addf %76, %77 : vector<4x32xf32>
    %79 = arith.mulf %68, %47 : vector<4x32xf32>
    %80 = arith.mulf %60, %70 : vector<4x32xf32>
    %81 = arith.addf %79, %80 : vector<4x32xf32>
    %82 = math.tanh %81 : vector<4x32xf32>
    %83 = arith.mulf %78, %82 : vector<4x32xf32>
    %c8 = arith.constant 8 : index
    %c0_41 = arith.constant 0 : index
    %84 = vector.load %arg19[%c8, %c0_41] : memref<32x128xf32, #tpu.memory_space<vmem>>, vector<4x128xf32>
    %cst_42 = arith.constant dense<0.000000e+00> : vector<4x128xf32>
    %85 = tpu.matmul %83, %13, %cst_42 {dimension_numbers = #tpu.dot_dimension_numbers<[1], [0], [0], [1], [0, 0, 1, 1], [], []>} : vector<4x32xf32>, vector<32x128xf32>, vector<4x128xf32> -> vector<4x128xf32>
    %86 = arith.addf %84, %85 : vector<4x128xf32>
    %87 = vector.extract_strided_slice %86 {offsets = [0, 0], sizes = [4, 32], strides = [1, 1]} : vector<4x128xf32> to vector<4x32xf32>
    %cst_43 = arith.constant 5.000000e-01 : f32
    %88 = vector.broadcast %cst_43 : f32 to vector<4x32xf32>
    %89 = arith.mulf %88, %87 : vector<4x32xf32>
    %90 = math.tanh %89 : vector<4x32xf32>
    %cst_44 = arith.constant 5.000000e-01 : f32
    %91 = vector.broadcast %cst_44 : f32 to vector<4x32xf32>
    %92 = arith.mulf %91, %90 : vector<4x32xf32>
    %cst_45 = arith.constant 5.000000e-01 : f32
    %93 = vector.broadcast %cst_45 : f32 to vector<4x32xf32>
    %94 = arith.addf %92, %93 : vector<4x32xf32>
    %95 = vector.extract_strided_slice %86 {offsets = [0, 32], sizes = [4, 32], strides = [1, 1]} : vector<4x128xf32> to vector<4x32xf32>
    %cst_46 = arith.constant 5.000000e-01 : f32
    %96 = vector.broadcast %cst_46 : f32 to vector<4x32xf32>
    %97 = arith.mulf %96, %95 : vector<4x32xf32>
    %98 = math.tanh %97 : vector<4x32xf32>
    %cst_47 = arith.constant 5.000000e-01 : f32
    %99 = vector.broadcast %cst_47 : f32 to vector<4x32xf32>
    %100 = arith.mulf %99, %98 : vector<4x32xf32>
    %cst_48 = arith.constant 5.000000e-01 : f32
    %101 = vector.broadcast %cst_48 : f32 to vector<4x32xf32>
    %102 = arith.addf %100, %101 : vector<4x32xf32>
    %103 = vector.extract_strided_slice %86 {offsets = [0, 64], sizes = [4, 32], strides = [1, 1]} : vector<4x128xf32> to vector<4x32xf32>
    %104 = math.tanh %103 : vector<4x32xf32>
    %105 = vector.extract_strided_slice %86 {offsets = [0, 96], sizes = [4, 32], strides = [1, 1]} : vector<4x128xf32> to vector<4x32xf32>
    %cst_49 = arith.constant 5.000000e-01 : f32
    %106 = vector.broadcast %cst_49 : f32 to vector<4x32xf32>
    %107 = arith.mulf %106, %105 : vector<4x32xf32>
    %108 = math.tanh %107 : vector<4x32xf32>
    %cst_50 = arith.constant 5.000000e-01 : f32
    %109 = vector.broadcast %cst_50 : f32 to vector<4x32xf32>
    %110 = arith.mulf %109, %108 : vector<4x32xf32>
    %cst_51 = arith.constant 5.000000e-01 : f32
    %111 = vector.broadcast %cst_51 : f32 to vector<4x32xf32>
    %112 = arith.addf %110, %111 : vector<4x32xf32>
    %113 = arith.mulf %102, %81 : vector<4x32xf32>
    %114 = arith.mulf %94, %104 : vector<4x32xf32>
    %115 = arith.addf %113, %114 : vector<4x32xf32>
    %116 = math.tanh %115 : vector<4x32xf32>
    %117 = arith.mulf %112, %116 : vector<4x32xf32>
    %c12 = arith.constant 12 : index
    %c0_52 = arith.constant 0 : index
    %118 = vector.load %arg19[%c12, %c0_52] : memref<32x128xf32, #tpu.memory_space<vmem>>, vector<4x128xf32>
    %cst_53 = arith.constant dense<0.000000e+00> : vector<4x128xf32>
    %119 = tpu.matmul %117, %13, %cst_53 {dimension_numbers = #tpu.dot_dimension_numbers<[1], [0], [0], [1], [0, 0, 1, 1], [], []>} : vector<4x32xf32>, vector<32x128xf32>, vector<4x128xf32> -> vector<4x128xf32>
    %120 = arith.addf %118, %119 : vector<4x128xf32>
    %121 = vector.extract_strided_slice %120 {offsets = [0, 0], sizes = [4, 32], strides = [1, 1]} : vector<4x128xf32> to vector<4x32xf32>
    %cst_54 = arith.constant 5.000000e-01 : f32
    %122 = vector.broadcast %cst_54 : f32 to vector<4x32xf32>
    %123 = arith.mulf %122, %121 : vector<4x32xf32>
    %124 = math.tanh %123 : vector<4x32xf32>
    %cst_55 = arith.constant 5.000000e-01 : f32
    %125 = vector.broadcast %cst_55 : f32 to vector<4x32xf32>
    %126 = arith.mulf %125, %124 : vector<4x32xf32>
    %cst_56 = arith.constant 5.000000e-01 : f32
    %127 = vector.broadcast %cst_56 : f32 to vector<4x32xf32>
    %128 = arith.addf %126, %127 : vector<4x32xf32>
    %129 = vector.extract_strided_slice %120 {offsets = [0, 32], sizes = [4, 32], strides = [1, 1]} : vector<4x128xf32> to vector<4x32xf32>
    %cst_57 = arith.constant 5.000000e-01 : f32
    %130 = vector.broadcast %cst_57 : f32 to vector<4x32xf32>
    %131 = arith.mulf %130, %129 : vector<4x32xf32>
    %132 = math.tanh %131 : vector<4x32xf32>
    %cst_58 = arith.constant 5.000000e-01 : f32
    %133 = vector.broadcast %cst_58 : f32 to vector<4x32xf32>
    %134 = arith.mulf %133, %132 : vector<4x32xf32>
    %cst_59 = arith.constant 5.000000e-01 : f32
    %135 = vector.broadcast %cst_59 : f32 to vector<4x32xf32>
    %136 = arith.addf %134, %135 : vector<4x32xf32>
    %137 = vector.extract_strided_slice %120 {offsets = [0, 64], sizes = [4, 32], strides = [1, 1]} : vector<4x128xf32> to vector<4x32xf32>
    %138 = math.tanh %137 : vector<4x32xf32>
    %139 = vector.extract_strided_slice %120 {offsets = [0, 96], sizes = [4, 32], strides = [1, 1]} : vector<4x128xf32> to vector<4x32xf32>
    %cst_60 = arith.constant 5.000000e-01 : f32
    %140 = vector.broadcast %cst_60 : f32 to vector<4x32xf32>
    %141 = arith.mulf %140, %139 : vector<4x32xf32>
    %142 = math.tanh %141 : vector<4x32xf32>
    %cst_61 = arith.constant 5.000000e-01 : f32
    %143 = vector.broadcast %cst_61 : f32 to vector<4x32xf32>
    %144 = arith.mulf %143, %142 : vector<4x32xf32>
    %cst_62 = arith.constant 5.000000e-01 : f32
    %145 = vector.broadcast %cst_62 : f32 to vector<4x32xf32>
    %146 = arith.addf %144, %145 : vector<4x32xf32>
    %147 = arith.mulf %136, %115 : vector<4x32xf32>
    %148 = arith.mulf %128, %138 : vector<4x32xf32>
    %149 = arith.addf %147, %148 : vector<4x32xf32>
    %150 = math.tanh %149 : vector<4x32xf32>
    %151 = arith.mulf %146, %150 : vector<4x32xf32>
    %c16 = arith.constant 16 : index
    %c0_63 = arith.constant 0 : index
    %152 = vector.load %arg19[%c16, %c0_63] : memref<32x128xf32, #tpu.memory_space<vmem>>, vector<4x128xf32>
    %cst_64 = arith.constant dense<0.000000e+00> : vector<4x128xf32>
    %153 = tpu.matmul %151, %13, %cst_64 {dimension_numbers = #tpu.dot_dimension_numbers<[1], [0], [0], [1], [0, 0, 1, 1], [], []>} : vector<4x32xf32>, vector<32x128xf32>, vector<4x128xf32> -> vector<4x128xf32>
    %154 = arith.addf %152, %153 : vector<4x128xf32>
    %155 = vector.extract_strided_slice %154 {offsets = [0, 0], sizes = [4, 32], strides = [1, 1]} : vector<4x128xf32> to vector<4x32xf32>
    %cst_65 = arith.constant 5.000000e-01 : f32
    %156 = vector.broadcast %cst_65 : f32 to vector<4x32xf32>
    %157 = arith.mulf %156, %155 : vector<4x32xf32>
    %158 = math.tanh %157 : vector<4x32xf32>
    %cst_66 = arith.constant 5.000000e-01 : f32
    %159 = vector.broadcast %cst_66 : f32 to vector<4x32xf32>
    %160 = arith.mulf %159, %158 : vector<4x32xf32>
    %cst_67 = arith.constant 5.000000e-01 : f32
    %161 = vector.broadcast %cst_67 : f32 to vector<4x32xf32>
    %162 = arith.addf %160, %161 : vector<4x32xf32>
    %163 = vector.extract_strided_slice %154 {offsets = [0, 32], sizes = [4, 32], strides = [1, 1]} : vector<4x128xf32> to vector<4x32xf32>
    %cst_68 = arith.constant 5.000000e-01 : f32
    %164 = vector.broadcast %cst_68 : f32 to vector<4x32xf32>
    %165 = arith.mulf %164, %163 : vector<4x32xf32>
    %166 = math.tanh %165 : vector<4x32xf32>
    %cst_69 = arith.constant 5.000000e-01 : f32
    %167 = vector.broadcast %cst_69 : f32 to vector<4x32xf32>
    %168 = arith.mulf %167, %166 : vector<4x32xf32>
    %cst_70 = arith.constant 5.000000e-01 : f32
    %169 = vector.broadcast %cst_70 : f32 to vector<4x32xf32>
    %170 = arith.addf %168, %169 : vector<4x32xf32>
    %171 = vector.extract_strided_slice %154 {offsets = [0, 64], sizes = [4, 32], strides = [1, 1]} : vector<4x128xf32> to vector<4x32xf32>
    %172 = math.tanh %171 : vector<4x32xf32>
    %173 = vector.extract_strided_slice %154 {offsets = [0, 96], sizes = [4, 32], strides = [1, 1]} : vector<4x128xf32> to vector<4x32xf32>
    %cst_71 = arith.constant 5.000000e-01 : f32
    %174 = vector.broadcast %cst_71 : f32 to vector<4x32xf32>
    %175 = arith.mulf %174, %173 : vector<4x32xf32>
    %176 = math.tanh %175 : vector<4x32xf32>
    %cst_72 = arith.constant 5.000000e-01 : f32
    %177 = vector.broadcast %cst_72 : f32 to vector<4x32xf32>
    %178 = arith.mulf %177, %176 : vector<4x32xf32>
    %cst_73 = arith.constant 5.000000e-01 : f32
    %179 = vector.broadcast %cst_73 : f32 to vector<4x32xf32>
    %180 = arith.addf %178, %179 : vector<4x32xf32>
    %181 = arith.mulf %170, %149 : vector<4x32xf32>
    %182 = arith.mulf %162, %172 : vector<4x32xf32>
    %183 = arith.addf %181, %182 : vector<4x32xf32>
    %184 = math.tanh %183 : vector<4x32xf32>
    %185 = arith.mulf %180, %184 : vector<4x32xf32>
    %c20 = arith.constant 20 : index
    %c0_74 = arith.constant 0 : index
    %186 = vector.load %arg19[%c20, %c0_74] : memref<32x128xf32, #tpu.memory_space<vmem>>, vector<4x128xf32>
    %cst_75 = arith.constant dense<0.000000e+00> : vector<4x128xf32>
    %187 = tpu.matmul %185, %13, %cst_75 {dimension_numbers = #tpu.dot_dimension_numbers<[1], [0], [0], [1], [0, 0, 1, 1], [], []>} : vector<4x32xf32>, vector<32x128xf32>, vector<4x128xf32> -> vector<4x128xf32>
    %188 = arith.addf %186, %187 : vector<4x128xf32>
    %189 = vector.extract_strided_slice %188 {offsets = [0, 0], sizes = [4, 32], strides = [1, 1]} : vector<4x128xf32> to vector<4x32xf32>
    %cst_76 = arith.constant 5.000000e-01 : f32
    %190 = vector.broadcast %cst_76 : f32 to vector<4x32xf32>
    %191 = arith.mulf %190, %189 : vector<4x32xf32>
    %192 = math.tanh %191 : vector<4x32xf32>
    %cst_77 = arith.constant 5.000000e-01 : f32
    %193 = vector.broadcast %cst_77 : f32 to vector<4x32xf32>
    %194 = arith.mulf %193, %192 : vector<4x32xf32>
    %cst_78 = arith.constant 5.000000e-01 : f32
    %195 = vector.broadcast %cst_78 : f32 to vector<4x32xf32>
    %196 = arith.addf %194, %195 : vector<4x32xf32>
    %197 = vector.extract_strided_slice %188 {offsets = [0, 32], sizes = [4, 32], strides = [1, 1]} : vector<4x128xf32> to vector<4x32xf32>
    %cst_79 = arith.constant 5.000000e-01 : f32
    %198 = vector.broadcast %cst_79 : f32 to vector<4x32xf32>
    %199 = arith.mulf %198, %197 : vector<4x32xf32>
    %200 = math.tanh %199 : vector<4x32xf32>
    %cst_80 = arith.constant 5.000000e-01 : f32
    %201 = vector.broadcast %cst_80 : f32 to vector<4x32xf32>
    %202 = arith.mulf %201, %200 : vector<4x32xf32>
    %cst_81 = arith.constant 5.000000e-01 : f32
    %203 = vector.broadcast %cst_81 : f32 to vector<4x32xf32>
    %204 = arith.addf %202, %203 : vector<4x32xf32>
    %205 = vector.extract_strided_slice %188 {offsets = [0, 64], sizes = [4, 32], strides = [1, 1]} : vector<4x128xf32> to vector<4x32xf32>
    %206 = math.tanh %205 : vector<4x32xf32>
    %207 = vector.extract_strided_slice %188 {offsets = [0, 96], sizes = [4, 32], strides = [1, 1]} : vector<4x128xf32> to vector<4x32xf32>
    %cst_82 = arith.constant 5.000000e-01 : f32
    %208 = vector.broadcast %cst_82 : f32 to vector<4x32xf32>
    %209 = arith.mulf %208, %207 : vector<4x32xf32>
    %210 = math.tanh %209 : vector<4x32xf32>
    %cst_83 = arith.constant 5.000000e-01 : f32
    %211 = vector.broadcast %cst_83 : f32 to vector<4x32xf32>
    %212 = arith.mulf %211, %210 : vector<4x32xf32>
    %cst_84 = arith.constant 5.000000e-01 : f32
    %213 = vector.broadcast %cst_84 : f32 to vector<4x32xf32>
    %214 = arith.addf %212, %213 : vector<4x32xf32>
    %215 = arith.mulf %204, %183 : vector<4x32xf32>
    %216 = arith.mulf %196, %206 : vector<4x32xf32>
    %217 = arith.addf %215, %216 : vector<4x32xf32>
    %218 = math.tanh %217 : vector<4x32xf32>
    %219 = arith.mulf %214, %218 : vector<4x32xf32>
    %c24 = arith.constant 24 : index
    %c0_85 = arith.constant 0 : index
    %220 = vector.load %arg19[%c24, %c0_85] : memref<32x128xf32, #tpu.memory_space<vmem>>, vector<4x128xf32>
    %cst_86 = arith.constant dense<0.000000e+00> : vector<4x128xf32>
    %221 = tpu.matmul %219, %13, %cst_86 {dimension_numbers = #tpu.dot_dimension_numbers<[1], [0], [0], [1], [0, 0, 1, 1], [], []>} : vector<4x32xf32>, vector<32x128xf32>, vector<4x128xf32> -> vector<4x128xf32>
    %222 = arith.addf %220, %221 : vector<4x128xf32>
    %223 = vector.extract_strided_slice %222 {offsets = [0, 0], sizes = [4, 32], strides = [1, 1]} : vector<4x128xf32> to vector<4x32xf32>
    %cst_87 = arith.constant 5.000000e-01 : f32
    %224 = vector.broadcast %cst_87 : f32 to vector<4x32xf32>
    %225 = arith.mulf %224, %223 : vector<4x32xf32>
    %226 = math.tanh %225 : vector<4x32xf32>
    %cst_88 = arith.constant 5.000000e-01 : f32
    %227 = vector.broadcast %cst_88 : f32 to vector<4x32xf32>
    %228 = arith.mulf %227, %226 : vector<4x32xf32>
    %cst_89 = arith.constant 5.000000e-01 : f32
    %229 = vector.broadcast %cst_89 : f32 to vector<4x32xf32>
    %230 = arith.addf %228, %229 : vector<4x32xf32>
    %231 = vector.extract_strided_slice %222 {offsets = [0, 32], sizes = [4, 32], strides = [1, 1]} : vector<4x128xf32> to vector<4x32xf32>
    %cst_90 = arith.constant 5.000000e-01 : f32
    %232 = vector.broadcast %cst_90 : f32 to vector<4x32xf32>
    %233 = arith.mulf %232, %231 : vector<4x32xf32>
    %234 = math.tanh %233 : vector<4x32xf32>
    %cst_91 = arith.constant 5.000000e-01 : f32
    %235 = vector.broadcast %cst_91 : f32 to vector<4x32xf32>
    %236 = arith.mulf %235, %234 : vector<4x32xf32>
    %cst_92 = arith.constant 5.000000e-01 : f32
    %237 = vector.broadcast %cst_92 : f32 to vector<4x32xf32>
    %238 = arith.addf %236, %237 : vector<4x32xf32>
    %239 = vector.extract_strided_slice %222 {offsets = [0, 64], sizes = [4, 32], strides = [1, 1]} : vector<4x128xf32> to vector<4x32xf32>
    %240 = math.tanh %239 : vector<4x32xf32>
    %241 = vector.extract_strided_slice %222 {offsets = [0, 96], sizes = [4, 32], strides = [1, 1]} : vector<4x128xf32> to vector<4x32xf32>
    %cst_93 = arith.constant 5.000000e-01 : f32
    %242 = vector.broadcast %cst_93 : f32 to vector<4x32xf32>
    %243 = arith.mulf %242, %241 : vector<4x32xf32>
    %244 = math.tanh %243 : vector<4x32xf32>
    %cst_94 = arith.constant 5.000000e-01 : f32
    %245 = vector.broadcast %cst_94 : f32 to vector<4x32xf32>
    %246 = arith.mulf %245, %244 : vector<4x32xf32>
    %cst_95 = arith.constant 5.000000e-01 : f32
    %247 = vector.broadcast %cst_95 : f32 to vector<4x32xf32>
    %248 = arith.addf %246, %247 : vector<4x32xf32>
    %249 = arith.mulf %238, %217 : vector<4x32xf32>
    %250 = arith.mulf %230, %240 : vector<4x32xf32>
    %251 = arith.addf %249, %250 : vector<4x32xf32>
    %252 = math.tanh %251 : vector<4x32xf32>
    %253 = arith.mulf %248, %252 : vector<4x32xf32>
    %c28 = arith.constant 28 : index
    %c0_96 = arith.constant 0 : index
    %254 = vector.load %arg19[%c28, %c0_96] : memref<32x128xf32, #tpu.memory_space<vmem>>, vector<4x128xf32>
    %cst_97 = arith.constant dense<0.000000e+00> : vector<4x128xf32>
    %255 = tpu.matmul %253, %13, %cst_97 {dimension_numbers = #tpu.dot_dimension_numbers<[1], [0], [0], [1], [0, 0, 1, 1], [], []>} : vector<4x32xf32>, vector<32x128xf32>, vector<4x128xf32> -> vector<4x128xf32>
    %256 = arith.addf %254, %255 : vector<4x128xf32>
    %257 = vector.extract_strided_slice %256 {offsets = [0, 0], sizes = [4, 32], strides = [1, 1]} : vector<4x128xf32> to vector<4x32xf32>
    %cst_98 = arith.constant 5.000000e-01 : f32
    %258 = vector.broadcast %cst_98 : f32 to vector<4x32xf32>
    %259 = arith.mulf %258, %257 : vector<4x32xf32>
    %260 = math.tanh %259 : vector<4x32xf32>
    %cst_99 = arith.constant 5.000000e-01 : f32
    %261 = vector.broadcast %cst_99 : f32 to vector<4x32xf32>
    %262 = arith.mulf %261, %260 : vector<4x32xf32>
    %cst_100 = arith.constant 5.000000e-01 : f32
    %263 = vector.broadcast %cst_100 : f32 to vector<4x32xf32>
    %264 = arith.addf %262, %263 : vector<4x32xf32>
    %265 = vector.extract_strided_slice %256 {offsets = [0, 32], sizes = [4, 32], strides = [1, 1]} : vector<4x128xf32> to vector<4x32xf32>
    %cst_101 = arith.constant 5.000000e-01 : f32
    %266 = vector.broadcast %cst_101 : f32 to vector<4x32xf32>
    %267 = arith.mulf %266, %265 : vector<4x32xf32>
    %268 = math.tanh %267 : vector<4x32xf32>
    %cst_102 = arith.constant 5.000000e-01 : f32
    %269 = vector.broadcast %cst_102 : f32 to vector<4x32xf32>
    %270 = arith.mulf %269, %268 : vector<4x32xf32>
    %cst_103 = arith.constant 5.000000e-01 : f32
    %271 = vector.broadcast %cst_103 : f32 to vector<4x32xf32>
    %272 = arith.addf %270, %271 : vector<4x32xf32>
    %273 = vector.extract_strided_slice %256 {offsets = [0, 64], sizes = [4, 32], strides = [1, 1]} : vector<4x128xf32> to vector<4x32xf32>
    %274 = math.tanh %273 : vector<4x32xf32>
    %275 = vector.extract_strided_slice %256 {offsets = [0, 96], sizes = [4, 32], strides = [1, 1]} : vector<4x128xf32> to vector<4x32xf32>
    %cst_104 = arith.constant 5.000000e-01 : f32
    %276 = vector.broadcast %cst_104 : f32 to vector<4x32xf32>
    %277 = arith.mulf %276, %275 : vector<4x32xf32>
    %278 = math.tanh %277 : vector<4x32xf32>
    %cst_105 = arith.constant 5.000000e-01 : f32
    %279 = vector.broadcast %cst_105 : f32 to vector<4x32xf32>
    %280 = arith.mulf %279, %278 : vector<4x32xf32>
    %cst_106 = arith.constant 5.000000e-01 : f32
    %281 = vector.broadcast %cst_106 : f32 to vector<4x32xf32>
    %282 = arith.addf %280, %281 : vector<4x32xf32>
    %283 = arith.mulf %272, %251 : vector<4x32xf32>
    %284 = arith.mulf %264, %274 : vector<4x32xf32>
    %285 = arith.addf %283, %284 : vector<4x32xf32>
    %286 = math.tanh %285 : vector<4x32xf32>
    %287 = arith.mulf %282, %286 : vector<4x32xf32>
    %c0_107 = arith.constant 0 : index
    %c0_108 = arith.constant 0 : index
    %c0_109 = arith.constant 0 : index
    %288 = vector.load %arg6[%c0_107, %c0_108, %c0_109] : memref<1x32x128xf32, #tpu.memory_space<vmem>>, vector<1x32x128xf32>
    %289 = vector.shape_cast %288 : vector<1x32x128xf32> to vector<32x128xf32>
    %c0_110 = arith.constant 0 : index
    %c0_111 = arith.constant 0 : index
    %c0_112 = arith.constant 0 : index
    %290 = vector.load %arg7[%c0_110, %c0_111, %c0_112] : memref<1x32x128xf32, #tpu.memory_space<vmem>>, vector<1x32x128xf32>
    %291 = vector.shape_cast %290 : vector<1x32x128xf32> to vector<32x128xf32>
    %c0_113 = arith.constant 0 : index
    %c0_114 = arith.constant 0 : index
    %c0_115 = arith.constant 0 : index
    %292 = vector.load %arg8[%c0_113, %c0_114, %c0_115] : memref<1x1x128xf32, #tpu.memory_space<vmem>>, vector<1x1x128xf32>
    %293 = vector.shape_cast %292 : vector<1x1x128xf32> to vector<1x128xf32>
    %294 = vector.shape_cast %293 : vector<1x128xf32> to vector<1x128xf32>
    %295 = vector.broadcast %294 : vector<1x128xf32> to vector<4x128xf32>
    %cst_116 = arith.constant 0.000000e+00 : f32
    %296 = vector.broadcast %cst_116 : f32 to vector<4x32xf32>
    %cst_117 = arith.constant 0.000000e+00 : f32
    %297 = vector.broadcast %cst_117 : f32 to vector<4x32xf32>
    %cst_118 = arith.constant dense<0.000000e+00> : vector<4x128xf32>
    %298 = tpu.matmul %49, %289, %cst_118 {dimension_numbers = #tpu.dot_dimension_numbers<[1], [0], [0], [1], [0, 0, 1, 1], [], []>} : vector<4x32xf32>, vector<32x128xf32>, vector<4x128xf32> -> vector<4x128xf32>
    %cst_119 = arith.constant dense<0.000000e+00> : vector<4x128xf32>
    %299 = tpu.matmul %296, %291, %cst_119 {dimension_numbers = #tpu.dot_dimension_numbers<[1], [0], [0], [1], [0, 0, 1, 1], [], []>} : vector<4x32xf32>, vector<32x128xf32>, vector<4x128xf32> -> vector<4x128xf32>
    %300 = arith.addf %298, %299 : vector<4x128xf32>
    %301 = arith.addf %300, %295 : vector<4x128xf32>
    %302 = vector.extract_strided_slice %301 {offsets = [0, 0], sizes = [4, 32], strides = [1, 1]} : vector<4x128xf32> to vector<4x32xf32>
    %cst_120 = arith.constant 5.000000e-01 : f32
    %303 = vector.broadcast %cst_120 : f32 to vector<4x32xf32>
    %304 = arith.mulf %303, %302 : vector<4x32xf32>
    %305 = math.tanh %304 : vector<4x32xf32>
    %cst_121 = arith.constant 5.000000e-01 : f32
    %306 = vector.broadcast %cst_121 : f32 to vector<4x32xf32>
    %307 = arith.mulf %306, %305 : vector<4x32xf32>
    %cst_122 = arith.constant 5.000000e-01 : f32
    %308 = vector.broadcast %cst_122 : f32 to vector<4x32xf32>
    %309 = arith.addf %307, %308 : vector<4x32xf32>
    %310 = vector.extract_strided_slice %301 {offsets = [0, 32], sizes = [4, 32], strides = [1, 1]} : vector<4x128xf32> to vector<4x32xf32>
    %cst_123 = arith.constant 5.000000e-01 : f32
    %311 = vector.broadcast %cst_123 : f32 to vector<4x32xf32>
    %312 = arith.mulf %311, %310 : vector<4x32xf32>
    %313 = math.tanh %312 : vector<4x32xf32>
    %cst_124 = arith.constant 5.000000e-01 : f32
    %314 = vector.broadcast %cst_124 : f32 to vector<4x32xf32>
    %315 = arith.mulf %314, %313 : vector<4x32xf32>
    %cst_125 = arith.constant 5.000000e-01 : f32
    %316 = vector.broadcast %cst_125 : f32 to vector<4x32xf32>
    %317 = arith.addf %315, %316 : vector<4x32xf32>
    %318 = vector.extract_strided_slice %301 {offsets = [0, 64], sizes = [4, 32], strides = [1, 1]} : vector<4x128xf32> to vector<4x32xf32>
    %319 = math.tanh %318 : vector<4x32xf32>
    %320 = vector.extract_strided_slice %301 {offsets = [0, 96], sizes = [4, 32], strides = [1, 1]} : vector<4x128xf32> to vector<4x32xf32>
    %cst_126 = arith.constant 5.000000e-01 : f32
    %321 = vector.broadcast %cst_126 : f32 to vector<4x32xf32>
    %322 = arith.mulf %321, %320 : vector<4x32xf32>
    %323 = math.tanh %322 : vector<4x32xf32>
    %cst_127 = arith.constant 5.000000e-01 : f32
    %324 = vector.broadcast %cst_127 : f32 to vector<4x32xf32>
    %325 = arith.mulf %324, %323 : vector<4x32xf32>
    %cst_128 = arith.constant 5.000000e-01 : f32
    %326 = vector.broadcast %cst_128 : f32 to vector<4x32xf32>
    %327 = arith.addf %325, %326 : vector<4x32xf32>
    %328 = arith.mulf %317, %297 : vector<4x32xf32>
    %329 = arith.mulf %309, %319 : vector<4x32xf32>
    %330 = arith.addf %328, %329 : vector<4x32xf32>
    %331 = math.tanh %330 : vector<4x32xf32>
    %332 = arith.mulf %327, %331 : vector<4x32xf32>
    %cst_129 = arith.constant dense<0.000000e+00> : vector<4x128xf32>
    %333 = tpu.matmul %83, %289, %cst_129 {dimension_numbers = #tpu.dot_dimension_numbers<[1], [0], [0], [1], [0, 0, 1, 1], [], []>} : vector<4x32xf32>, vector<32x128xf32>, vector<4x128xf32> -> vector<4x128xf32>
    %cst_130 = arith.constant dense<0.000000e+00> : vector<4x128xf32>
    %334 = tpu.matmul %332, %291, %cst_130 {dimension_numbers = #tpu.dot_dimension_numbers<[1], [0], [0], [1], [0, 0, 1, 1], [], []>} : vector<4x32xf32>, vector<32x128xf32>, vector<4x128xf32> -> vector<4x128xf32>
    %335 = arith.addf %333, %334 : vector<4x128xf32>
    %336 = arith.addf %335, %295 : vector<4x128xf32>
    %337 = vector.extract_strided_slice %336 {offsets = [0, 0], sizes = [4, 32], strides = [1, 1]} : vector<4x128xf32> to vector<4x32xf32>
    %cst_131 = arith.constant 5.000000e-01 : f32
    %338 = vector.broadcast %cst_131 : f32 to vector<4x32xf32>
    %339 = arith.mulf %338, %337 : vector<4x32xf32>
    %340 = math.tanh %339 : vector<4x32xf32>
    %cst_132 = arith.constant 5.000000e-01 : f32
    %341 = vector.broadcast %cst_132 : f32 to vector<4x32xf32>
    %342 = arith.mulf %341, %340 : vector<4x32xf32>
    %cst_133 = arith.constant 5.000000e-01 : f32
    %343 = vector.broadcast %cst_133 : f32 to vector<4x32xf32>
    %344 = arith.addf %342, %343 : vector<4x32xf32>
    %345 = vector.extract_strided_slice %336 {offsets = [0, 32], sizes = [4, 32], strides = [1, 1]} : vector<4x128xf32> to vector<4x32xf32>
    %cst_134 = arith.constant 5.000000e-01 : f32
    %346 = vector.broadcast %cst_134 : f32 to vector<4x32xf32>
    %347 = arith.mulf %346, %345 : vector<4x32xf32>
    %348 = math.tanh %347 : vector<4x32xf32>
    %cst_135 = arith.constant 5.000000e-01 : f32
    %349 = vector.broadcast %cst_135 : f32 to vector<4x32xf32>
    %350 = arith.mulf %349, %348 : vector<4x32xf32>
    %cst_136 = arith.constant 5.000000e-01 : f32
    %351 = vector.broadcast %cst_136 : f32 to vector<4x32xf32>
    %352 = arith.addf %350, %351 : vector<4x32xf32>
    %353 = vector.extract_strided_slice %336 {offsets = [0, 64], sizes = [4, 32], strides = [1, 1]} : vector<4x128xf32> to vector<4x32xf32>
    %354 = math.tanh %353 : vector<4x32xf32>
    %355 = vector.extract_strided_slice %336 {offsets = [0, 96], sizes = [4, 32], strides = [1, 1]} : vector<4x128xf32> to vector<4x32xf32>
    %cst_137 = arith.constant 5.000000e-01 : f32
    %356 = vector.broadcast %cst_137 : f32 to vector<4x32xf32>
    %357 = arith.mulf %356, %355 : vector<4x32xf32>
    %358 = math.tanh %357 : vector<4x32xf32>
    %cst_138 = arith.constant 5.000000e-01 : f32
    %359 = vector.broadcast %cst_138 : f32 to vector<4x32xf32>
    %360 = arith.mulf %359, %358 : vector<4x32xf32>
    %cst_139 = arith.constant 5.000000e-01 : f32
    %361 = vector.broadcast %cst_139 : f32 to vector<4x32xf32>
    %362 = arith.addf %360, %361 : vector<4x32xf32>
    %363 = arith.mulf %352, %330 : vector<4x32xf32>
    %364 = arith.mulf %344, %354 : vector<4x32xf32>
    %365 = arith.addf %363, %364 : vector<4x32xf32>
    %366 = math.tanh %365 : vector<4x32xf32>
    %367 = arith.mulf %362, %366 : vector<4x32xf32>
    %cst_140 = arith.constant dense<0.000000e+00> : vector<4x128xf32>
    %368 = tpu.matmul %117, %289, %cst_140 {dimension_numbers = #tpu.dot_dimension_numbers<[1], [0], [0], [1], [0, 0, 1, 1], [], []>} : vector<4x32xf32>, vector<32x128xf32>, vector<4x128xf32> -> vector<4x128xf32>
    %cst_141 = arith.constant dense<0.000000e+00> : vector<4x128xf32>
    %369 = tpu.matmul %367, %291, %cst_141 {dimension_numbers = #tpu.dot_dimension_numbers<[1], [0], [0], [1], [0, 0, 1, 1], [], []>} : vector<4x32xf32>, vector<32x128xf32>, vector<4x128xf32> -> vector<4x128xf32>
    %370 = arith.addf %368, %369 : vector<4x128xf32>
    %371 = arith.addf %370, %295 : vector<4x128xf32>
    %372 = vector.extract_strided_slice %371 {offsets = [0, 0], sizes = [4, 32], strides = [1, 1]} : vector<4x128xf32> to vector<4x32xf32>
    %cst_142 = arith.constant 5.000000e-01 : f32
    %373 = vector.broadcast %cst_142 : f32 to vector<4x32xf32>
    %374 = arith.mulf %373, %372 : vector<4x32xf32>
    %375 = math.tanh %374 : vector<4x32xf32>
    %cst_143 = arith.constant 5.000000e-01 : f32
    %376 = vector.broadcast %cst_143 : f32 to vector<4x32xf32>
    %377 = arith.mulf %376, %375 : vector<4x32xf32>
    %cst_144 = arith.constant 5.000000e-01 : f32
    %378 = vector.broadcast %cst_144 : f32 to vector<4x32xf32>
    %379 = arith.addf %377, %378 : vector<4x32xf32>
    %380 = vector.extract_strided_slice %371 {offsets = [0, 32], sizes = [4, 32], strides = [1, 1]} : vector<4x128xf32> to vector<4x32xf32>
    %cst_145 = arith.constant 5.000000e-01 : f32
    %381 = vector.broadcast %cst_145 : f32 to vector<4x32xf32>
    %382 = arith.mulf %381, %380 : vector<4x32xf32>
    %383 = math.tanh %382 : vector<4x32xf32>
    %cst_146 = arith.constant 5.000000e-01 : f32
    %384 = vector.broadcast %cst_146 : f32 to vector<4x32xf32>
    %385 = arith.mulf %384, %383 : vector<4x32xf32>
    %cst_147 = arith.constant 5.000000e-01 : f32
    %386 = vector.broadcast %cst_147 : f32 to vector<4x32xf32>
    %387 = arith.addf %385, %386 : vector<4x32xf32>
    %388 = vector.extract_strided_slice %371 {offsets = [0, 64], sizes = [4, 32], strides = [1, 1]} : vector<4x128xf32> to vector<4x32xf32>
    %389 = math.tanh %388 : vector<4x32xf32>
    %390 = vector.extract_strided_slice %371 {offsets = [0, 96], sizes = [4, 32], strides = [1, 1]} : vector<4x128xf32> to vector<4x32xf32>
    %cst_148 = arith.constant 5.000000e-01 : f32
    %391 = vector.broadcast %cst_148 : f32 to vector<4x32xf32>
    %392 = arith.mulf %391, %390 : vector<4x32xf32>
    %393 = math.tanh %392 : vector<4x32xf32>
    %cst_149 = arith.constant 5.000000e-01 : f32
    %394 = vector.broadcast %cst_149 : f32 to vector<4x32xf32>
    %395 = arith.mulf %394, %393 : vector<4x32xf32>
    %cst_150 = arith.constant 5.000000e-01 : f32
    %396 = vector.broadcast %cst_150 : f32 to vector<4x32xf32>
    %397 = arith.addf %395, %396 : vector<4x32xf32>
    %398 = arith.mulf %387, %365 : vector<4x32xf32>
    %399 = arith.mulf %379, %389 : vector<4x32xf32>
    %400 = arith.addf %398, %399 : vector<4x32xf32>
    %401 = math.tanh %400 : vector<4x32xf32>
    %402 = arith.mulf %397, %401 : vector<4x32xf32>
    %cst_151 = arith.constant dense<0.000000e+00> : vector<4x128xf32>
    %403 = tpu.matmul %151, %289, %cst_151 {dimension_numbers = #tpu.dot_dimension_numbers<[1], [0], [0], [1], [0, 0, 1, 1], [], []>} : vector<4x32xf32>, vector<32x128xf32>, vector<4x128xf32> -> vector<4x128xf32>
    %cst_152 = arith.constant dense<0.000000e+00> : vector<4x128xf32>
    %404 = tpu.matmul %402, %291, %cst_152 {dimension_numbers = #tpu.dot_dimension_numbers<[1], [0], [0], [1], [0, 0, 1, 1], [], []>} : vector<4x32xf32>, vector<32x128xf32>, vector<4x128xf32> -> vector<4x128xf32>
    %405 = arith.addf %403, %404 : vector<4x128xf32>
    %406 = arith.addf %405, %295 : vector<4x128xf32>
    %407 = vector.extract_strided_slice %406 {offsets = [0, 0], sizes = [4, 32], strides = [1, 1]} : vector<4x128xf32> to vector<4x32xf32>
    %cst_153 = arith.constant 5.000000e-01 : f32
    %408 = vector.broadcast %cst_153 : f32 to vector<4x32xf32>
    %409 = arith.mulf %408, %407 : vector<4x32xf32>
    %410 = math.tanh %409 : vector<4x32xf32>
    %cst_154 = arith.constant 5.000000e-01 : f32
    %411 = vector.broadcast %cst_154 : f32 to vector<4x32xf32>
    %412 = arith.mulf %411, %410 : vector<4x32xf32>
    %cst_155 = arith.constant 5.000000e-01 : f32
    %413 = vector.broadcast %cst_155 : f32 to vector<4x32xf32>
    %414 = arith.addf %412, %413 : vector<4x32xf32>
    %415 = vector.extract_strided_slice %406 {offsets = [0, 32], sizes = [4, 32], strides = [1, 1]} : vector<4x128xf32> to vector<4x32xf32>
    %cst_156 = arith.constant 5.000000e-01 : f32
    %416 = vector.broadcast %cst_156 : f32 to vector<4x32xf32>
    %417 = arith.mulf %416, %415 : vector<4x32xf32>
    %418 = math.tanh %417 : vector<4x32xf32>
    %cst_157 = arith.constant 5.000000e-01 : f32
    %419 = vector.broadcast %cst_157 : f32 to vector<4x32xf32>
    %420 = arith.mulf %419, %418 : vector<4x32xf32>
    %cst_158 = arith.constant 5.000000e-01 : f32
    %421 = vector.broadcast %cst_158 : f32 to vector<4x32xf32>
    %422 = arith.addf %420, %421 : vector<4x32xf32>
    %423 = vector.extract_strided_slice %406 {offsets = [0, 64], sizes = [4, 32], strides = [1, 1]} : vector<4x128xf32> to vector<4x32xf32>
    %424 = math.tanh %423 : vector<4x32xf32>
    %425 = vector.extract_strided_slice %406 {offsets = [0, 96], sizes = [4, 32], strides = [1, 1]} : vector<4x128xf32> to vector<4x32xf32>
    %cst_159 = arith.constant 5.000000e-01 : f32
    %426 = vector.broadcast %cst_159 : f32 to vector<4x32xf32>
    %427 = arith.mulf %426, %425 : vector<4x32xf32>
    %428 = math.tanh %427 : vector<4x32xf32>
    %cst_160 = arith.constant 5.000000e-01 : f32
    %429 = vector.broadcast %cst_160 : f32 to vector<4x32xf32>
    %430 = arith.mulf %429, %428 : vector<4x32xf32>
    %cst_161 = arith.constant 5.000000e-01 : f32
    %431 = vector.broadcast %cst_161 : f32 to vector<4x32xf32>
    %432 = arith.addf %430, %431 : vector<4x32xf32>
    %433 = arith.mulf %422, %400 : vector<4x32xf32>
    %434 = arith.mulf %414, %424 : vector<4x32xf32>
    %435 = arith.addf %433, %434 : vector<4x32xf32>
    %436 = math.tanh %435 : vector<4x32xf32>
    %437 = arith.mulf %432, %436 : vector<4x32xf32>
    %cst_162 = arith.constant dense<0.000000e+00> : vector<4x128xf32>
    %438 = tpu.matmul %185, %289, %cst_162 {dimension_numbers = #tpu.dot_dimension_numbers<[1], [0], [0], [1], [0, 0, 1, 1], [], []>} : vector<4x32xf32>, vector<32x128xf32>, vector<4x128xf32> -> vector<4x128xf32>
    %cst_163 = arith.constant dense<0.000000e+00> : vector<4x128xf32>
    %439 = tpu.matmul %437, %291, %cst_163 {dimension_numbers = #tpu.dot_dimension_numbers<[1], [0], [0], [1], [0, 0, 1, 1], [], []>} : vector<4x32xf32>, vector<32x128xf32>, vector<4x128xf32> -> vector<4x128xf32>
    %440 = arith.addf %438, %439 : vector<4x128xf32>
    %441 = arith.addf %440, %295 : vector<4x128xf32>
    %442 = vector.extract_strided_slice %441 {offsets = [0, 0], sizes = [4, 32], strides = [1, 1]} : vector<4x128xf32> to vector<4x32xf32>
    %cst_164 = arith.constant 5.000000e-01 : f32
    %443 = vector.broadcast %cst_164 : f32 to vector<4x32xf32>
    %444 = arith.mulf %443, %442 : vector<4x32xf32>
    %445 = math.tanh %444 : vector<4x32xf32>
    %cst_165 = arith.constant 5.000000e-01 : f32
    %446 = vector.broadcast %cst_165 : f32 to vector<4x32xf32>
    %447 = arith.mulf %446, %445 : vector<4x32xf32>
    %cst_166 = arith.constant 5.000000e-01 : f32
    %448 = vector.broadcast %cst_166 : f32 to vector<4x32xf32>
    %449 = arith.addf %447, %448 : vector<4x32xf32>
    %450 = vector.extract_strided_slice %441 {offsets = [0, 32], sizes = [4, 32], strides = [1, 1]} : vector<4x128xf32> to vector<4x32xf32>
    %cst_167 = arith.constant 5.000000e-01 : f32
    %451 = vector.broadcast %cst_167 : f32 to vector<4x32xf32>
    %452 = arith.mulf %451, %450 : vector<4x32xf32>
    %453 = math.tanh %452 : vector<4x32xf32>
    %cst_168 = arith.constant 5.000000e-01 : f32
    %454 = vector.broadcast %cst_168 : f32 to vector<4x32xf32>
    %455 = arith.mulf %454, %453 : vector<4x32xf32>
    %cst_169 = arith.constant 5.000000e-01 : f32
    %456 = vector.broadcast %cst_169 : f32 to vector<4x32xf32>
    %457 = arith.addf %455, %456 : vector<4x32xf32>
    %458 = vector.extract_strided_slice %441 {offsets = [0, 64], sizes = [4, 32], strides = [1, 1]} : vector<4x128xf32> to vector<4x32xf32>
    %459 = math.tanh %458 : vector<4x32xf32>
    %460 = vector.extract_strided_slice %441 {offsets = [0, 96], sizes = [4, 32], strides = [1, 1]} : vector<4x128xf32> to vector<4x32xf32>
    %cst_170 = arith.constant 5.000000e-01 : f32
    %461 = vector.broadcast %cst_170 : f32 to vector<4x32xf32>
    %462 = arith.mulf %461, %460 : vector<4x32xf32>
    %463 = math.tanh %462 : vector<4x32xf32>
    %cst_171 = arith.constant 5.000000e-01 : f32
    %464 = vector.broadcast %cst_171 : f32 to vector<4x32xf32>
    %465 = arith.mulf %464, %463 : vector<4x32xf32>
    %cst_172 = arith.constant 5.000000e-01 : f32
    %466 = vector.broadcast %cst_172 : f32 to vector<4x32xf32>
    %467 = arith.addf %465, %466 : vector<4x32xf32>
    %468 = arith.mulf %457, %435 : vector<4x32xf32>
    %469 = arith.mulf %449, %459 : vector<4x32xf32>
    %470 = arith.addf %468, %469 : vector<4x32xf32>
    %471 = math.tanh %470 : vector<4x32xf32>
    %472 = arith.mulf %467, %471 : vector<4x32xf32>
    %cst_173 = arith.constant dense<0.000000e+00> : vector<4x128xf32>
    %473 = tpu.matmul %219, %289, %cst_173 {dimension_numbers = #tpu.dot_dimension_numbers<[1], [0], [0], [1], [0, 0, 1, 1], [], []>} : vector<4x32xf32>, vector<32x128xf32>, vector<4x128xf32> -> vector<4x128xf32>
    %cst_174 = arith.constant dense<0.000000e+00> : vector<4x128xf32>
    %474 = tpu.matmul %472, %291, %cst_174 {dimension_numbers = #tpu.dot_dimension_numbers<[1], [0], [0], [1], [0, 0, 1, 1], [], []>} : vector<4x32xf32>, vector<32x128xf32>, vector<4x128xf32> -> vector<4x128xf32>
    %475 = arith.addf %473, %474 : vector<4x128xf32>
    %476 = arith.addf %475, %295 : vector<4x128xf32>
    %477 = vector.extract_strided_slice %476 {offsets = [0, 0], sizes = [4, 32], strides = [1, 1]} : vector<4x128xf32> to vector<4x32xf32>
    %cst_175 = arith.constant 5.000000e-01 : f32
    %478 = vector.broadcast %cst_175 : f32 to vector<4x32xf32>
    %479 = arith.mulf %478, %477 : vector<4x32xf32>
    %480 = math.tanh %479 : vector<4x32xf32>
    %cst_176 = arith.constant 5.000000e-01 : f32
    %481 = vector.broadcast %cst_176 : f32 to vector<4x32xf32>
    %482 = arith.mulf %481, %480 : vector<4x32xf32>
    %cst_177 = arith.constant 5.000000e-01 : f32
    %483 = vector.broadcast %cst_177 : f32 to vector<4x32xf32>
    %484 = arith.addf %482, %483 : vector<4x32xf32>
    %485 = vector.extract_strided_slice %476 {offsets = [0, 32], sizes = [4, 32], strides = [1, 1]} : vector<4x128xf32> to vector<4x32xf32>
    %cst_178 = arith.constant 5.000000e-01 : f32
    %486 = vector.broadcast %cst_178 : f32 to vector<4x32xf32>
    %487 = arith.mulf %486, %485 : vector<4x32xf32>
    %488 = math.tanh %487 : vector<4x32xf32>
    %cst_179 = arith.constant 5.000000e-01 : f32
    %489 = vector.broadcast %cst_179 : f32 to vector<4x32xf32>
    %490 = arith.mulf %489, %488 : vector<4x32xf32>
    %cst_180 = arith.constant 5.000000e-01 : f32
    %491 = vector.broadcast %cst_180 : f32 to vector<4x32xf32>
    %492 = arith.addf %490, %491 : vector<4x32xf32>
    %493 = vector.extract_strided_slice %476 {offsets = [0, 64], sizes = [4, 32], strides = [1, 1]} : vector<4x128xf32> to vector<4x32xf32>
    %494 = math.tanh %493 : vector<4x32xf32>
    %495 = vector.extract_strided_slice %476 {offsets = [0, 96], sizes = [4, 32], strides = [1, 1]} : vector<4x128xf32> to vector<4x32xf32>
    %cst_181 = arith.constant 5.000000e-01 : f32
    %496 = vector.broadcast %cst_181 : f32 to vector<4x32xf32>
    %497 = arith.mulf %496, %495 : vector<4x32xf32>
    %498 = math.tanh %497 : vector<4x32xf32>
    %cst_182 = arith.constant 5.000000e-01 : f32
    %499 = vector.broadcast %cst_182 : f32 to vector<4x32xf32>
    %500 = arith.mulf %499, %498 : vector<4x32xf32>
    %cst_183 = arith.constant 5.000000e-01 : f32
    %501 = vector.broadcast %cst_183 : f32 to vector<4x32xf32>
    %502 = arith.addf %500, %501 : vector<4x32xf32>
    %503 = arith.mulf %492, %470 : vector<4x32xf32>
    %504 = arith.mulf %484, %494 : vector<4x32xf32>
    %505 = arith.addf %503, %504 : vector<4x32xf32>
    %506 = math.tanh %505 : vector<4x32xf32>
    %507 = arith.mulf %502, %506 : vector<4x32xf32>
    %cst_184 = arith.constant dense<0.000000e+00> : vector<4x128xf32>
    %508 = tpu.matmul %253, %289, %cst_184 {dimension_numbers = #tpu.dot_dimension_numbers<[1], [0], [0], [1], [0, 0, 1, 1], [], []>} : vector<4x32xf32>, vector<32x128xf32>, vector<4x128xf32> -> vector<4x128xf32>
    %cst_185 = arith.constant dense<0.000000e+00> : vector<4x128xf32>
    %509 = tpu.matmul %507, %291, %cst_185 {dimension_numbers = #tpu.dot_dimension_numbers<[1], [0], [0], [1], [0, 0, 1, 1], [], []>} : vector<4x32xf32>, vector<32x128xf32>, vector<4x128xf32> -> vector<4x128xf32>
    %510 = arith.addf %508, %509 : vector<4x128xf32>
    %511 = arith.addf %510, %295 : vector<4x128xf32>
    %512 = vector.extract_strided_slice %511 {offsets = [0, 0], sizes = [4, 32], strides = [1, 1]} : vector<4x128xf32> to vector<4x32xf32>
    %cst_186 = arith.constant 5.000000e-01 : f32
    %513 = vector.broadcast %cst_186 : f32 to vector<4x32xf32>
    %514 = arith.mulf %513, %512 : vector<4x32xf32>
    %515 = math.tanh %514 : vector<4x32xf32>
    %cst_187 = arith.constant 5.000000e-01 : f32
    %516 = vector.broadcast %cst_187 : f32 to vector<4x32xf32>
    %517 = arith.mulf %516, %515 : vector<4x32xf32>
    %cst_188 = arith.constant 5.000000e-01 : f32
    %518 = vector.broadcast %cst_188 : f32 to vector<4x32xf32>
    %519 = arith.addf %517, %518 : vector<4x32xf32>
    %520 = vector.extract_strided_slice %511 {offsets = [0, 32], sizes = [4, 32], strides = [1, 1]} : vector<4x128xf32> to vector<4x32xf32>
    %cst_189 = arith.constant 5.000000e-01 : f32
    %521 = vector.broadcast %cst_189 : f32 to vector<4x32xf32>
    %522 = arith.mulf %521, %520 : vector<4x32xf32>
    %523 = math.tanh %522 : vector<4x32xf32>
    %cst_190 = arith.constant 5.000000e-01 : f32
    %524 = vector.broadcast %cst_190 : f32 to vector<4x32xf32>
    %525 = arith.mulf %524, %523 : vector<4x32xf32>
    %cst_191 = arith.constant 5.000000e-01 : f32
    %526 = vector.broadcast %cst_191 : f32 to vector<4x32xf32>
    %527 = arith.addf %525, %526 : vector<4x32xf32>
    %528 = vector.extract_strided_slice %511 {offsets = [0, 64], sizes = [4, 32], strides = [1, 1]} : vector<4x128xf32> to vector<4x32xf32>
    %529 = math.tanh %528 : vector<4x32xf32>
    %530 = vector.extract_strided_slice %511 {offsets = [0, 96], sizes = [4, 32], strides = [1, 1]} : vector<4x128xf32> to vector<4x32xf32>
    %cst_192 = arith.constant 5.000000e-01 : f32
    %531 = vector.broadcast %cst_192 : f32 to vector<4x32xf32>
    %532 = arith.mulf %531, %530 : vector<4x32xf32>
    %533 = math.tanh %532 : vector<4x32xf32>
    %cst_193 = arith.constant 5.000000e-01 : f32
    %534 = vector.broadcast %cst_193 : f32 to vector<4x32xf32>
    %535 = arith.mulf %534, %533 : vector<4x32xf32>
    %cst_194 = arith.constant 5.000000e-01 : f32
    %536 = vector.broadcast %cst_194 : f32 to vector<4x32xf32>
    %537 = arith.addf %535, %536 : vector<4x32xf32>
    %538 = arith.mulf %527, %505 : vector<4x32xf32>
    %539 = arith.mulf %519, %529 : vector<4x32xf32>
    %540 = arith.addf %538, %539 : vector<4x32xf32>
    %541 = math.tanh %540 : vector<4x32xf32>
    %542 = arith.mulf %537, %541 : vector<4x32xf32>
    %cst_195 = arith.constant dense<0.000000e+00> : vector<4x128xf32>
    %543 = tpu.matmul %287, %289, %cst_195 {dimension_numbers = #tpu.dot_dimension_numbers<[1], [0], [0], [1], [0, 0, 1, 1], [], []>} : vector<4x32xf32>, vector<32x128xf32>, vector<4x128xf32> -> vector<4x128xf32>
    %cst_196 = arith.constant dense<0.000000e+00> : vector<4x128xf32>
    %544 = tpu.matmul %542, %291, %cst_196 {dimension_numbers = #tpu.dot_dimension_numbers<[1], [0], [0], [1], [0, 0, 1, 1], [], []>} : vector<4x32xf32>, vector<32x128xf32>, vector<4x128xf32> -> vector<4x128xf32>
    %545 = arith.addf %543, %544 : vector<4x128xf32>
    %546 = arith.addf %545, %295 : vector<4x128xf32>
    %547 = vector.extract_strided_slice %546 {offsets = [0, 0], sizes = [4, 32], strides = [1, 1]} : vector<4x128xf32> to vector<4x32xf32>
    %cst_197 = arith.constant 5.000000e-01 : f32
    %548 = vector.broadcast %cst_197 : f32 to vector<4x32xf32>
    %549 = arith.mulf %548, %547 : vector<4x32xf32>
    %550 = math.tanh %549 : vector<4x32xf32>
    %cst_198 = arith.constant 5.000000e-01 : f32
    %551 = vector.broadcast %cst_198 : f32 to vector<4x32xf32>
    %552 = arith.mulf %551, %550 : vector<4x32xf32>
    %cst_199 = arith.constant 5.000000e-01 : f32
    %553 = vector.broadcast %cst_199 : f32 to vector<4x32xf32>
    %554 = arith.addf %552, %553 : vector<4x32xf32>
    %555 = vector.extract_strided_slice %546 {offsets = [0, 32], sizes = [4, 32], strides = [1, 1]} : vector<4x128xf32> to vector<4x32xf32>
    %cst_200 = arith.constant 5.000000e-01 : f32
    %556 = vector.broadcast %cst_200 : f32 to vector<4x32xf32>
    %557 = arith.mulf %556, %555 : vector<4x32xf32>
    %558 = math.tanh %557 : vector<4x32xf32>
    %cst_201 = arith.constant 5.000000e-01 : f32
    %559 = vector.broadcast %cst_201 : f32 to vector<4x32xf32>
    %560 = arith.mulf %559, %558 : vector<4x32xf32>
    %cst_202 = arith.constant 5.000000e-01 : f32
    %561 = vector.broadcast %cst_202 : f32 to vector<4x32xf32>
    %562 = arith.addf %560, %561 : vector<4x32xf32>
    %563 = vector.extract_strided_slice %546 {offsets = [0, 64], sizes = [4, 32], strides = [1, 1]} : vector<4x128xf32> to vector<4x32xf32>
    %564 = math.tanh %563 : vector<4x32xf32>
    %565 = vector.extract_strided_slice %546 {offsets = [0, 96], sizes = [4, 32], strides = [1, 1]} : vector<4x128xf32> to vector<4x32xf32>
    %cst_203 = arith.constant 5.000000e-01 : f32
    %566 = vector.broadcast %cst_203 : f32 to vector<4x32xf32>
    %567 = arith.mulf %566, %565 : vector<4x32xf32>
    %568 = math.tanh %567 : vector<4x32xf32>
    %cst_204 = arith.constant 5.000000e-01 : f32
    %569 = vector.broadcast %cst_204 : f32 to vector<4x32xf32>
    %570 = arith.mulf %569, %568 : vector<4x32xf32>
    %cst_205 = arith.constant 5.000000e-01 : f32
    %571 = vector.broadcast %cst_205 : f32 to vector<4x32xf32>
    %572 = arith.addf %570, %571 : vector<4x32xf32>
    %573 = arith.mulf %562, %540 : vector<4x32xf32>
    %574 = arith.mulf %554, %564 : vector<4x32xf32>
    %575 = arith.addf %573, %574 : vector<4x32xf32>
    %576 = math.tanh %575 : vector<4x32xf32>
    %577 = arith.mulf %572, %576 : vector<4x32xf32>
    %c0_206 = arith.constant 0 : index
    %c0_207 = arith.constant 0 : index
    %c0_208 = arith.constant 0 : index
    %578 = vector.load %arg9[%c0_206, %c0_207, %c0_208] : memref<1x32x16xf32, #tpu.memory_space<vmem>>, vector<1x32x16xf32>
    %579 = vector.shape_cast %578 : vector<1x32x16xf32> to vector<32x16xf32>
    %c0_209 = arith.constant 0 : index
    %c0_210 = arith.constant 0 : index
    %c0_211 = arith.constant 0 : index
    %580 = vector.load %arg10[%c0_209, %c0_210, %c0_211] : memref<1x16x128xf32, #tpu.memory_space<vmem>>, vector<1x16x128xf32>
    %581 = vector.shape_cast %580 : vector<1x16x128xf32> to vector<16x128xf32>
    %c0_212 = arith.constant 0 : index
    %c0_213 = arith.constant 0 : index
    %c0_214 = arith.constant 0 : index
    %582 = vector.load %arg11[%c0_212, %c0_213, %c0_214] : memref<1x32x128xf32, #tpu.memory_space<vmem>>, vector<1x32x128xf32>
    %583 = vector.shape_cast %582 : vector<1x32x128xf32> to vector<32x128xf32>
    %c0_215 = arith.constant 0 : index
    %c0_216 = arith.constant 0 : index
    %c0_217 = arith.constant 0 : index
    %584 = vector.load %arg12[%c0_215, %c0_216, %c0_217] : memref<1x1x128xf32, #tpu.memory_space<vmem>>, vector<1x1x128xf32>
    %585 = vector.shape_cast %584 : vector<1x1x128xf32> to vector<1x128xf32>
    %586 = vector.shape_cast %585 : vector<1x128xf32> to vector<1x128xf32>
    %587 = vector.broadcast %586 : vector<1x128xf32> to vector<4x128xf32>
    %c0_218 = arith.constant 0 : index
    %c0_219 = arith.constant 0 : index
    %c0_220 = arith.constant 0 : index
    %588 = vector.load %arg13[%c0_218, %c0_219, %c0_220] : memref<1x32x128xf32, #tpu.memory_space<vmem>>, vector<1x32x128xf32>
    %589 = vector.shape_cast %588 : vector<1x32x128xf32> to vector<32x128xf32>
    %c0_221 = arith.constant 0 : index
    %c0_222 = arith.constant 0 : index
    %c0_223 = arith.constant 0 : index
    %590 = vector.load %arg14[%c0_221, %c0_222, %c0_223] : memref<1x32x128xf32, #tpu.memory_space<vmem>>, vector<1x32x128xf32>
    %591 = vector.shape_cast %590 : vector<1x32x128xf32> to vector<32x128xf32>
    %c0_224 = arith.constant 0 : index
    %c0_225 = arith.constant 0 : index
    %c0_226 = arith.constant 0 : index
    %592 = vector.load %arg15[%c0_224, %c0_225, %c0_226] : memref<1x1x128xf32, #tpu.memory_space<vmem>>, vector<1x1x128xf32>
    %593 = vector.shape_cast %592 : vector<1x1x128xf32> to vector<1x128xf32>
    %594 = vector.shape_cast %593 : vector<1x128xf32> to vector<1x128xf32>
    %595 = vector.broadcast %594 : vector<1x128xf32> to vector<4x128xf32>
    %c0_227 = arith.constant 0 : index
    %c0_228 = arith.constant 0 : index
    %c0_229 = arith.constant 0 : index
    %596 = vector.load %arg16[%c0_227, %c0_228, %c0_229] : memref<1x32x32xf32, #tpu.memory_space<vmem>>, vector<1x32x32xf32>
    %597 = vector.shape_cast %596 : vector<1x32x32xf32> to vector<32x32xf32>
    %c0_230 = arith.constant 0 : index
    %c0_231 = arith.constant 0 : index
    %c0_232 = arith.constant 0 : index
    %598 = vector.load %arg17[%c0_230, %c0_231, %c0_232] : memref<1x1x32xf32, #tpu.memory_space<vmem>>, vector<1x1x32xf32>
    %599 = vector.shape_cast %598 : vector<1x1x32xf32> to vector<1x32xf32>
    %600 = vector.shape_cast %599 : vector<1x32xf32> to vector<1x32xf32>
    %601 = vector.broadcast %600 : vector<1x32xf32> to vector<4x32xf32>
    %c0_233 = arith.constant 0 : index
    %c0_234 = arith.constant 0 : index
    %602 = vector.load %arg1[%c0_233, %c0_234] : memref<32x32xf32, #tpu.memory_space<vmem>>, vector<4x32xf32>
    %603 = tpu.iota {dimensions = array<i32: 1>} : vector<4x32xi32>
    %cst_235 = arith.constant 0.000000e+00 : f32
    %604 = vector.broadcast %cst_235 : f32 to vector<4x32xf32>
    %c0_236 = arith.constant 0 : index
    %c0_237 = arith.constant 0 : index
    %c0_238 = arith.constant 0 : index
    %c0_239 = arith.constant 0 : index
    %605 = vector.load %arg18[%c0_236, %c0_237, %c0_238, %c0_239] : memref<1x8x4x32xf32, #tpu.memory_space<vmem>>, vector<1x1x4x32xf32>
    %606 = vector.shape_cast %605 : vector<1x1x4x32xf32> to vector<4x32xf32>
    %607 = vector.shape_cast %604 : vector<4x32xf32> to vector<1x1x4x32xf32>
    tpu.vector_store %arg18[%c0_236, %c0_237, %c0_238, %c0_239], %607 {strides = array<i32>} : memref<1x8x4x32xf32, #tpu.memory_space<vmem>>, vector<1x1x4x32xf32>,
    %cst_240 = arith.constant dense<0.000000e+00> : vector<4x16xf32>
    %608 = tpu.matmul %602, %579, %cst_240 {dimension_numbers = #tpu.dot_dimension_numbers<[1], [0], [0], [1], [0, 0, 1, 1], [], []>} : vector<4x32xf32>, vector<32x16xf32>, vector<4x16xf32> -> vector<4x16xf32>
    %cst_241 = arith.constant dense<0.000000e+00> : vector<4x128xf32>
    %609 = tpu.matmul %608, %581, %cst_241 {dimension_numbers = #tpu.dot_dimension_numbers<[1], [0], [0], [1], [0, 0, 1, 1], [], []>} : vector<4x16xf32>, vector<16x128xf32>, vector<4x128xf32> -> vector<4x128xf32>
    %cst_242 = arith.constant dense<0.000000e+00> : vector<4x128xf32>
    %610 = tpu.matmul %287, %583, %cst_242 {dimension_numbers = #tpu.dot_dimension_numbers<[1], [0], [0], [1], [0, 0, 1, 1], [], []>} : vector<4x32xf32>, vector<32x128xf32>, vector<4x128xf32> -> vector<4x128xf32>
    %611 = arith.addf %609, %610 : vector<4x128xf32>
    %612 = arith.addf %611, %587 : vector<4x128xf32>
    %613 = vector.extract_strided_slice %612 {offsets = [0, 0], sizes = [4, 32], strides = [1, 1]} : vector<4x128xf32> to vector<4x32xf32>
    %cst_243 = arith.constant 5.000000e-01 : f32
    %614 = vector.broadcast %cst_243 : f32 to vector<4x32xf32>
    %615 = arith.mulf %614, %613 : vector<4x32xf32>
    %616 = math.tanh %615 : vector<4x32xf32>
    %cst_244 = arith.constant 5.000000e-01 : f32
    %617 = vector.broadcast %cst_244 : f32 to vector<4x32xf32>
    %618 = arith.mulf %617, %616 : vector<4x32xf32>
    %cst_245 = arith.constant 5.000000e-01 : f32
    %619 = vector.broadcast %cst_245 : f32 to vector<4x32xf32>
    %620 = arith.addf %618, %619 : vector<4x32xf32>
    %621 = vector.extract_strided_slice %612 {offsets = [0, 32], sizes = [4, 32], strides = [1, 1]} : vector<4x128xf32> to vector<4x32xf32>
    %cst_246 = arith.constant 5.000000e-01 : f32
    %622 = vector.broadcast %cst_246 : f32 to vector<4x32xf32>
    %623 = arith.mulf %622, %621 : vector<4x32xf32>
    %624 = math.tanh %623 : vector<4x32xf32>
    %cst_247 = arith.constant 5.000000e-01 : f32
    %625 = vector.broadcast %cst_247 : f32 to vector<4x32xf32>
    %626 = arith.mulf %625, %624 : vector<4x32xf32>
    %cst_248 = arith.constant 5.000000e-01 : f32
    %627 = vector.broadcast %cst_248 : f32 to vector<4x32xf32>
    %628 = arith.addf %626, %627 : vector<4x32xf32>
    %629 = vector.extract_strided_slice %612 {offsets = [0, 64], sizes = [4, 32], strides = [1, 1]} : vector<4x128xf32> to vector<4x32xf32>
    %630 = math.tanh %629 : vector<4x32xf32>
    %631 = vector.extract_strided_slice %612 {offsets = [0, 96], sizes = [4, 32], strides = [1, 1]} : vector<4x128xf32> to vector<4x32xf32>
    %cst_249 = arith.constant 5.000000e-01 : f32
    %632 = vector.broadcast %cst_249 : f32 to vector<4x32xf32>
    %633 = arith.mulf %632, %631 : vector<4x32xf32>
    %634 = math.tanh %633 : vector<4x32xf32>
    %cst_250 = arith.constant 5.000000e-01 : f32
    %635 = vector.broadcast %cst_250 : f32 to vector<4x32xf32>
    %636 = arith.mulf %635, %634 : vector<4x32xf32>
    %cst_251 = arith.constant 5.000000e-01 : f32
    %637 = vector.broadcast %cst_251 : f32 to vector<4x32xf32>
    %638 = arith.addf %636, %637 : vector<4x32xf32>
    %639 = arith.mulf %628, %285 : vector<4x32xf32>
    %640 = arith.mulf %620, %630 : vector<4x32xf32>
    %641 = arith.addf %639, %640 : vector<4x32xf32>
    %642 = math.tanh %641 : vector<4x32xf32>
    %643 = arith.mulf %638, %642 : vector<4x32xf32>
    %cst_252 = arith.constant dense<0.000000e+00> : vector<4x128xf32>
    %644 = tpu.matmul %643, %589, %cst_252 {dimension_numbers = #tpu.dot_dimension_numbers<[1], [0], [0], [1], [0, 0, 1, 1], [], []>} : vector<4x32xf32>, vector<32x128xf32>, vector<4x128xf32> -> vector<4x128xf32>
    %cst_253 = arith.constant dense<0.000000e+00> : vector<4x128xf32>
    %645 = tpu.matmul %577, %591, %cst_253 {dimension_numbers = #tpu.dot_dimension_numbers<[1], [0], [0], [1], [0, 0, 1, 1], [], []>} : vector<4x32xf32>, vector<32x128xf32>, vector<4x128xf32> -> vector<4x128xf32>
    %646 = arith.addf %644, %645 : vector<4x128xf32>
    %647 = arith.addf %646, %595 : vector<4x128xf32>
    %648 = vector.extract_strided_slice %647 {offsets = [0, 0], sizes = [4, 32], strides = [1, 1]} : vector<4x128xf32> to vector<4x32xf32>
    %cst_254 = arith.constant 5.000000e-01 : f32
    %649 = vector.broadcast %cst_254 : f32 to vector<4x32xf32>
    %650 = arith.mulf %649, %648 : vector<4x32xf32>
    %651 = math.tanh %650 : vector<4x32xf32>
    %cst_255 = arith.constant 5.000000e-01 : f32
    %652 = vector.broadcast %cst_255 : f32 to vector<4x32xf32>
    %653 = arith.mulf %652, %651 : vector<4x32xf32>
    %cst_256 = arith.constant 5.000000e-01 : f32
    %654 = vector.broadcast %cst_256 : f32 to vector<4x32xf32>
    %655 = arith.addf %653, %654 : vector<4x32xf32>
    %656 = vector.extract_strided_slice %647 {offsets = [0, 32], sizes = [4, 32], strides = [1, 1]} : vector<4x128xf32> to vector<4x32xf32>
    %cst_257 = arith.constant 5.000000e-01 : f32
    %657 = vector.broadcast %cst_257 : f32 to vector<4x32xf32>
    %658 = arith.mulf %657, %656 : vector<4x32xf32>
    %659 = math.tanh %658 : vector<4x32xf32>
    %cst_258 = arith.constant 5.000000e-01 : f32
    %660 = vector.broadcast %cst_258 : f32 to vector<4x32xf32>
    %661 = arith.mulf %660, %659 : vector<4x32xf32>
    %cst_259 = arith.constant 5.000000e-01 : f32
    %662 = vector.broadcast %cst_259 : f32 to vector<4x32xf32>
    %663 = arith.addf %661, %662 : vector<4x32xf32>
    %664 = vector.extract_strided_slice %647 {offsets = [0, 64], sizes = [4, 32], strides = [1, 1]} : vector<4x128xf32> to vector<4x32xf32>
    %665 = math.tanh %664 : vector<4x32xf32>
    %666 = vector.extract_strided_slice %647 {offsets = [0, 96], sizes = [4, 32], strides = [1, 1]} : vector<4x128xf32> to vector<4x32xf32>
    %cst_260 = arith.constant 5.000000e-01 : f32
    %667 = vector.broadcast %cst_260 : f32 to vector<4x32xf32>
    %668 = arith.mulf %667, %666 : vector<4x32xf32>
    %669 = math.tanh %668 : vector<4x32xf32>
    %cst_261 = arith.constant 5.000000e-01 : f32
    %670 = vector.broadcast %cst_261 : f32 to vector<4x32xf32>
    %671 = arith.mulf %670, %669 : vector<4x32xf32>
    %cst_262 = arith.constant 5.000000e-01 : f32
    %672 = vector.broadcast %cst_262 : f32 to vector<4x32xf32>
    %673 = arith.addf %671, %672 : vector<4x32xf32>
    %674 = arith.mulf %663, %575 : vector<4x32xf32>
    %675 = arith.mulf %655, %665 : vector<4x32xf32>
    %676 = arith.addf %674, %675 : vector<4x32xf32>
    %677 = math.tanh %676 : vector<4x32xf32>
    %678 = arith.mulf %673, %677 : vector<4x32xf32>
    %cst_263 = arith.constant dense<0.000000e+00> : vector<4x32xf32>
    %679 = tpu.matmul %678, %597, %cst_263 {dimension_numbers = #tpu.dot_dimension_numbers<[1], [0], [0], [1], [0, 0, 1, 1], [], []>} : vector<4x32xf32>, vector<32x32xf32>, vector<4x32xf32> -> vector<4x32xf32>
    %680 = arith.addf %679, %601 : vector<4x32xf32>
    %c0_264 = arith.constant 0 : index
    %c1 = arith.constant 1 : index
    %c0_265 = arith.constant 0 : index
    %c0_266 = arith.constant 0 : index
    %681 = vector.load %arg18[%c0_264, %c1, %c0_265, %c0_266] : memref<1x8x4x32xf32, #tpu.memory_space<vmem>>, vector<1x1x4x32xf32>
    %682 = vector.shape_cast %681 : vector<1x1x4x32xf32> to vector<4x32xf32>
    %683 = vector.shape_cast %680 : vector<4x32xf32> to vector<1x1x4x32xf32>
    tpu.vector_store %arg18[%c0_264, %c1, %c0_265, %c0_266], %683 {strides = array<i32>} : memref<1x8x4x32xf32, #tpu.memory_space<vmem>>, vector<1x1x4x32xf32>,
    %cst_267 = arith.constant dense<0xFF800000> : vector<4xf32>
    %684 = vector.multi_reduction <maximumf>, %680, %cst_267 [1] : vector<4x32xf32> to vector<4xf32>
    %685 = vector.shape_cast %684 : vector<4xf32> to vector<4x1xf32>
    %686 = vector.broadcast %685 : vector<4x1xf32> to vector<4x32xf32>
    %687 = arith.cmpf oeq, %680, %686 : vector<4x32xf32>
    %c32_i32 = arith.constant 32 : i32
    %688 = vector.broadcast %c32_i32 : i32 to vector<4x32xi32>
    %689 = arith.select %687, %603, %688 : vector<4x32xi1>, vector<4x32xi32>
    %cst_268 = arith.constant dense<2147483647> : vector<4xi32>
    %690 = vector.multi_reduction <minsi>, %689, %cst_268 [1] : vector<4x32xi32> to vector<4xi32>
    %691 = vector.shape_cast %690 : vector<4xi32> to vector<4x1xi32>
    %692 = vector.broadcast %691 : vector<4x1xi32> to vector<4x32xi32>
    %693 = arith.cmpi eq, %603, %692 : vector<4x32xi32>
    %694 = arith.extui %693 : vector<4x32xi1> to vector<4x32xi32>
    %695 = arith.sitofp %694 : vector<4x32xi32> to vector<4x32xf32>
    %cst_269 = arith.constant dense<0.000000e+00> : vector<4x16xf32>
    %696 = tpu.matmul %695, %579, %cst_269 {dimension_numbers = #tpu.dot_dimension_numbers<[1], [0], [0], [1], [0, 0, 1, 1], [], []>} : vector<4x32xf32>, vector<32x16xf32>, vector<4x16xf32> -> vector<4x16xf32>
    %cst_270 = arith.constant dense<0.000000e+00> : vector<4x128xf32>
    %697 = tpu.matmul %696, %581, %cst_270 {dimension_numbers = #tpu.dot_dimension_numbers<[1], [0], [0], [1], [0, 0, 1, 1], [], []>} : vector<4x16xf32>, vector<16x128xf32>, vector<4x128xf32> -> vector<4x128xf32>
    %cst_271 = arith.constant dense<0.000000e+00> : vector<4x128xf32>
    %698 = tpu.matmul %643, %583, %cst_271 {dimension_numbers = #tpu.dot_dimension_numbers<[1], [0], [0], [1], [0, 0, 1, 1], [], []>} : vector<4x32xf32>, vector<32x128xf32>, vector<4x128xf32> -> vector<4x128xf32>
    %699 = arith.addf %697, %698 : vector<4x128xf32>
    %700 = arith.addf %699, %587 : vector<4x128xf32>
    %701 = vector.extract_strided_slice %700 {offsets = [0, 0], sizes = [4, 32], strides = [1, 1]} : vector<4x128xf32> to vector<4x32xf32>
    %cst_272 = arith.constant 5.000000e-01 : f32
    %702 = vector.broadcast %cst_272 : f32 to vector<4x32xf32>
    %703 = arith.mulf %702, %701 : vector<4x32xf32>
    %704 = math.tanh %703 : vector<4x32xf32>
    %cst_273 = arith.constant 5.000000e-01 : f32
    %705 = vector.broadcast %cst_273 : f32 to vector<4x32xf32>
    %706 = arith.mulf %705, %704 : vector<4x32xf32>
    %cst_274 = arith.constant 5.000000e-01 : f32
    %707 = vector.broadcast %cst_274 : f32 to vector<4x32xf32>
    %708 = arith.addf %706, %707 : vector<4x32xf32>
    %709 = vector.extract_strided_slice %700 {offsets = [0, 32], sizes = [4, 32], strides = [1, 1]} : vector<4x128xf32> to vector<4x32xf32>
    %cst_275 = arith.constant 5.000000e-01 : f32
    %710 = vector.broadcast %cst_275 : f32 to vector<4x32xf32>
    %711 = arith.mulf %710, %709 : vector<4x32xf32>
    %712 = math.tanh %711 : vector<4x32xf32>
    %cst_276 = arith.constant 5.000000e-01 : f32
    %713 = vector.broadcast %cst_276 : f32 to vector<4x32xf32>
    %714 = arith.mulf %713, %712 : vector<4x32xf32>
    %cst_277 = arith.constant 5.000000e-01 : f32
    %715 = vector.broadcast %cst_277 : f32 to vector<4x32xf32>
    %716 = arith.addf %714, %715 : vector<4x32xf32>
    %717 = vector.extract_strided_slice %700 {offsets = [0, 64], sizes = [4, 32], strides = [1, 1]} : vector<4x128xf32> to vector<4x32xf32>
    %718 = math.tanh %717 : vector<4x32xf32>
    %719 = vector.extract_strided_slice %700 {offsets = [0, 96], sizes = [4, 32], strides = [1, 1]} : vector<4x128xf32> to vector<4x32xf32>
    %cst_278 = arith.constant 5.000000e-01 : f32
    %720 = vector.broadcast %cst_278 : f32 to vector<4x32xf32>
    %721 = arith.mulf %720, %719 : vector<4x32xf32>
    %722 = math.tanh %721 : vector<4x32xf32>
    %cst_279 = arith.constant 5.000000e-01 : f32
    %723 = vector.broadcast %cst_279 : f32 to vector<4x32xf32>
    %724 = arith.mulf %723, %722 : vector<4x32xf32>
    %cst_280 = arith.constant 5.000000e-01 : f32
    %725 = vector.broadcast %cst_280 : f32 to vector<4x32xf32>
    %726 = arith.addf %724, %725 : vector<4x32xf32>
    %727 = arith.mulf %716, %641 : vector<4x32xf32>
    %728 = arith.mulf %708, %718 : vector<4x32xf32>
    %729 = arith.addf %727, %728 : vector<4x32xf32>
    %730 = math.tanh %729 : vector<4x32xf32>
    %731 = arith.mulf %726, %730 : vector<4x32xf32>
    %cst_281 = arith.constant dense<0.000000e+00> : vector<4x128xf32>
    %732 = tpu.matmul %731, %589, %cst_281 {dimension_numbers = #tpu.dot_dimension_numbers<[1], [0], [0], [1], [0, 0, 1, 1], [], []>} : vector<4x32xf32>, vector<32x128xf32>, vector<4x128xf32> -> vector<4x128xf32>
    %cst_282 = arith.constant dense<0.000000e+00> : vector<4x128xf32>
    %733 = tpu.matmul %678, %591, %cst_282 {dimension_numbers = #tpu.dot_dimension_numbers<[1], [0], [0], [1], [0, 0, 1, 1], [], []>} : vector<4x32xf32>, vector<32x128xf32>, vector<4x128xf32> -> vector<4x128xf32>
    %734 = arith.addf %732, %733 : vector<4x128xf32>
    %735 = arith.addf %734, %595 : vector<4x128xf32>
    %736 = vector.extract_strided_slice %735 {offsets = [0, 0], sizes = [4, 32], strides = [1, 1]} : vector<4x128xf32> to vector<4x32xf32>
    %cst_283 = arith.constant 5.000000e-01 : f32
    %737 = vector.broadcast %cst_283 : f32 to vector<4x32xf32>
    %738 = arith.mulf %737, %736 : vector<4x32xf32>
    %739 = math.tanh %738 : vector<4x32xf32>
    %cst_284 = arith.constant 5.000000e-01 : f32
    %740 = vector.broadcast %cst_284 : f32 to vector<4x32xf32>
    %741 = arith.mulf %740, %739 : vector<4x32xf32>
    %cst_285 = arith.constant 5.000000e-01 : f32
    %742 = vector.broadcast %cst_285 : f32 to vector<4x32xf32>
    %743 = arith.addf %741, %742 : vector<4x32xf32>
    %744 = vector.extract_strided_slice %735 {offsets = [0, 32], sizes = [4, 32], strides = [1, 1]} : vector<4x128xf32> to vector<4x32xf32>
    %cst_286 = arith.constant 5.000000e-01 : f32
    %745 = vector.broadcast %cst_286 : f32 to vector<4x32xf32>
    %746 = arith.mulf %745, %744 : vector<4x32xf32>
    %747 = math.tanh %746 : vector<4x32xf32>
    %cst_287 = arith.constant 5.000000e-01 : f32
    %748 = vector.broadcast %cst_287 : f32 to vector<4x32xf32>
    %749 = arith.mulf %748, %747 : vector<4x32xf32>
    %cst_288 = arith.constant 5.000000e-01 : f32
    %750 = vector.broadcast %cst_288 : f32 to vector<4x32xf32>
    %751 = arith.addf %749, %750 : vector<4x32xf32>
    %752 = vector.extract_strided_slice %735 {offsets = [0, 64], sizes = [4, 32], strides = [1, 1]} : vector<4x128xf32> to vector<4x32xf32>
    %753 = math.tanh %752 : vector<4x32xf32>
    %754 = vector.extract_strided_slice %735 {offsets = [0, 96], sizes = [4, 32], strides = [1, 1]} : vector<4x128xf32> to vector<4x32xf32>
    %cst_289 = arith.constant 5.000000e-01 : f32
    %755 = vector.broadcast %cst_289 : f32 to vector<4x32xf32>
    %756 = arith.mulf %755, %754 : vector<4x32xf32>
    %757 = math.tanh %756 : vector<4x32xf32>
    %cst_290 = arith.constant 5.000000e-01 : f32
    %758 = vector.broadcast %cst_290 : f32 to vector<4x32xf32>
    %759 = arith.mulf %758, %757 : vector<4x32xf32>
    %cst_291 = arith.constant 5.000000e-01 : f32
    %760 = vector.broadcast %cst_291 : f32 to vector<4x32xf32>
    %761 = arith.addf %759, %760 : vector<4x32xf32>
    %762 = arith.mulf %751, %676 : vector<4x32xf32>
    %763 = arith.mulf %743, %753 : vector<4x32xf32>
    %764 = arith.addf %762, %763 : vector<4x32xf32>
    %765 = math.tanh %764 : vector<4x32xf32>
    %766 = arith.mulf %761, %765 : vector<4x32xf32>
    %cst_292 = arith.constant dense<0.000000e+00> : vector<4x32xf32>
    %767 = tpu.matmul %766, %597, %cst_292 {dimension_numbers = #tpu.dot_dimension_numbers<[1], [0], [0], [1], [0, 0, 1, 1], [], []>} : vector<4x32xf32>, vector<32x32xf32>, vector<4x32xf32> -> vector<4x32xf32>
    %768 = arith.addf %767, %601 : vector<4x32xf32>
    %c0_293 = arith.constant 0 : index
    %c2 = arith.constant 2 : index
    %c0_294 = arith.constant 0 : index
    %c0_295 = arith.constant 0 : index
    %769 = vector.load %arg18[%c0_293, %c2, %c0_294, %c0_295] : memref<1x8x4x32xf32, #tpu.memory_space<vmem>>, vector<1x1x4x32xf32>
    %770 = vector.shape_cast %769 : vector<1x1x4x32xf32> to vector<4x32xf32>
    %771 = vector.shape_cast %768 : vector<4x32xf32> to vector<1x1x4x32xf32>
    tpu.vector_store %arg18[%c0_293, %c2, %c0_294, %c0_295], %771 {strides = array<i32>} : memref<1x8x4x32xf32, #tpu.memory_space<vmem>>, vector<1x1x4x32xf32>,
    %cst_296 = arith.constant dense<0xFF800000> : vector<4xf32>
    %772 = vector.multi_reduction <maximumf>, %768, %cst_296 [1] : vector<4x32xf32> to vector<4xf32>
    %773 = vector.shape_cast %772 : vector<4xf32> to vector<4x1xf32>
    %774 = vector.broadcast %773 : vector<4x1xf32> to vector<4x32xf32>
    %775 = arith.cmpf oeq, %768, %774 : vector<4x32xf32>
    %c32_i32_297 = arith.constant 32 : i32
    %776 = vector.broadcast %c32_i32_297 : i32 to vector<4x32xi32>
    %777 = arith.select %775, %603, %776 : vector<4x32xi1>, vector<4x32xi32>
    %cst_298 = arith.constant dense<2147483647> : vector<4xi32>
    %778 = vector.multi_reduction <minsi>, %777, %cst_298 [1] : vector<4x32xi32> to vector<4xi32>
    %779 = vector.shape_cast %778 : vector<4xi32> to vector<4x1xi32>
    %780 = vector.broadcast %779 : vector<4x1xi32> to vector<4x32xi32>
    %781 = arith.cmpi eq, %603, %780 : vector<4x32xi32>
    %782 = arith.extui %781 : vector<4x32xi1> to vector<4x32xi32>
    %783 = arith.sitofp %782 : vector<4x32xi32> to vector<4x32xf32>
    %cst_299 = arith.constant dense<0.000000e+00> : vector<4x16xf32>
    %784 = tpu.matmul %783, %579, %cst_299 {dimension_numbers = #tpu.dot_dimension_numbers<[1], [0], [0], [1], [0, 0, 1, 1], [], []>} : vector<4x32xf32>, vector<32x16xf32>, vector<4x16xf32> -> vector<4x16xf32>
    %cst_300 = arith.constant dense<0.000000e+00> : vector<4x128xf32>
    %785 = tpu.matmul %784, %581, %cst_300 {dimension_numbers = #tpu.dot_dimension_numbers<[1], [0], [0], [1], [0, 0, 1, 1], [], []>} : vector<4x16xf32>, vector<16x128xf32>, vector<4x128xf32> -> vector<4x128xf32>
    %cst_301 = arith.constant dense<0.000000e+00> : vector<4x128xf32>
    %786 = tpu.matmul %731, %583, %cst_301 {dimension_numbers = #tpu.dot_dimension_numbers<[1], [0], [0], [1], [0, 0, 1, 1], [], []>} : vector<4x32xf32>, vector<32x128xf32>, vector<4x128xf32> -> vector<4x128xf32>
    %787 = arith.addf %785, %786 : vector<4x128xf32>
    %788 = arith.addf %787, %587 : vector<4x128xf32>
    %789 = vector.extract_strided_slice %788 {offsets = [0, 0], sizes = [4, 32], strides = [1, 1]} : vector<4x128xf32> to vector<4x32xf32>
    %cst_302 = arith.constant 5.000000e-01 : f32
    %790 = vector.broadcast %cst_302 : f32 to vector<4x32xf32>
    %791 = arith.mulf %790, %789 : vector<4x32xf32>
    %792 = math.tanh %791 : vector<4x32xf32>
    %cst_303 = arith.constant 5.000000e-01 : f32
    %793 = vector.broadcast %cst_303 : f32 to vector<4x32xf32>
    %794 = arith.mulf %793, %792 : vector<4x32xf32>
    %cst_304 = arith.constant 5.000000e-01 : f32
    %795 = vector.broadcast %cst_304 : f32 to vector<4x32xf32>
    %796 = arith.addf %794, %795 : vector<4x32xf32>
    %797 = vector.extract_strided_slice %788 {offsets = [0, 32], sizes = [4, 32], strides = [1, 1]} : vector<4x128xf32> to vector<4x32xf32>
    %cst_305 = arith.constant 5.000000e-01 : f32
    %798 = vector.broadcast %cst_305 : f32 to vector<4x32xf32>
    %799 = arith.mulf %798, %797 : vector<4x32xf32>
    %800 = math.tanh %799 : vector<4x32xf32>
    %cst_306 = arith.constant 5.000000e-01 : f32
    %801 = vector.broadcast %cst_306 : f32 to vector<4x32xf32>
    %802 = arith.mulf %801, %800 : vector<4x32xf32>
    %cst_307 = arith.constant 5.000000e-01 : f32
    %803 = vector.broadcast %cst_307 : f32 to vector<4x32xf32>
    %804 = arith.addf %802, %803 : vector<4x32xf32>
    %805 = vector.extract_strided_slice %788 {offsets = [0, 64], sizes = [4, 32], strides = [1, 1]} : vector<4x128xf32> to vector<4x32xf32>
    %806 = math.tanh %805 : vector<4x32xf32>
    %807 = vector.extract_strided_slice %788 {offsets = [0, 96], sizes = [4, 32], strides = [1, 1]} : vector<4x128xf32> to vector<4x32xf32>
    %cst_308 = arith.constant 5.000000e-01 : f32
    %808 = vector.broadcast %cst_308 : f32 to vector<4x32xf32>
    %809 = arith.mulf %808, %807 : vector<4x32xf32>
    %810 = math.tanh %809 : vector<4x32xf32>
    %cst_309 = arith.constant 5.000000e-01 : f32
    %811 = vector.broadcast %cst_309 : f32 to vector<4x32xf32>
    %812 = arith.mulf %811, %810 : vector<4x32xf32>
    %cst_310 = arith.constant 5.000000e-01 : f32
    %813 = vector.broadcast %cst_310 : f32 to vector<4x32xf32>
    %814 = arith.addf %812, %813 : vector<4x32xf32>
    %815 = arith.mulf %804, %729 : vector<4x32xf32>
    %816 = arith.mulf %796, %806 : vector<4x32xf32>
    %817 = arith.addf %815, %816 : vector<4x32xf32>
    %818 = math.tanh %817 : vector<4x32xf32>
    %819 = arith.mulf %814, %818 : vector<4x32xf32>
    %cst_311 = arith.constant dense<0.000000e+00> : vector<4x128xf32>
    %820 = tpu.matmul %819, %589, %cst_311 {dimension_numbers = #tpu.dot_dimension_numbers<[1], [0], [0], [1], [0, 0, 1, 1], [], []>} : vector<4x32xf32>, vector<32x128xf32>, vector<4x128xf32> -> vector<4x128xf32>
    %cst_312 = arith.constant dense<0.000000e+00> : vector<4x128xf32>
    %821 = tpu.matmul %766, %591, %cst_312 {dimension_numbers = #tpu.dot_dimension_numbers<[1], [0], [0], [1], [0, 0, 1, 1], [], []>} : vector<4x32xf32>, vector<32x128xf32>, vector<4x128xf32> -> vector<4x128xf32>
    %822 = arith.addf %820, %821 : vector<4x128xf32>
    %823 = arith.addf %822, %595 : vector<4x128xf32>
    %824 = vector.extract_strided_slice %823 {offsets = [0, 0], sizes = [4, 32], strides = [1, 1]} : vector<4x128xf32> to vector<4x32xf32>
    %cst_313 = arith.constant 5.000000e-01 : f32
    %825 = vector.broadcast %cst_313 : f32 to vector<4x32xf32>
    %826 = arith.mulf %825, %824 : vector<4x32xf32>
    %827 = math.tanh %826 : vector<4x32xf32>
    %cst_314 = arith.constant 5.000000e-01 : f32
    %828 = vector.broadcast %cst_314 : f32 to vector<4x32xf32>
    %829 = arith.mulf %828, %827 : vector<4x32xf32>
    %cst_315 = arith.constant 5.000000e-01 : f32
    %830 = vector.broadcast %cst_315 : f32 to vector<4x32xf32>
    %831 = arith.addf %829, %830 : vector<4x32xf32>
    %832 = vector.extract_strided_slice %823 {offsets = [0, 32], sizes = [4, 32], strides = [1, 1]} : vector<4x128xf32> to vector<4x32xf32>
    %cst_316 = arith.constant 5.000000e-01 : f32
    %833 = vector.broadcast %cst_316 : f32 to vector<4x32xf32>
    %834 = arith.mulf %833, %832 : vector<4x32xf32>
    %835 = math.tanh %834 : vector<4x32xf32>
    %cst_317 = arith.constant 5.000000e-01 : f32
    %836 = vector.broadcast %cst_317 : f32 to vector<4x32xf32>
    %837 = arith.mulf %836, %835 : vector<4x32xf32>
    %cst_318 = arith.constant 5.000000e-01 : f32
    %838 = vector.broadcast %cst_318 : f32 to vector<4x32xf32>
    %839 = arith.addf %837, %838 : vector<4x32xf32>
    %840 = vector.extract_strided_slice %823 {offsets = [0, 64], sizes = [4, 32], strides = [1, 1]} : vector<4x128xf32> to vector<4x32xf32>
    %841 = math.tanh %840 : vector<4x32xf32>
    %842 = vector.extract_strided_slice %823 {offsets = [0, 96], sizes = [4, 32], strides = [1, 1]} : vector<4x128xf32> to vector<4x32xf32>
    %cst_319 = arith.constant 5.000000e-01 : f32
    %843 = vector.broadcast %cst_319 : f32 to vector<4x32xf32>
    %844 = arith.mulf %843, %842 : vector<4x32xf32>
    %845 = math.tanh %844 : vector<4x32xf32>
    %cst_320 = arith.constant 5.000000e-01 : f32
    %846 = vector.broadcast %cst_320 : f32 to vector<4x32xf32>
    %847 = arith.mulf %846, %845 : vector<4x32xf32>
    %cst_321 = arith.constant 5.000000e-01 : f32
    %848 = vector.broadcast %cst_321 : f32 to vector<4x32xf32>
    %849 = arith.addf %847, %848 : vector<4x32xf32>
    %850 = arith.mulf %839, %764 : vector<4x32xf32>
    %851 = arith.mulf %831, %841 : vector<4x32xf32>
    %852 = arith.addf %850, %851 : vector<4x32xf32>
    %853 = math.tanh %852 : vector<4x32xf32>
    %854 = arith.mulf %849, %853 : vector<4x32xf32>
    %cst_322 = arith.constant dense<0.000000e+00> : vector<4x32xf32>
    %855 = tpu.matmul %854, %597, %cst_322 {dimension_numbers = #tpu.dot_dimension_numbers<[1], [0], [0], [1], [0, 0, 1, 1], [], []>} : vector<4x32xf32>, vector<32x32xf32>, vector<4x32xf32> -> vector<4x32xf32>
    %856 = arith.addf %855, %601 : vector<4x32xf32>
    %c0_323 = arith.constant 0 : index
    %c3 = arith.constant 3 : index
    %c0_324 = arith.constant 0 : index
    %c0_325 = arith.constant 0 : index
    %857 = vector.load %arg18[%c0_323, %c3, %c0_324, %c0_325] : memref<1x8x4x32xf32, #tpu.memory_space<vmem>>, vector<1x1x4x32xf32>
    %858 = vector.shape_cast %857 : vector<1x1x4x32xf32> to vector<4x32xf32>
    %859 = vector.shape_cast %856 : vector<4x32xf32> to vector<1x1x4x32xf32>
    tpu.vector_store %arg18[%c0_323, %c3, %c0_324, %c0_325], %859 {strides = array<i32>} : memref<1x8x4x32xf32, #tpu.memory_space<vmem>>, vector<1x1x4x32xf32>,
    %cst_326 = arith.constant dense<0xFF800000> : vector<4xf32>
    %860 = vector.multi_reduction <maximumf>, %856, %cst_326 [1] : vector<4x32xf32> to vector<4xf32>
    %861 = vector.shape_cast %860 : vector<4xf32> to vector<4x1xf32>
    %862 = vector.broadcast %861 : vector<4x1xf32> to vector<4x32xf32>
    %863 = arith.cmpf oeq, %856, %862 : vector<4x32xf32>
    %c32_i32_327 = arith.constant 32 : i32
    %864 = vector.broadcast %c32_i32_327 : i32 to vector<4x32xi32>
    %865 = arith.select %863, %603, %864 : vector<4x32xi1>, vector<4x32xi32>
    %cst_328 = arith.constant dense<2147483647> : vector<4xi32>
    %866 = vector.multi_reduction <minsi>, %865, %cst_328 [1] : vector<4x32xi32> to vector<4xi32>
    %867 = vector.shape_cast %866 : vector<4xi32> to vector<4x1xi32>
    %868 = vector.broadcast %867 : vector<4x1xi32> to vector<4x32xi32>
    %869 = arith.cmpi eq, %603, %868 : vector<4x32xi32>
    %870 = arith.extui %869 : vector<4x32xi1> to vector<4x32xi32>
    %871 = arith.sitofp %870 : vector<4x32xi32> to vector<4x32xf32>
    %cst_329 = arith.constant dense<0.000000e+00> : vector<4x16xf32>
    %872 = tpu.matmul %871, %579, %cst_329 {dimension_numbers = #tpu.dot_dimension_numbers<[1], [0], [0], [1], [0, 0, 1, 1], [], []>} : vector<4x32xf32>, vector<32x16xf32>, vector<4x16xf32> -> vector<4x16xf32>
    %cst_330 = arith.constant dense<0.000000e+00> : vector<4x128xf32>
    %873 = tpu.matmul %872, %581, %cst_330 {dimension_numbers = #tpu.dot_dimension_numbers<[1], [0], [0], [1], [0, 0, 1, 1], [], []>} : vector<4x16xf32>, vector<16x128xf32>, vector<4x128xf32> -> vector<4x128xf32>
    %cst_331 = arith.constant dense<0.000000e+00> : vector<4x128xf32>
    %874 = tpu.matmul %819, %583, %cst_331 {dimension_numbers = #tpu.dot_dimension_numbers<[1], [0], [0], [1], [0, 0, 1, 1], [], []>} : vector<4x32xf32>, vector<32x128xf32>, vector<4x128xf32> -> vector<4x128xf32>
    %875 = arith.addf %873, %874 : vector<4x128xf32>
    %876 = arith.addf %875, %587 : vector<4x128xf32>
    %877 = vector.extract_strided_slice %876 {offsets = [0, 0], sizes = [4, 32], strides = [1, 1]} : vector<4x128xf32> to vector<4x32xf32>
    %cst_332 = arith.constant 5.000000e-01 : f32
    %878 = vector.broadcast %cst_332 : f32 to vector<4x32xf32>
    %879 = arith.mulf %878, %877 : vector<4x32xf32>
    %880 = math.tanh %879 : vector<4x32xf32>
    %cst_333 = arith.constant 5.000000e-01 : f32
    %881 = vector.broadcast %cst_333 : f32 to vector<4x32xf32>
    %882 = arith.mulf %881, %880 : vector<4x32xf32>
    %cst_334 = arith.constant 5.000000e-01 : f32
    %883 = vector.broadcast %cst_334 : f32 to vector<4x32xf32>
    %884 = arith.addf %882, %883 : vector<4x32xf32>
    %885 = vector.extract_strided_slice %876 {offsets = [0, 32], sizes = [4, 32], strides = [1, 1]} : vector<4x128xf32> to vector<4x32xf32>
    %cst_335 = arith.constant 5.000000e-01 : f32
    %886 = vector.broadcast %cst_335 : f32 to vector<4x32xf32>
    %887 = arith.mulf %886, %885 : vector<4x32xf32>
    %888 = math.tanh %887 : vector<4x32xf32>
    %cst_336 = arith.constant 5.000000e-01 : f32
    %889 = vector.broadcast %cst_336 : f32 to vector<4x32xf32>
    %890 = arith.mulf %889, %888 : vector<4x32xf32>
    %cst_337 = arith.constant 5.000000e-01 : f32
    %891 = vector.broadcast %cst_337 : f32 to vector<4x32xf32>
    %892 = arith.addf %890, %891 : vector<4x32xf32>
    %893 = vector.extract_strided_slice %876 {offsets = [0, 64], sizes = [4, 32], strides = [1, 1]} : vector<4x128xf32> to vector<4x32xf32>
    %894 = math.tanh %893 : vector<4x32xf32>
    %895 = vector.extract_strided_slice %876 {offsets = [0, 96], sizes = [4, 32], strides = [1, 1]} : vector<4x128xf32> to vector<4x32xf32>
    %cst_338 = arith.constant 5.000000e-01 : f32
    %896 = vector.broadcast %cst_338 : f32 to vector<4x32xf32>
    %897 = arith.mulf %896, %895 : vector<4x32xf32>
    %898 = math.tanh %897 : vector<4x32xf32>
    %cst_339 = arith.constant 5.000000e-01 : f32
    %899 = vector.broadcast %cst_339 : f32 to vector<4x32xf32>
    %900 = arith.mulf %899, %898 : vector<4x32xf32>
    %cst_340 = arith.constant 5.000000e-01 : f32
    %901 = vector.broadcast %cst_340 : f32 to vector<4x32xf32>
    %902 = arith.addf %900, %901 : vector<4x32xf32>
    %903 = arith.mulf %892, %817 : vector<4x32xf32>
    %904 = arith.mulf %884, %894 : vector<4x32xf32>
    %905 = arith.addf %903, %904 : vector<4x32xf32>
    %906 = math.tanh %905 : vector<4x32xf32>
    %907 = arith.mulf %902, %906 : vector<4x32xf32>
    %cst_341 = arith.constant dense<0.000000e+00> : vector<4x128xf32>
    %908 = tpu.matmul %907, %589, %cst_341 {dimension_numbers = #tpu.dot_dimension_numbers<[1], [0], [0], [1], [0, 0, 1, 1], [], []>} : vector<4x32xf32>, vector<32x128xf32>, vector<4x128xf32> -> vector<4x128xf32>
    %cst_342 = arith.constant dense<0.000000e+00> : vector<4x128xf32>
    %909 = tpu.matmul %854, %591, %cst_342 {dimension_numbers = #tpu.dot_dimension_numbers<[1], [0], [0], [1], [0, 0, 1, 1], [], []>} : vector<4x32xf32>, vector<32x128xf32>, vector<4x128xf32> -> vector<4x128xf32>
    %910 = arith.addf %908, %909 : vector<4x128xf32>
    %911 = arith.addf %910, %595 : vector<4x128xf32>
    %912 = vector.extract_strided_slice %911 {offsets = [0, 0], sizes = [4, 32], strides = [1, 1]} : vector<4x128xf32> to vector<4x32xf32>
    %cst_343 = arith.constant 5.000000e-01 : f32
    %913 = vector.broadcast %cst_343 : f32 to vector<4x32xf32>
    %914 = arith.mulf %913, %912 : vector<4x32xf32>
    %915 = math.tanh %914 : vector<4x32xf32>
    %cst_344 = arith.constant 5.000000e-01 : f32
    %916 = vector.broadcast %cst_344 : f32 to vector<4x32xf32>
    %917 = arith.mulf %916, %915 : vector<4x32xf32>
    %cst_345 = arith.constant 5.000000e-01 : f32
    %918 = vector.broadcast %cst_345 : f32 to vector<4x32xf32>
    %919 = arith.addf %917, %918 : vector<4x32xf32>
    %920 = vector.extract_strided_slice %911 {offsets = [0, 32], sizes = [4, 32], strides = [1, 1]} : vector<4x128xf32> to vector<4x32xf32>
    %cst_346 = arith.constant 5.000000e-01 : f32
    %921 = vector.broadcast %cst_346 : f32 to vector<4x32xf32>
    %922 = arith.mulf %921, %920 : vector<4x32xf32>
    %923 = math.tanh %922 : vector<4x32xf32>
    %cst_347 = arith.constant 5.000000e-01 : f32
    %924 = vector.broadcast %cst_347 : f32 to vector<4x32xf32>
    %925 = arith.mulf %924, %923 : vector<4x32xf32>
    %cst_348 = arith.constant 5.000000e-01 : f32
    %926 = vector.broadcast %cst_348 : f32 to vector<4x32xf32>
    %927 = arith.addf %925, %926 : vector<4x32xf32>
    %928 = vector.extract_strided_slice %911 {offsets = [0, 64], sizes = [4, 32], strides = [1, 1]} : vector<4x128xf32> to vector<4x32xf32>
    %929 = math.tanh %928 : vector<4x32xf32>
    %930 = vector.extract_strided_slice %911 {offsets = [0, 96], sizes = [4, 32], strides = [1, 1]} : vector<4x128xf32> to vector<4x32xf32>
    %cst_349 = arith.constant 5.000000e-01 : f32
    %931 = vector.broadcast %cst_349 : f32 to vector<4x32xf32>
    %932 = arith.mulf %931, %930 : vector<4x32xf32>
    %933 = math.tanh %932 : vector<4x32xf32>
    %cst_350 = arith.constant 5.000000e-01 : f32
    %934 = vector.broadcast %cst_350 : f32 to vector<4x32xf32>
    %935 = arith.mulf %934, %933 : vector<4x32xf32>
    %cst_351 = arith.constant 5.000000e-01 : f32
    %936 = vector.broadcast %cst_351 : f32 to vector<4x32xf32>
    %937 = arith.addf %935, %936 : vector<4x32xf32>
    %938 = arith.mulf %927, %852 : vector<4x32xf32>
    %939 = arith.mulf %919, %929 : vector<4x32xf32>
    %940 = arith.addf %938, %939 : vector<4x32xf32>
    %941 = math.tanh %940 : vector<4x32xf32>
    %942 = arith.mulf %937, %941 : vector<4x32xf32>
    %cst_352 = arith.constant dense<0.000000e+00> : vector<4x32xf32>
    %943 = tpu.matmul %942, %597, %cst_352 {dimension_numbers = #tpu.dot_dimension_numbers<[1], [0], [0], [1], [0, 0, 1, 1], [], []>} : vector<4x32xf32>, vector<32x32xf32>, vector<4x32xf32> -> vector<4x32xf32>
    %944 = arith.addf %943, %601 : vector<4x32xf32>
    %c0_353 = arith.constant 0 : index
    %c4_354 = arith.constant 4 : index
    %c0_355 = arith.constant 0 : index
    %c0_356 = arith.constant 0 : index
    %945 = vector.load %arg18[%c0_353, %c4_354, %c0_355, %c0_356] : memref<1x8x4x32xf32, #tpu.memory_space<vmem>>, vector<1x1x4x32xf32>
    %946 = vector.shape_cast %945 : vector<1x1x4x32xf32> to vector<4x32xf32>
    %947 = vector.shape_cast %944 : vector<4x32xf32> to vector<1x1x4x32xf32>
    tpu.vector_store %arg18[%c0_353, %c4_354, %c0_355, %c0_356], %947 {strides = array<i32>} : memref<1x8x4x32xf32, #tpu.memory_space<vmem>>, vector<1x1x4x32xf32>,
    %cst_357 = arith.constant dense<0xFF800000> : vector<4xf32>
    %948 = vector.multi_reduction <maximumf>, %944, %cst_357 [1] : vector<4x32xf32> to vector<4xf32>
    %949 = vector.shape_cast %948 : vector<4xf32> to vector<4x1xf32>
    %950 = vector.broadcast %949 : vector<4x1xf32> to vector<4x32xf32>
    %951 = arith.cmpf oeq, %944, %950 : vector<4x32xf32>
    %c32_i32_358 = arith.constant 32 : i32
    %952 = vector.broadcast %c32_i32_358 : i32 to vector<4x32xi32>
    %953 = arith.select %951, %603, %952 : vector<4x32xi1>, vector<4x32xi32>
    %cst_359 = arith.constant dense<2147483647> : vector<4xi32>
    %954 = vector.multi_reduction <minsi>, %953, %cst_359 [1] : vector<4x32xi32> to vector<4xi32>
    %955 = vector.shape_cast %954 : vector<4xi32> to vector<4x1xi32>
    %956 = vector.broadcast %955 : vector<4x1xi32> to vector<4x32xi32>
    %957 = arith.cmpi eq, %603, %956 : vector<4x32xi32>
    %958 = arith.extui %957 : vector<4x32xi1> to vector<4x32xi32>
    %959 = arith.sitofp %958 : vector<4x32xi32> to vector<4x32xf32>
    %cst_360 = arith.constant dense<0.000000e+00> : vector<4x16xf32>
    %960 = tpu.matmul %959, %579, %cst_360 {dimension_numbers = #tpu.dot_dimension_numbers<[1], [0], [0], [1], [0, 0, 1, 1], [], []>} : vector<4x32xf32>, vector<32x16xf32>, vector<4x16xf32> -> vector<4x16xf32>
    %cst_361 = arith.constant dense<0.000000e+00> : vector<4x128xf32>
    %961 = tpu.matmul %960, %581, %cst_361 {dimension_numbers = #tpu.dot_dimension_numbers<[1], [0], [0], [1], [0, 0, 1, 1], [], []>} : vector<4x16xf32>, vector<16x128xf32>, vector<4x128xf32> -> vector<4x128xf32>
    %cst_362 = arith.constant dense<0.000000e+00> : vector<4x128xf32>
    %962 = tpu.matmul %907, %583, %cst_362 {dimension_numbers = #tpu.dot_dimension_numbers<[1], [0], [0], [1], [0, 0, 1, 1], [], []>} : vector<4x32xf32>, vector<32x128xf32>, vector<4x128xf32> -> vector<4x128xf32>
    %963 = arith.addf %961, %962 : vector<4x128xf32>
    %964 = arith.addf %963, %587 : vector<4x128xf32>
    %965 = vector.extract_strided_slice %964 {offsets = [0, 0], sizes = [4, 32], strides = [1, 1]} : vector<4x128xf32> to vector<4x32xf32>
    %cst_363 = arith.constant 5.000000e-01 : f32
    %966 = vector.broadcast %cst_363 : f32 to vector<4x32xf32>
    %967 = arith.mulf %966, %965 : vector<4x32xf32>
    %968 = math.tanh %967 : vector<4x32xf32>
    %cst_364 = arith.constant 5.000000e-01 : f32
    %969 = vector.broadcast %cst_364 : f32 to vector<4x32xf32>
    %970 = arith.mulf %969, %968 : vector<4x32xf32>
    %cst_365 = arith.constant 5.000000e-01 : f32
    %971 = vector.broadcast %cst_365 : f32 to vector<4x32xf32>
    %972 = arith.addf %970, %971 : vector<4x32xf32>
    %973 = vector.extract_strided_slice %964 {offsets = [0, 32], sizes = [4, 32], strides = [1, 1]} : vector<4x128xf32> to vector<4x32xf32>
    %cst_366 = arith.constant 5.000000e-01 : f32
    %974 = vector.broadcast %cst_366 : f32 to vector<4x32xf32>
    %975 = arith.mulf %974, %973 : vector<4x32xf32>
    %976 = math.tanh %975 : vector<4x32xf32>
    %cst_367 = arith.constant 5.000000e-01 : f32
    %977 = vector.broadcast %cst_367 : f32 to vector<4x32xf32>
    %978 = arith.mulf %977, %976 : vector<4x32xf32>
    %cst_368 = arith.constant 5.000000e-01 : f32
    %979 = vector.broadcast %cst_368 : f32 to vector<4x32xf32>
    %980 = arith.addf %978, %979 : vector<4x32xf32>
    %981 = vector.extract_strided_slice %964 {offsets = [0, 64], sizes = [4, 32], strides = [1, 1]} : vector<4x128xf32> to vector<4x32xf32>
    %982 = math.tanh %981 : vector<4x32xf32>
    %983 = vector.extract_strided_slice %964 {offsets = [0, 96], sizes = [4, 32], strides = [1, 1]} : vector<4x128xf32> to vector<4x32xf32>
    %cst_369 = arith.constant 5.000000e-01 : f32
    %984 = vector.broadcast %cst_369 : f32 to vector<4x32xf32>
    %985 = arith.mulf %984, %983 : vector<4x32xf32>
    %986 = math.tanh %985 : vector<4x32xf32>
    %cst_370 = arith.constant 5.000000e-01 : f32
    %987 = vector.broadcast %cst_370 : f32 to vector<4x32xf32>
    %988 = arith.mulf %987, %986 : vector<4x32xf32>
    %cst_371 = arith.constant 5.000000e-01 : f32
    %989 = vector.broadcast %cst_371 : f32 to vector<4x32xf32>
    %990 = arith.addf %988, %989 : vector<4x32xf32>
    %991 = arith.mulf %980, %905 : vector<4x32xf32>
    %992 = arith.mulf %972, %982 : vector<4x32xf32>
    %993 = arith.addf %991, %992 : vector<4x32xf32>
    %994 = math.tanh %993 : vector<4x32xf32>
    %995 = arith.mulf %990, %994 : vector<4x32xf32>
    %cst_372 = arith.constant dense<0.000000e+00> : vector<4x128xf32>
    %996 = tpu.matmul %995, %589, %cst_372 {dimension_numbers = #tpu.dot_dimension_numbers<[1], [0], [0], [1], [0, 0, 1, 1], [], []>} : vector<4x32xf32>, vector<32x128xf32>, vector<4x128xf32> -> vector<4x128xf32>
    %cst_373 = arith.constant dense<0.000000e+00> : vector<4x128xf32>
    %997 = tpu.matmul %942, %591, %cst_373 {dimension_numbers = #tpu.dot_dimension_numbers<[1], [0], [0], [1], [0, 0, 1, 1], [], []>} : vector<4x32xf32>, vector<32x128xf32>, vector<4x128xf32> -> vector<4x128xf32>
    %998 = arith.addf %996, %997 : vector<4x128xf32>
    %999 = arith.addf %998, %595 : vector<4x128xf32>
    %1000 = vector.extract_strided_slice %999 {offsets = [0, 0], sizes = [4, 32], strides = [1, 1]} : vector<4x128xf32> to vector<4x32xf32>
    %cst_374 = arith.constant 5.000000e-01 : f32
    %1001 = vector.broadcast %cst_374 : f32 to vector<4x32xf32>
    %1002 = arith.mulf %1001, %1000 : vector<4x32xf32>
    %1003 = math.tanh %1002 : vector<4x32xf32>
    %cst_375 = arith.constant 5.000000e-01 : f32
    %1004 = vector.broadcast %cst_375 : f32 to vector<4x32xf32>
    %1005 = arith.mulf %1004, %1003 : vector<4x32xf32>
    %cst_376 = arith.constant 5.000000e-01 : f32
    %1006 = vector.broadcast %cst_376 : f32 to vector<4x32xf32>
    %1007 = arith.addf %1005, %1006 : vector<4x32xf32>
    %1008 = vector.extract_strided_slice %999 {offsets = [0, 32], sizes = [4, 32], strides = [1, 1]} : vector<4x128xf32> to vector<4x32xf32>
    %cst_377 = arith.constant 5.000000e-01 : f32
    %1009 = vector.broadcast %cst_377 : f32 to vector<4x32xf32>
    %1010 = arith.mulf %1009, %1008 : vector<4x32xf32>
    %1011 = math.tanh %1010 : vector<4x32xf32>
    %cst_378 = arith.constant 5.000000e-01 : f32
    %1012 = vector.broadcast %cst_378 : f32 to vector<4x32xf32>
    %1013 = arith.mulf %1012, %1011 : vector<4x32xf32>
    %cst_379 = arith.constant 5.000000e-01 : f32
    %1014 = vector.broadcast %cst_379 : f32 to vector<4x32xf32>
    %1015 = arith.addf %1013, %1014 : vector<4x32xf32>
    %1016 = vector.extract_strided_slice %999 {offsets = [0, 64], sizes = [4, 32], strides = [1, 1]} : vector<4x128xf32> to vector<4x32xf32>
    %1017 = math.tanh %1016 : vector<4x32xf32>
    %1018 = vector.extract_strided_slice %999 {offsets = [0, 96], sizes = [4, 32], strides = [1, 1]} : vector<4x128xf32> to vector<4x32xf32>
    %cst_380 = arith.constant 5.000000e-01 : f32
    %1019 = vector.broadcast %cst_380 : f32 to vector<4x32xf32>
    %1020 = arith.mulf %1019, %1018 : vector<4x32xf32>
    %1021 = math.tanh %1020 : vector<4x32xf32>
    %cst_381 = arith.constant 5.000000e-01 : f32
    %1022 = vector.broadcast %cst_381 : f32 to vector<4x32xf32>
    %1023 = arith.mulf %1022, %1021 : vector<4x32xf32>
    %cst_382 = arith.constant 5.000000e-01 : f32
    %1024 = vector.broadcast %cst_382 : f32 to vector<4x32xf32>
    %1025 = arith.addf %1023, %1024 : vector<4x32xf32>
    %1026 = arith.mulf %1015, %940 : vector<4x32xf32>
    %1027 = arith.mulf %1007, %1017 : vector<4x32xf32>
    %1028 = arith.addf %1026, %1027 : vector<4x32xf32>
    %1029 = math.tanh %1028 : vector<4x32xf32>
    %1030 = arith.mulf %1025, %1029 : vector<4x32xf32>
    %cst_383 = arith.constant dense<0.000000e+00> : vector<4x32xf32>
    %1031 = tpu.matmul %1030, %597, %cst_383 {dimension_numbers = #tpu.dot_dimension_numbers<[1], [0], [0], [1], [0, 0, 1, 1], [], []>} : vector<4x32xf32>, vector<32x32xf32>, vector<4x32xf32> -> vector<4x32xf32>
    %1032 = arith.addf %1031, %601 : vector<4x32xf32>
    %c0_384 = arith.constant 0 : index
    %c5 = arith.constant 5 : index
    %c0_385 = arith.constant 0 : index
    %c0_386 = arith.constant 0 : index
    %1033 = vector.load %arg18[%c0_384, %c5, %c0_385, %c0_386] : memref<1x8x4x32xf32, #tpu.memory_space<vmem>>, vector<1x1x4x32xf32>
    %1034 = vector.shape_cast %1033 : vector<1x1x4x32xf32> to vector<4x32xf32>
    %1035 = vector.shape_cast %1032 : vector<4x32xf32> to vector<1x1x4x32xf32>
    tpu.vector_store %arg18[%c0_384, %c5, %c0_385, %c0_386], %1035 {strides = array<i32>} : memref<1x8x4x32xf32, #tpu.memory_space<vmem>>, vector<1x1x4x32xf32>,
    %cst_387 = arith.constant dense<0xFF800000> : vector<4xf32>
    %1036 = vector.multi_reduction <maximumf>, %1032, %cst_387 [1] : vector<4x32xf32> to vector<4xf32>
    %1037 = vector.shape_cast %1036 : vector<4xf32> to vector<4x1xf32>
    %1038 = vector.broadcast %1037 : vector<4x1xf32> to vector<4x32xf32>
    %1039 = arith.cmpf oeq, %1032, %1038 : vector<4x32xf32>
    %c32_i32_388 = arith.constant 32 : i32
    %1040 = vector.broadcast %c32_i32_388 : i32 to vector<4x32xi32>
    %1041 = arith.select %1039, %603, %1040 : vector<4x32xi1>, vector<4x32xi32>
    %cst_389 = arith.constant dense<2147483647> : vector<4xi32>
    %1042 = vector.multi_reduction <minsi>, %1041, %cst_389 [1] : vector<4x32xi32> to vector<4xi32>
    %1043 = vector.shape_cast %1042 : vector<4xi32> to vector<4x1xi32>
    %1044 = vector.broadcast %1043 : vector<4x1xi32> to vector<4x32xi32>
    %1045 = arith.cmpi eq, %603, %1044 : vector<4x32xi32>
    %1046 = arith.extui %1045 : vector<4x32xi1> to vector<4x32xi32>
    %1047 = arith.sitofp %1046 : vector<4x32xi32> to vector<4x32xf32>
    %cst_390 = arith.constant dense<0.000000e+00> : vector<4x16xf32>
    %1048 = tpu.matmul %1047, %579, %cst_390 {dimension_numbers = #tpu.dot_dimension_numbers<[1], [0], [0], [1], [0, 0, 1, 1], [], []>} : vector<4x32xf32>, vector<32x16xf32>, vector<4x16xf32> -> vector<4x16xf32>
    %cst_391 = arith.constant dense<0.000000e+00> : vector<4x128xf32>
    %1049 = tpu.matmul %1048, %581, %cst_391 {dimension_numbers = #tpu.dot_dimension_numbers<[1], [0], [0], [1], [0, 0, 1, 1], [], []>} : vector<4x16xf32>, vector<16x128xf32>, vector<4x128xf32> -> vector<4x128xf32>
    %cst_392 = arith.constant dense<0.000000e+00> : vector<4x128xf32>
    %1050 = tpu.matmul %995, %583, %cst_392 {dimension_numbers = #tpu.dot_dimension_numbers<[1], [0], [0], [1], [0, 0, 1, 1], [], []>} : vector<4x32xf32>, vector<32x128xf32>, vector<4x128xf32> -> vector<4x128xf32>
    %1051 = arith.addf %1049, %1050 : vector<4x128xf32>
    %1052 = arith.addf %1051, %587 : vector<4x128xf32>
    %1053 = vector.extract_strided_slice %1052 {offsets = [0, 0], sizes = [4, 32], strides = [1, 1]} : vector<4x128xf32> to vector<4x32xf32>
    %cst_393 = arith.constant 5.000000e-01 : f32
    %1054 = vector.broadcast %cst_393 : f32 to vector<4x32xf32>
    %1055 = arith.mulf %1054, %1053 : vector<4x32xf32>
    %1056 = math.tanh %1055 : vector<4x32xf32>
    %cst_394 = arith.constant 5.000000e-01 : f32
    %1057 = vector.broadcast %cst_394 : f32 to vector<4x32xf32>
    %1058 = arith.mulf %1057, %1056 : vector<4x32xf32>
    %cst_395 = arith.constant 5.000000e-01 : f32
    %1059 = vector.broadcast %cst_395 : f32 to vector<4x32xf32>
    %1060 = arith.addf %1058, %1059 : vector<4x32xf32>
    %1061 = vector.extract_strided_slice %1052 {offsets = [0, 32], sizes = [4, 32], strides = [1, 1]} : vector<4x128xf32> to vector<4x32xf32>
    %cst_396 = arith.constant 5.000000e-01 : f32
    %1062 = vector.broadcast %cst_396 : f32 to vector<4x32xf32>
    %1063 = arith.mulf %1062, %1061 : vector<4x32xf32>
    %1064 = math.tanh %1063 : vector<4x32xf32>
    %cst_397 = arith.constant 5.000000e-01 : f32
    %1065 = vector.broadcast %cst_397 : f32 to vector<4x32xf32>
    %1066 = arith.mulf %1065, %1064 : vector<4x32xf32>
    %cst_398 = arith.constant 5.000000e-01 : f32
    %1067 = vector.broadcast %cst_398 : f32 to vector<4x32xf32>
    %1068 = arith.addf %1066, %1067 : vector<4x32xf32>
    %1069 = vector.extract_strided_slice %1052 {offsets = [0, 64], sizes = [4, 32], strides = [1, 1]} : vector<4x128xf32> to vector<4x32xf32>
    %1070 = math.tanh %1069 : vector<4x32xf32>
    %1071 = vector.extract_strided_slice %1052 {offsets = [0, 96], sizes = [4, 32], strides = [1, 1]} : vector<4x128xf32> to vector<4x32xf32>
    %cst_399 = arith.constant 5.000000e-01 : f32
    %1072 = vector.broadcast %cst_399 : f32 to vector<4x32xf32>
    %1073 = arith.mulf %1072, %1071 : vector<4x32xf32>
    %1074 = math.tanh %1073 : vector<4x32xf32>
    %cst_400 = arith.constant 5.000000e-01 : f32
    %1075 = vector.broadcast %cst_400 : f32 to vector<4x32xf32>
    %1076 = arith.mulf %1075, %1074 : vector<4x32xf32>
    %cst_401 = arith.constant 5.000000e-01 : f32
    %1077 = vector.broadcast %cst_401 : f32 to vector<4x32xf32>
    %1078 = arith.addf %1076, %1077 : vector<4x32xf32>
    %1079 = arith.mulf %1068, %993 : vector<4x32xf32>
    %1080 = arith.mulf %1060, %1070 : vector<4x32xf32>
    %1081 = arith.addf %1079, %1080 : vector<4x32xf32>
    %1082 = math.tanh %1081 : vector<4x32xf32>
    %1083 = arith.mulf %1078, %1082 : vector<4x32xf32>
    %cst_402 = arith.constant dense<0.000000e+00> : vector<4x128xf32>
    %1084 = tpu.matmul %1083, %589, %cst_402 {dimension_numbers = #tpu.dot_dimension_numbers<[1], [0], [0], [1], [0, 0, 1, 1], [], []>} : vector<4x32xf32>, vector<32x128xf32>, vector<4x128xf32> -> vector<4x128xf32>
    %cst_403 = arith.constant dense<0.000000e+00> : vector<4x128xf32>
    %1085 = tpu.matmul %1030, %591, %cst_403 {dimension_numbers = #tpu.dot_dimension_numbers<[1], [0], [0], [1], [0, 0, 1, 1], [], []>} : vector<4x32xf32>, vector<32x128xf32>, vector<4x128xf32> -> vector<4x128xf32>
    %1086 = arith.addf %1084, %1085 : vector<4x128xf32>
    %1087 = arith.addf %1086, %595 : vector<4x128xf32>
    %1088 = vector.extract_strided_slice %1087 {offsets = [0, 0], sizes = [4, 32], strides = [1, 1]} : vector<4x128xf32> to vector<4x32xf32>
    %cst_404 = arith.constant 5.000000e-01 : f32
    %1089 = vector.broadcast %cst_404 : f32 to vector<4x32xf32>
    %1090 = arith.mulf %1089, %1088 : vector<4x32xf32>
    %1091 = math.tanh %1090 : vector<4x32xf32>
    %cst_405 = arith.constant 5.000000e-01 : f32
    %1092 = vector.broadcast %cst_405 : f32 to vector<4x32xf32>
    %1093 = arith.mulf %1092, %1091 : vector<4x32xf32>
    %cst_406 = arith.constant 5.000000e-01 : f32
    %1094 = vector.broadcast %cst_406 : f32 to vector<4x32xf32>
    %1095 = arith.addf %1093, %1094 : vector<4x32xf32>
    %1096 = vector.extract_strided_slice %1087 {offsets = [0, 32], sizes = [4, 32], strides = [1, 1]} : vector<4x128xf32> to vector<4x32xf32>
    %cst_407 = arith.constant 5.000000e-01 : f32
    %1097 = vector.broadcast %cst_407 : f32 to vector<4x32xf32>
    %1098 = arith.mulf %1097, %1096 : vector<4x32xf32>
    %1099 = math.tanh %1098 : vector<4x32xf32>
    %cst_408 = arith.constant 5.000000e-01 : f32
    %1100 = vector.broadcast %cst_408 : f32 to vector<4x32xf32>
    %1101 = arith.mulf %1100, %1099 : vector<4x32xf32>
    %cst_409 = arith.constant 5.000000e-01 : f32
    %1102 = vector.broadcast %cst_409 : f32 to vector<4x32xf32>
    %1103 = arith.addf %1101, %1102 : vector<4x32xf32>
    %1104 = vector.extract_strided_slice %1087 {offsets = [0, 64], sizes = [4, 32], strides = [1, 1]} : vector<4x128xf32> to vector<4x32xf32>
    %1105 = math.tanh %1104 : vector<4x32xf32>
    %1106 = vector.extract_strided_slice %1087 {offsets = [0, 96], sizes = [4, 32], strides = [1, 1]} : vector<4x128xf32> to vector<4x32xf32>
    %cst_410 = arith.constant 5.000000e-01 : f32
    %1107 = vector.broadcast %cst_410 : f32 to vector<4x32xf32>
    %1108 = arith.mulf %1107, %1106 : vector<4x32xf32>
    %1109 = math.tanh %1108 : vector<4x32xf32>
    %cst_411 = arith.constant 5.000000e-01 : f32
    %1110 = vector.broadcast %cst_411 : f32 to vector<4x32xf32>
    %1111 = arith.mulf %1110, %1109 : vector<4x32xf32>
    %cst_412 = arith.constant 5.000000e-01 : f32
    %1112 = vector.broadcast %cst_412 : f32 to vector<4x32xf32>
    %1113 = arith.addf %1111, %1112 : vector<4x32xf32>
    %1114 = arith.mulf %1103, %1028 : vector<4x32xf32>
    %1115 = arith.mulf %1095, %1105 : vector<4x32xf32>
    %1116 = arith.addf %1114, %1115 : vector<4x32xf32>
    %1117 = math.tanh %1116 : vector<4x32xf32>
    %1118 = arith.mulf %1113, %1117 : vector<4x32xf32>
    %cst_413 = arith.constant dense<0.000000e+00> : vector<4x32xf32>
    %1119 = tpu.matmul %1118, %597, %cst_413 {dimension_numbers = #tpu.dot_dimension_numbers<[1], [0], [0], [1], [0, 0, 1, 1], [], []>} : vector<4x32xf32>, vector<32x32xf32>, vector<4x32xf32> -> vector<4x32xf32>
    %1120 = arith.addf %1119, %601 : vector<4x32xf32>
    %c0_414 = arith.constant 0 : index
    %c6 = arith.constant 6 : index
    %c0_415 = arith.constant 0 : index
    %c0_416 = arith.constant 0 : index
    %1121 = vector.load %arg18[%c0_414, %c6, %c0_415, %c0_416] : memref<1x8x4x32xf32, #tpu.memory_space<vmem>>, vector<1x1x4x32xf32>
    %1122 = vector.shape_cast %1121 : vector<1x1x4x32xf32> to vector<4x32xf32>
    %1123 = vector.shape_cast %1120 : vector<4x32xf32> to vector<1x1x4x32xf32>
    tpu.vector_store %arg18[%c0_414, %c6, %c0_415, %c0_416], %1123 {strides = array<i32>} : memref<1x8x4x32xf32, #tpu.memory_space<vmem>>, vector<1x1x4x32xf32>,
    %cst_417 = arith.constant dense<0xFF800000> : vector<4xf32>
    %1124 = vector.multi_reduction <maximumf>, %1120, %cst_417 [1] : vector<4x32xf32> to vector<4xf32>
    %1125 = vector.shape_cast %1124 : vector<4xf32> to vector<4x1xf32>
    %1126 = vector.broadcast %1125 : vector<4x1xf32> to vector<4x32xf32>
    %1127 = arith.cmpf oeq, %1120, %1126 : vector<4x32xf32>
    %c32_i32_418 = arith.constant 32 : i32
    %1128 = vector.broadcast %c32_i32_418 : i32 to vector<4x32xi32>
    %1129 = arith.select %1127, %603, %1128 : vector<4x32xi1>, vector<4x32xi32>
    %cst_419 = arith.constant dense<2147483647> : vector<4xi32>
    %1130 = vector.multi_reduction <minsi>, %1129, %cst_419 [1] : vector<4x32xi32> to vector<4xi32>
    %1131 = vector.shape_cast %1130 : vector<4xi32> to vector<4x1xi32>
    %1132 = vector.broadcast %1131 : vector<4x1xi32> to vector<4x32xi32>
    %1133 = arith.cmpi eq, %603, %1132 : vector<4x32xi32>
    %1134 = arith.extui %1133 : vector<4x32xi1> to vector<4x32xi32>
    %1135 = arith.sitofp %1134 : vector<4x32xi32> to vector<4x32xf32>
    %cst_420 = arith.constant dense<0.000000e+00> : vector<4x16xf32>
    %1136 = tpu.matmul %1135, %579, %cst_420 {dimension_numbers = #tpu.dot_dimension_numbers<[1], [0], [0], [1], [0, 0, 1, 1], [], []>} : vector<4x32xf32>, vector<32x16xf32>, vector<4x16xf32> -> vector<4x16xf32>
    %cst_421 = arith.constant dense<0.000000e+00> : vector<4x128xf32>
    %1137 = tpu.matmul %1136, %581, %cst_421 {dimension_numbers = #tpu.dot_dimension_numbers<[1], [0], [0], [1], [0, 0, 1, 1], [], []>} : vector<4x16xf32>, vector<16x128xf32>, vector<4x128xf32> -> vector<4x128xf32>
    %cst_422 = arith.constant dense<0.000000e+00> : vector<4x128xf32>
    %1138 = tpu.matmul %1083, %583, %cst_422 {dimension_numbers = #tpu.dot_dimension_numbers<[1], [0], [0], [1], [0, 0, 1, 1], [], []>} : vector<4x32xf32>, vector<32x128xf32>, vector<4x128xf32> -> vector<4x128xf32>
    %1139 = arith.addf %1137, %1138 : vector<4x128xf32>
    %1140 = arith.addf %1139, %587 : vector<4x128xf32>
    %1141 = vector.extract_strided_slice %1140 {offsets = [0, 0], sizes = [4, 32], strides = [1, 1]} : vector<4x128xf32> to vector<4x32xf32>
    %cst_423 = arith.constant 5.000000e-01 : f32
    %1142 = vector.broadcast %cst_423 : f32 to vector<4x32xf32>
    %1143 = arith.mulf %1142, %1141 : vector<4x32xf32>
    %1144 = math.tanh %1143 : vector<4x32xf32>
    %cst_424 = arith.constant 5.000000e-01 : f32
    %1145 = vector.broadcast %cst_424 : f32 to vector<4x32xf32>
    %1146 = arith.mulf %1145, %1144 : vector<4x32xf32>
    %cst_425 = arith.constant 5.000000e-01 : f32
    %1147 = vector.broadcast %cst_425 : f32 to vector<4x32xf32>
    %1148 = arith.addf %1146, %1147 : vector<4x32xf32>
    %1149 = vector.extract_strided_slice %1140 {offsets = [0, 32], sizes = [4, 32], strides = [1, 1]} : vector<4x128xf32> to vector<4x32xf32>
    %cst_426 = arith.constant 5.000000e-01 : f32
    %1150 = vector.broadcast %cst_426 : f32 to vector<4x32xf32>
    %1151 = arith.mulf %1150, %1149 : vector<4x32xf32>
    %1152 = math.tanh %1151 : vector<4x32xf32>
    %cst_427 = arith.constant 5.000000e-01 : f32
    %1153 = vector.broadcast %cst_427 : f32 to vector<4x32xf32>
    %1154 = arith.mulf %1153, %1152 : vector<4x32xf32>
    %cst_428 = arith.constant 5.000000e-01 : f32
    %1155 = vector.broadcast %cst_428 : f32 to vector<4x32xf32>
    %1156 = arith.addf %1154, %1155 : vector<4x32xf32>
    %1157 = vector.extract_strided_slice %1140 {offsets = [0, 64], sizes = [4, 32], strides = [1, 1]} : vector<4x128xf32> to vector<4x32xf32>
    %1158 = math.tanh %1157 : vector<4x32xf32>
    %1159 = vector.extract_strided_slice %1140 {offsets = [0, 96], sizes = [4, 32], strides = [1, 1]} : vector<4x128xf32> to vector<4x32xf32>
    %cst_429 = arith.constant 5.000000e-01 : f32
    %1160 = vector.broadcast %cst_429 : f32 to vector<4x32xf32>
    %1161 = arith.mulf %1160, %1159 : vector<4x32xf32>
    %1162 = math.tanh %1161 : vector<4x32xf32>
    %cst_430 = arith.constant 5.000000e-01 : f32
    %1163 = vector.broadcast %cst_430 : f32 to vector<4x32xf32>
    %1164 = arith.mulf %1163, %1162 : vector<4x32xf32>
    %cst_431 = arith.constant 5.000000e-01 : f32
    %1165 = vector.broadcast %cst_431 : f32 to vector<4x32xf32>
    %1166 = arith.addf %1164, %1165 : vector<4x32xf32>
    %1167 = arith.mulf %1156, %1081 : vector<4x32xf32>
    %1168 = arith.mulf %1148, %1158 : vector<4x32xf32>
    %1169 = arith.addf %1167, %1168 : vector<4x32xf32>
    %1170 = math.tanh %1169 : vector<4x32xf32>
    %1171 = arith.mulf %1166, %1170 : vector<4x32xf32>
    %cst_432 = arith.constant dense<0.000000e+00> : vector<4x128xf32>
    %1172 = tpu.matmul %1171, %589, %cst_432 {dimension_numbers = #tpu.dot_dimension_numbers<[1], [0], [0], [1], [0, 0, 1, 1], [], []>} : vector<4x32xf32>, vector<32x128xf32>, vector<4x128xf32> -> vector<4x128xf32>
    %cst_433 = arith.constant dense<0.000000e+00> : vector<4x128xf32>
    %1173 = tpu.matmul %1118, %591, %cst_433 {dimension_numbers = #tpu.dot_dimension_numbers<[1], [0], [0], [1], [0, 0, 1, 1], [], []>} : vector<4x32xf32>, vector<32x128xf32>, vector<4x128xf32> -> vector<4x128xf32>
    %1174 = arith.addf %1172, %1173 : vector<4x128xf32>
    %1175 = arith.addf %1174, %595 : vector<4x128xf32>
    %1176 = vector.extract_strided_slice %1175 {offsets = [0, 0], sizes = [4, 32], strides = [1, 1]} : vector<4x128xf32> to vector<4x32xf32>
    %cst_434 = arith.constant 5.000000e-01 : f32
    %1177 = vector.broadcast %cst_434 : f32 to vector<4x32xf32>
    %1178 = arith.mulf %1177, %1176 : vector<4x32xf32>
    %1179 = math.tanh %1178 : vector<4x32xf32>
    %cst_435 = arith.constant 5.000000e-01 : f32
    %1180 = vector.broadcast %cst_435 : f32 to vector<4x32xf32>
    %1181 = arith.mulf %1180, %1179 : vector<4x32xf32>
    %cst_436 = arith.constant 5.000000e-01 : f32
    %1182 = vector.broadcast %cst_436 : f32 to vector<4x32xf32>
    %1183 = arith.addf %1181, %1182 : vector<4x32xf32>
    %1184 = vector.extract_strided_slice %1175 {offsets = [0, 32], sizes = [4, 32], strides = [1, 1]} : vector<4x128xf32> to vector<4x32xf32>
    %cst_437 = arith.constant 5.000000e-01 : f32
    %1185 = vector.broadcast %cst_437 : f32 to vector<4x32xf32>
    %1186 = arith.mulf %1185, %1184 : vector<4x32xf32>
    %1187 = math.tanh %1186 : vector<4x32xf32>
    %cst_438 = arith.constant 5.000000e-01 : f32
    %1188 = vector.broadcast %cst_438 : f32 to vector<4x32xf32>
    %1189 = arith.mulf %1188, %1187 : vector<4x32xf32>
    %cst_439 = arith.constant 5.000000e-01 : f32
    %1190 = vector.broadcast %cst_439 : f32 to vector<4x32xf32>
    %1191 = arith.addf %1189, %1190 : vector<4x32xf32>
    %1192 = vector.extract_strided_slice %1175 {offsets = [0, 64], sizes = [4, 32], strides = [1, 1]} : vector<4x128xf32> to vector<4x32xf32>
    %1193 = math.tanh %1192 : vector<4x32xf32>
    %1194 = vector.extract_strided_slice %1175 {offsets = [0, 96], sizes = [4, 32], strides = [1, 1]} : vector<4x128xf32> to vector<4x32xf32>
    %cst_440 = arith.constant 5.000000e-01 : f32
    %1195 = vector.broadcast %cst_440 : f32 to vector<4x32xf32>
    %1196 = arith.mulf %1195, %1194 : vector<4x32xf32>
    %1197 = math.tanh %1196 : vector<4x32xf32>
    %cst_441 = arith.constant 5.000000e-01 : f32
    %1198 = vector.broadcast %cst_441 : f32 to vector<4x32xf32>
    %1199 = arith.mulf %1198, %1197 : vector<4x32xf32>
    %cst_442 = arith.constant 5.000000e-01 : f32
    %1200 = vector.broadcast %cst_442 : f32 to vector<4x32xf32>
    %1201 = arith.addf %1199, %1200 : vector<4x32xf32>
    %1202 = arith.mulf %1191, %1116 : vector<4x32xf32>
    %1203 = arith.mulf %1183, %1193 : vector<4x32xf32>
    %1204 = arith.addf %1202, %1203 : vector<4x32xf32>
    %1205 = math.tanh %1204 : vector<4x32xf32>
    %1206 = arith.mulf %1201, %1205 : vector<4x32xf32>
    %cst_443 = arith.constant dense<0.000000e+00> : vector<4x32xf32>
    %1207 = tpu.matmul %1206, %597, %cst_443 {dimension_numbers = #tpu.dot_dimension_numbers<[1], [0], [0], [1], [0, 0, 1, 1], [], []>} : vector<4x32xf32>, vector<32x32xf32>, vector<4x32xf32> -> vector<4x32xf32>
    %1208 = arith.addf %1207, %601 : vector<4x32xf32>
    %c0_444 = arith.constant 0 : index
    %c7 = arith.constant 7 : index
    %c0_445 = arith.constant 0 : index
    %c0_446 = arith.constant 0 : index
    %1209 = vector.load %arg18[%c0_444, %c7, %c0_445, %c0_446] : memref<1x8x4x32xf32, #tpu.memory_space<vmem>>, vector<1x1x4x32xf32>
    %1210 = vector.shape_cast %1209 : vector<1x1x4x32xf32> to vector<4x32xf32>
    %1211 = vector.shape_cast %1208 : vector<4x32xf32> to vector<1x1x4x32xf32>
    tpu.vector_store %arg18[%c0_444, %c7, %c0_445, %c0_446], %1211 {strides = array<i32>} : memref<1x8x4x32xf32, #tpu.memory_space<vmem>>, vector<1x1x4x32xf32>,
    return
  }
  func.func @transform_0(%arg0: i32) -> (i32, i32) {
    %c0_i32 = arith.constant 0 : i32
    %c0_i32_0 = arith.constant 0 : i32
    %c0_i32_1 = arith.constant 0 : i32
    return %c0_i32, %c0_i32_0 : i32, i32
  }
  func.func @transform_1(%arg0: i32) -> (i32, i32, i32) {
    %c0_i32 = arith.constant 0 : i32
    %c0_i32_0 = arith.constant 0 : i32
    %c0_i32_1 = arith.constant 0 : i32
    return %arg0, %c0_i32, %c0_i32_0 : i32, i32, i32
  }
  func.func @transform_2(%arg0: i32) -> (i32, i32, i32) {
    %c0_i32 = arith.constant 0 : i32
    %c0_i32_0 = arith.constant 0 : i32
    %c0_i32_1 = arith.constant 0 : i32
    return %arg0, %c0_i32, %c0_i32_0 : i32, i32, i32
  }
  func.func @transform_3(%arg0: i32) -> (i32, i32, i32) {
    %c0_i32 = arith.constant 0 : i32
    %c0_i32_0 = arith.constant 0 : i32
    %c0_i32_1 = arith.constant 0 : i32
    return %arg0, %c0_i32, %c0_i32_0 : i32, i32, i32
  }
  func.func @transform_4(%arg0: i32) -> (i32, i32, i32) {
    %c0_i32 = arith.constant 0 : i32
    %c0_i32_0 = arith.constant 0 : i32
    %c0_i32_1 = arith.constant 0 : i32
    return %arg0, %c0_i32, %c0_i32_0 : i32, i32, i32
  }
  func.func @transform_5(%arg0: i32) -> (i32, i32, i32) {
    %c0_i32 = arith.constant 0 : i32
    %c0_i32_0 = arith.constant 0 : i32
    %c0_i32_1 = arith.constant 0 : i32
    return %arg0, %c0_i32, %c0_i32_0 : i32, i32, i32
  }
  func.func @transform_6(%arg0: i32) -> (i32, i32, i32) {
    %c0_i32 = arith.constant 0 : i32
    %c0_i32_0 = arith.constant 0 : i32
    %c0_i32_1 = arith.constant 0 : i32
    return %arg0, %c0_i32, %c0_i32_0 : i32, i32, i32
  }
  func.func @transform_7(%arg0: i32) -> (i32, i32, i32) {
    %c0_i32 = arith.constant 0 : i32
    %c0_i32_0 = arith.constant 0 : i32
    %c0_i32_1 = arith.constant 0 : i32
    return %arg0, %c0_i32, %c0_i32_0 : i32, i32, i32
  }
  func.func @transform_8(%arg0: i32) -> (i32, i32, i32) {
    %c0_i32 = arith.constant 0 : i32
    %c0_i32_0 = arith.constant 0 : i32
    %c0_i32_1 = arith.constant 0 : i32
    return %arg0, %c0_i32, %c0_i32_0 : i32, i32, i32
  }
  func.func @transform_9(%arg0: i32) -> (i32, i32, i32) {
    %c0_i32 = arith.constant 0 : i32
    %c0_i32_0 = arith.constant 0 : i32
    %c0_i32_1 = arith.constant 0 : i32
    return %arg0, %c0_i32, %c0_i32_0 : i32, i32, i32
  }
  func.func @transform_10(%arg0: i32) -> (i32, i32, i32) {
    %c0_i32 = arith.constant 0 : i32
    %c0_i32_0 = arith.constant 0 : i32
    %c0_i32_1 = arith.constant 0 : i32
    return %arg0, %c0_i32, %c0_i32_0 : i32, i32, i32
  }
  func.func @transform_11(%arg0: i32) -> (i32, i32, i32) {
    %c0_i32 = arith.constant 0 : i32
    %c0_i32_0 = arith.constant 0 : i32
    %c0_i32_1 = arith.constant 0 : i32
    return %arg0, %c0_i32, %c0_i32_0 : i32, i32, i32
  }
  func.func @transform_12(%arg0: i32) -> (i32, i32, i32) {
    %c0_i32 = arith.constant 0 : i32
    %c0_i32_0 = arith.constant 0 : i32
    %c0_i32_1 = arith.constant 0 : i32
    return %arg0, %c0_i32, %c0_i32_0 : i32, i32, i32
  }
  func.func @transform_13(%arg0: i32) -> (i32, i32, i32) {
    %c0_i32 = arith.constant 0 : i32
    %c0_i32_0 = arith.constant 0 : i32
    %c0_i32_1 = arith.constant 0 : i32
    return %arg0, %c0_i32, %c0_i32_0 : i32, i32, i32
  }
  func.func @transform_14(%arg0: i32) -> (i32, i32, i32) {
    %c0_i32 = arith.constant 0 : i32
    %c0_i32_0 = arith.constant 0 : i32
    %c0_i32_1 = arith.constant 0 : i32
    return %arg0, %c0_i32, %c0_i32_0 : i32, i32, i32
  }
  func.func @transform_15(%arg0: i32) -> (i32, i32, i32) {
    %c0_i32 = arith.constant 0 : i32
    %c0_i32_0 = arith.constant 0 : i32
    %c0_i32_1 = arith.constant 0 : i32
    return %arg0, %c0_i32, %c0_i32_0 : i32, i32, i32
  }
  func.func @transform_16(%arg0: i32) -> (i32, i32, i32) {
    %c0_i32 = arith.constant 0 : i32
    %c0_i32_0 = arith.constant 0 : i32
    %c0_i32_1 = arith.constant 0 : i32
    return %arg0, %c0_i32, %c0_i32_0 : i32, i32, i32
  }
  func.func @transform_17(%arg0: i32) -> (i32, i32, i32, i32) {
    %c0_i32 = arith.constant 0 : i32
    %c0_i32_0 = arith.constant 0 : i32
    %c0_i32_1 = arith.constant 0 : i32
    %c0_i32_2 = arith.constant 0 : i32
    return %arg0, %c0_i32, %c0_i32_0, %c0_i32_1 : i32, i32, i32, i32
  }
}

</mosaic_0001>

<bundles_post_ra>
// kernel: eq.1
= control target key start
LH: loop header
LB: loop body
LE: loop exit
PB: predicated region body
PF: predicated region fallthrough
CT: control target
= control target key end

     0   :  { %s67_s10 = smov 28   ;;  %s68_s11 = smov 20   ;;  %vm3_vm0 = vcmask 31744   ;;  %vm9_vm1 = vcmask 261344   ;;  %vm15_vm2 = vcmask 228544   ;;  %vm21_vm3 = vcmask 195744   ;;  %s111_s0 = inlined_call_operand.vmem [shape: s32[8,4], index: 0, kind: input, shape index: {}]   ;;  %s112_s1 = inlined_call_operand.vmem [shape: s32[32], index: 1, kind: output, shape index: {}]  }
   0x1   :  { %v53_v0 = vld [vmem:[%s111_s0 + $0x7] sm:$0x1]   ;;  %v55_v1 = vld [vmem:[%s111_s0 + $0x5] sm:$0x1]   ;;  %v54_v2 = vld [vmem:[%s111_s0 + $0x6] sm:$0x1]  }
   0x2   :  { %7 = vrot.lane.b32.xlu0 %v53_v0, %s67_s10  ;;  %19 = vrot.lane.b32.xlu1 %v55_v1, %s68_s11  ;;  %v56_v3 = vld [vmem:[%s111_s0 + $0x4] sm:$0x1]   ;;  %v2_v4 = vld [vmem:[%s111_s0] sm:$0x1]   ;;  %s69_s18 = smov 24   ;;  %s70_s19 = smov 16  }
   0x3   :  { %4 = vst.msk [vmem:[#allocation0] sm:$0x1] %vm3_vm0, %v2_v4   ;;  %v57_v5 = vld [vmem:[%s111_s0 + $0x3] sm:$0x1]   ;;  %v58_v6 = vld [vmem:[%s111_s0 + $0x2] sm:$0x1]  }
   0x4   :  { %s71_s24 = smov 12   ;;  %s72_s25 = smov 8   ;;  %v59_v7 = vld [vmem:[%s111_s0 + $0x1] sm:$0x1]   ;;  %vm27_vm4 = vcmask 162944   ;;  %vm33_vm5 = vcmask 130144  }
   0x5   :  { %s73_s0 = smov 4   ;;  %vm39_vm6 = vcmask 97344   ;;  %vm45_vm7 = vcmask 64544  }
   0x6   :  { %13 = vrot.lane.b32.xlu0 %v54_v2, %s69_s18  ;;  %25 = vrot.lane.b32.xlu1 %v56_v3, %s70_s19 }
   0xa   :  { %31 = vrot.lane.b32.xlu0 %v57_v5, %s71_s24  ;;  %37 = vrot.lane.b32.xlu1 %v58_v6, %s72_s25 }
   0xe   :  { %43 = vrot.lane.b32.xlu0 %v59_v7, %s73_s0 }
  0x74   :  { %v8_v8 = vpop.permute.xlu0 %7   ;;  %v20_v9 = vpop.permute.xlu1 %19  }
  0x75   :  { %10 = vst.msk [vmem:[#allocation0] sm:$0x1] %vm9_vm1, %v8_v8  }
  0x78   :  { %v14_v10 = vpop.permute.xlu0 %13   ;;  %v26_v11 = vpop.permute.xlu1 %25  }
  0x79   :  { %16 = vst.msk [vmem:[#allocation0] sm:$0x1] %vm15_vm2, %v14_v10  }
  0x7a   :  { %22 = vst.msk [vmem:[#allocation0] sm:$0x1] %vm21_vm3, %v20_v9  }
  0x7b   :  { %28 = vst.msk [vmem:[#allocation0] sm:$0x1] %vm27_vm4, %v26_v11  }
  0x7c   :  { %v32_v12 = vpop.permute.xlu0 %31   ;;  %v38_v13 = vpop.permute.xlu1 %37  }
  0x7d   :  { %34 = vst.msk [vmem:[#allocation0] sm:$0x1] %vm33_vm5, %v32_v12  }
  0x7e   :  { %40 = vst.msk [vmem:[#allocation0] sm:$0x1] %vm39_vm6, %v38_v13  }
  0x80   :  { %v44_v14 = vpop.permute.xlu0 %43  }
  0x81   :  { %46 = vst.msk [vmem:[#allocation0] sm:$0x1] %vm45_vm7, %v44_v14  }
  0x88   :  { %v50_v15 = vld [vmem:[#allocation0] sm:$0x1] }
  0x89   :  { %52 = vst [vmem:[%s112_s1] sm:$0x1] %v50_v15 }

// kernel: unsupervised_lstm_forward.1
= control target key start
LH: loop header
LB: loop body
LE: loop exit
PB: predicated region body
PF: predicated region fallthrough
CT: control target
= control target key end

     0   :  { %s10556_s0 = inlined_call_operand.vmem [shape: f32[32,32], index: 0, kind: input, shape index: {}]   ;;  %s10557_s1 = inlined_call_operand.vmem [shape: f32[6,32,16], index: 1, kind: input, shape index: {}]   ;;  %s10558_s2 = inlined_call_operand.hbm [shape: f32[6,16,128], index: 2, kind: input, shape index: {}]   ;;  %s10559_s3 = inlined_call_operand.vmem [shape: f32[6,32,128], index: 3, kind: input, shape index: {}]   ;;  %s10560_s4 = inlined_call_operand.vmem [shape: f32[6,1,128], index: 4, kind: input, shape index: {}]   ;;  %s10561_s5 = inlined_call_operand.vmem [shape: f32[6,32,128], index: 5, kind: input, shape index: {}]   ;;  %s10562_s6 = inlined_call_operand.vmem [shape: f32[6,32,128], index: 6, kind: input, shape index: {}]   ;;  %s10563_s7 = inlined_call_operand.vmem [shape: f32[6,1,128], index: 7, kind: input, shape index: {}]   ;;  %s10564_s8 = inlined_call_operand.vmem [shape: f32[6,32,16], index: 8, kind: input, shape index: {}]   ;;  %s10565_s9 = inlined_call_operand.hbm [shape: f32[6,16,128], index: 9, kind: input, shape index: {}]   ;;  %s10566_s10 = inlined_call_operand.hbm [shape: f32[6,32,128], index: 10, kind: input, shape index: {}]   ;;  %s10567_s11 = inlined_call_operand.vmem [shape: f32[6,1,128], index: 11, kind: input, shape index: {}]   ;;  %s10568_s12 = inlined_call_operand.hbm [shape: f32[6,32,128], index: 12, kind: input, shape index: {}]   ;;  %s10569_s13 = inlined_call_operand.hbm [shape: f32[6,32,128], index: 13, kind: input, shape index: {}]   ;;  %s10570_s14 = inlined_call_operand.vmem [shape: f32[6,1,128], index: 14, kind: input, shape index: {}]   ;;  %s10571_s15 = inlined_call_operand.hbm [shape: f32[6,32,32], index: 15, kind: input, shape index: {}]   ;;  %s10572_s16 = inlined_call_operand.vmem [shape: f32[6,1,32], index: 16, kind: input, shape index: {}]   ;;  %s10573_s17 = inlined_call_operand.vmem [shape: f32[6,8,4,32], index: 17, kind: output, shape index: {}]  }
   0x1   :  { %10586 = sst [smem:[#allocation20_spill]] %s10556_s0 }
   0x2   :  { %10587 = sst [smem:[#allocation21_spill]] %s10557_s1 }
   0x3   :  { %10588 = sst [smem:[#allocation22_spill]] %s10561_s5 }
   0x4   :  { %10589 = sst [smem:[#allocation23_spill]] %s10562_s6 }
   0x5   :  { %10590 = sst [smem:[#allocation24_spill]] %s10563_s7 }
   0x6   :  { %10591 = sst [smem:[#allocation25_spill]] %s10564_s8 }
   0x7   :  { %10592 = sst [smem:[#allocation26_spill]] %s10565_s9 }
   0x8   :  { %10593 = sst [smem:[#allocation27_spill]] %s10567_s11 }
   0x9   :  { %10594 = sst [smem:[#allocation28_spill]] %s10568_s12 }
   0xa   :  { %10595 = sst [smem:[#allocation29_spill]] %s10570_s14 }
   0xb   :  { %10596 = sst [smem:[#allocation30_spill]] %s10572_s16 }
   0xc   :  { %10597 = sst [smem:[#allocation31_spill]] %s10573_s17 }
   0xd   :  { %22 = vsyncpa [#allocation4], 0 }
   0xe   :  { %24 = vsyncpa [#allocation4 + $0x1], 0 }
   0xf   :  { %25 = vsyncpa [#allocation6], 0 }
  0x10   :  { %27 = vsyncpa [#allocation6 + $0x1], 0 }
  0x11   :  { %28 = vsyncpa [#allocation9], 0 }
  0x12   :  { %30 = vsyncpa [#allocation9 + $0x1], 0 }
  0x13   :  { %31 = vsyncpa [#allocation12], 0 }
  0x14   :  { %33 = vsyncpa [#allocation12 + $0x1], 0  ;;  %s9331_s24 = smov 0   ;;  %s9333_s25 = smov 0  }
  0x15   :  { %s9335_s26 = smov 0   ;;  %s9337_s27 = smov 0  }
  0x16 LB: > { %10598 = sst [smem:[#allocation17_spill]] %s9222_s26  ;;  %s9350_s28 = sadd.s32 4294967295, %s9226_s27   ;;  %s9226_s27 = sphi %s9337_s27, %s10626_s27   ;;  %s9222_s26 = sphi %s9335_s26, %s10628_s26   ;;  %s9218_s25 = sphi %s9333_s25, %s10630_s25   ;;  %s9214_s24 = sphi %s9331_s24, %s10629_s24  }
  0x17   : > { %s9353_s29 = sadd.s32 1, %s9226_s27   ;;  %s93_s30 = sadd.s32 1, %s9222_s26 }
  0x18   : > { %10599 = sst [smem:[#allocation18_spill]] %s9353_s29  ;;  %s90_s0 = ssub.s32 %s9226_s27, %s9353_s29 }
  0x19   : > { %p91_p0 = scmp.eq.s32.totalorder %s90_s0, 0  ;;  %p100_p1 = scmp.ne.s32.totalorder %s9222_s26, %s9218_s25 }
  0x1a   : > { %p101_p2 = scmp.eq.s32.totalorder %s9226_s27, 0  ;;  %p106_p3 = scmp.ne.s32.totalorder %s9218_s25, %s9214_s24 }
  0x1b   : > { %s9363_s18 = scalar_select %p91_p0, %s9222_s26, %s93_s30  }
  0x1c   : > { %p102_p4 = por %p101_p2, %p100_p1  ;;  %p107_p5 = scmp.eq.s32.totalorder %s9350_s28, 0 }
  0x1d   : > { %10600 = sst [smem:[#allocation19_spill]] %s9363_s18  ;;  %p8777_p6 = scmp.lt.s32.totalorder %s9226_s27, 6 }
  0x1e   : > { %p9367_p7 = por %p107_p5, %p106_p3  ;;  %s9372_s1 = sand.u32 1, %s9222_s26  }
  0x1f   : > { %s10578_s20 = sshll.u32 %s9372_s1, 4  ;;  %s10579_s21 = sshll.u32 %s9226_s27, 8 }
  0x20   : > { %s10601_s19 = scalar_select %p9367_p7, 1, 0 }
  0x21   : > { %p9376_p8 = pnand %p8777_p6, %p102_p4  ;;  %s10580_s23 = sand.u32 1, %s9226_s27  }
  0x22   : > { %s10603_s9 = sld [smem:[#allocation26_spill]]  ;;  %s600_s18 = scalar_lea.vmem [#allocation5], %s10578_s20 }
  0x23   : > { %s607_s26 = sshll.u32 %s600_s18, 4  ;;  %s9396_s29 = scalar_lea.sflag [#allocation6], %s10580_s23  ;;  %s9391_s26 = int_to_ptr.vmem [resolvable:$true] %s607_s26 }
  0x24   : > { %p9402_p12 = pneg %p9376_p8 }
  0x28   : > { %s9386_s30 = scalar_lea.hbm %s10603_s9, %s10579_s21  ;;  %s9005_s20 = scalar_lea.hbm %s10603_s9, 1536 }
  0x29   : > { %s9000_s16 = scalar_lea.hbm %s9386_s30, 256  ;;  %p9006_p1 = scmp.lt.u32.totalorder %s9386_s30, %s10603_s9 }
  0x2a   : > { %p9001_p11 = scmp.ne.s32.totalorder %s9386_s30, %s9000_s16  ;;  %p9007_p2 = scmp.lt.u32.totalorder %s9005_s20, %s9000_s16 }
  0x2b   : > { %p9009_p4 = scmp.lt.u32.totalorder %s9000_s16, %s9386_s30 }
  0x2c   : > { %p9003_p13 = pnand %p9402_p12, %p9001_p11  ;;  %p9008_p3 = por %p9007_p2, %p9006_p1 }
  0x2e   : > { %p9004_p0 = pneg %p9003_p13  ;;  %p9010_p5 = por %p9009_p4, %p9008_p3 }
  0x30   : > { %p9011_p6 = pnand %p9010_p5, %p9004_p0 }
  0x32   : > { %9014 = shalt.err (!%p9011_p6)
}
  0x33   : > { %s9015_s23 = scalar_lea.vmem %s9391_s26, 256  ;;  %s9228_s0 = smov [#allocation5]  }
  0x34   : > { %p9016_p11 = scmp.ne.s32.totalorder %s9391_s26, %s9015_s23  ;;  %s9020_s18 = sshll.u32 %s9228_s0, 4  ;;  %s9021_s18 = int_to_ptr.vmem [resolvable:$false] %s9020_s18 }
  0x35   : > { %s9022_s17 = scalar_lea.vmem %s9021_s18, 512  ;;  %p9023_p10 = scmp.lt.s32.totalorder %s9391_s26, %s9021_s18 }
  0x36   : > { %p9018_p13 = pnand %p9016_p11, %p9402_p12  ;;  %p9024_p7 = scmp.lt.s32.totalorder %s9022_s17, %s9015_s23 }
  0x38   : > { %p9019_p9 = pneg %p9018_p13  ;;  %p9025_p1 = por %p9024_p7, %p9023_p10 }
  0x3a   : > { %p9026_p2 = pnand %p9025_p1, %p9019_p9 }
  0x3c   : > { %9029 = shalt.err (!%p9026_p2)
}
  0x3d   : > { %s10582_s16 = smov 128   ;;  %s10584_s20 = smov 8  }
  0x3e   : > { %8764 = dma.hbm_to_vmem [thread:$0]  (!%p9376_p8), %s9386_s30, 256, %s9391_s26, %s9396_s29, %s10582_s16, %s10582_s16, %s10584_s20  }
  0x3f   : > { %p10605_p7 = scmp.lt.s32.totalorder %s9226_s27, 7  ;;  %p10606_p9 = scmp.ge.s32.totalorder %s9226_s27, 1 }
  0x40   : > { %s9438_s23 = sshll.u32 %s9372_s1, 5  ;;  %s9441_s0 = sshll.u32 %s9226_s27, 9 }
  0x41   : > { %p9433_p10 = pnand %p10606_p9, %p10605_p7  ;;  %s10608_s12 = sld [smem:[#allocation28_spill]] }
  0x42   : > { %s648_s26 = scalar_lea.vmem [#allocation8], %s9438_s23  ;;  %s10609_s16 = sand.u32 1, %s9226_s27  }
  0x43   : > { %s10607_s21 = scalar_select %p9433_p10, 1, 0 }
  0x44   : > { %s655_s30 = sshll.u32 %s648_s26, 4  ;;  %s9454_s20 = scalar_lea.sflag [#allocation9], %s10609_s16  ;;  %s9450_s30 = int_to_ptr.vmem [resolvable:$true] %s655_s30 }
  0x47   : > { %s9447_s9 = scalar_lea.hbm %s10608_s12, %s9441_s0  ;;  %s9035_s17 = scalar_lea.hbm %s10608_s12, 3072 }
  0x48   : > { %s9030_s14 = scalar_lea.hbm %s9447_s9, 512  ;;  %p9036_p5 = scmp.lt.u32.totalorder %s9447_s9, %s10608_s12 }
  0x49   : > { %p9031_p0 = scmp.ne.s32.totalorder %s9447_s9, %s9030_s14  ;;  %p9037_p6 = scmp.lt.u32.totalorder %s9035_s17, %s9030_s14 }
  0x4a   : > { %p9039_p13 = scmp.lt.u32.totalorder %s9030_s14, %s9447_s9 }
  0x4b   : > { %p9033_p3 = pnand %p9031_p0, %p9402_p12  ;;  %p9038_p11 = por %p9037_p6, %p9036_p5 }
  0x4d   : > { %p9034_p4 = pneg %p9033_p3  ;;  %p9040_p1 = por %p9039_p13, %p9038_p11 }
  0x4f   : > { %p9041_p2 = pnand %p9040_p1, %p9034_p4 }
  0x51   : > { %9044 = shalt.err (!%p9041_p2)
}
  0x52   : > { %s9045_s16 = scalar_lea.vmem %s9450_s30, 512  ;;  %s9231_s11 = smov [#allocation8]  }
  0x53   : > { %p9046_p7 = scmp.ne.s32.totalorder %s9450_s30, %s9045_s16  ;;  %s9050_s26 = sshll.u32 %s9231_s11, 4  ;;  %s9051_s26 = int_to_ptr.vmem [resolvable:$false] %s9050_s26 }
  0x54   : > { %s9052_s7 = scalar_lea.vmem %s9051_s26, 1024  ;;  %p9053_p3 = scmp.lt.s32.totalorder %s9450_s30, %s9051_s26 }
  0x55   : > { %p9048_p9 = pnand %p9046_p7, %p9402_p12  ;;  %p9054_p10 = scmp.lt.s32.totalorder %s9052_s7, %s9045_s16 }
  0x57   : > { %p9049_p0 = pneg %p9048_p9  ;;  %p9055_p5 = por %p9054_p10, %p9053_p3 }
  0x59   : > { %p9056_p6 = pnand %p9055_p5, %p9049_p0 }
  0x5b   : > { %9059 = shalt.err (!%p9056_p6)
}
  0x5c   : > { %s10610_s8 = smov 8   ;;  %s10611_s14 = smov 128  }
  0x5d   : > { %8770 = dma.hbm_to_vmem [thread:$0]  (!%p9376_p8), %s9447_s9, 512, %s9450_s30, %s9454_s20, %s10611_s14, %s10611_s14, %s10610_s8  }
  0x5e   : > { %s10612_s18 = sshll.u32 %s9226_s27, 8  ;;  %s10613_s26 = sshll.u32 %s9372_s1, 4 }
  0x5f   : > { %s9486_s16 = scalar_lea.hbm %s10558_s2, %s10612_s18  ;;  %s535_s7 = scalar_lea.vmem [#allocation3], %s10613_s26 }
  0x60   : > { %s542_s12 = sshll.u32 %s535_s7, 4  ;;  %s532_s5 = scalar_lea.sflag [#allocation4], %s9372_s1  ;;  %s9490_s12 = int_to_ptr.vmem [resolvable:$true] %s542_s12 }
  0x61   : > { %s9060_s6 = scalar_lea.hbm %s9486_s16, 256  ;;  %s9065_s30 = scalar_lea.hbm %s10558_s2, 1536 }
  0x62   : > { %p9061_p10 = scmp.ne.s32.totalorder %s9486_s16, %s9060_s6  ;;  %p9066_p13 = scmp.lt.u32.totalorder %s9486_s16, %s10558_s2 }
  0x63   : > { %p9067_p1 = scmp.lt.u32.totalorder %s9065_s30, %s9060_s6  ;;  %p9069_p7 = scmp.lt.u32.totalorder %s9060_s6, %s9486_s16 }
  0x64   : > { %p9063_p4 = pnand %p9061_p10, %p9402_p12 }
  0x65   : > { %p9068_p2 = por %p9067_p1, %p9066_p13 }
  0x66   : > { %p9064_p11 = pneg %p9063_p4 }
  0x67   : > { %p9070_p9 = por %p9069_p7, %p9068_p2 }
  0x69   : > { %p9071_p0 = pnand %p9070_p9, %p9064_p11 }
  0x6b   : > { %9074 = shalt.err (!%p9071_p0)
}
  0x6c   : > { %s9075_s11 = scalar_lea.vmem %s9490_s12, 256  ;;  %s9232_s26 = smov [#allocation3]  }
  0x6d   : > { %p9076_p3 = scmp.ne.s32.totalorder %s9490_s12, %s9075_s11  ;;  %s9080_s7 = sshll.u32 %s9232_s26, 4  ;;  %s9081_s7 = int_to_ptr.vmem [resolvable:$false] %s9080_s7 }
  0x6e   : > { %s9082_s9 = scalar_lea.vmem %s9081_s7, 512  ;;  %p9083_p10 = scmp.lt.s32.totalorder %s9490_s12, %s9081_s7 }
  0x6f   : > { %p9078_p5 = pnand %p9076_p3, %p9402_p12  ;;  %p9084_p4 = scmp.lt.s32.totalorder %s9082_s9, %s9075_s11 }
  0x71   : > { %p9079_p6 = pneg %p9078_p5  ;;  %p9085_p13 = por %p9084_p4, %p9083_p10 }
  0x73   : > { %p9086_p1 = pnand %p9085_p13, %p9079_p6 }
  0x75   : > { %9089 = shalt.err (!%p9086_p1)
}
  0x76   : > { %8761 = dma.hbm_to_vmem [thread:$0]  (!%p9376_p8), %s9486_s16, 256, %s9490_s12, %s532_s5, %s10611_s14, %s10611_s14, %s10610_s8  }
  0x77   : > { %s9523_s30 = scalar_lea.hbm %s10566_s10, %s9441_s0  ;;  %s621_s18 = scalar_lea.vmem [#allocation7], %s9438_s23 }
  0x78   : > { %s628_s17 = sshll.u32 %s621_s18, 4  ;;  %s9090_s11 = scalar_lea.hbm %s9523_s30, 512  ;;  %s9526_s17 = int_to_ptr.vmem [resolvable:$true] %s628_s17 }
  0x79   : > { %p9091_p11 = scmp.ne.s32.totalorder %s9523_s30, %s9090_s11  ;;  %s9095_s12 = scalar_lea.hbm %s10566_s10, 3072 }
  0x7a   : > { %p9096_p9 = scmp.lt.u32.totalorder %s9523_s30, %s10566_s10  ;;  %p9097_p0 = scmp.lt.u32.totalorder %s9095_s12, %s9090_s11 }
  0x7b   : > { %p9093_p2 = pnand %p9091_p11, %p9402_p12  ;;  %p9099_p5 = scmp.lt.u32.totalorder %s9090_s11, %s9523_s30 }
  0x7c   : > { %p9098_p3 = por %p9097_p0, %p9096_p9 }
  0x7d   : > { %p9094_p7 = pneg %p9093_p2 }
  0x7e   : > { %p9100_p6 = por %p9099_p5, %p9098_p3 }
  0x80   : > { %p9101_p10 = pnand %p9100_p6, %p9094_p7 }
  0x82   : > { %9104 = shalt.err (!%p9101_p10)
}
  0x83   : > { %s9105_s9 = scalar_lea.vmem %s9526_s17, 512  ;;  %s9233_s6 = smov [#allocation7]  }
  0x84   : > { %p9106_p4 = scmp.ne.s32.totalorder %s9526_s17, %s9105_s9  ;;  %s9110_s27 = sshll.u32 %s9233_s6, 4  ;;  %s9111_s27 = int_to_ptr.vmem [resolvable:$false] %s9110_s27 }
  0x85   : > { %s9112_s18 = scalar_lea.vmem %s9111_s27, 1024  ;;  %p9113_p11 = scmp.lt.s32.totalorder %s9526_s17, %s9111_s27 }
  0x86   : > { %p9108_p13 = pnand %p9106_p4, %p9402_p12  ;;  %p9114_p2 = scmp.lt.s32.totalorder %s9112_s18, %s9105_s9 }
  0x88   : > { %p9109_p1 = pneg %p9108_p13  ;;  %p9115_p9 = por %p9114_p2, %p9113_p11 }
  0x8a   : > { %p9116_p0 = pnand %p9115_p9, %p9109_p1 }
  0x8c   : > { %9119 = shalt.err (!%p9116_p0)
}
  0x8d   : > { %8767 = dma.hbm_to_vmem [thread:$0]  (!%p9376_p8), %s9523_s30, 512, %s9526_s17, %s9396_s29, %s10611_s14, %s10611_s14, %s10610_s8  }
  0x8e   : > { %s9557_s5 = scalar_lea.hbm %s10569_s13, %s9441_s0  ;;  %s669_s12 = scalar_lea.vmem [#allocation10], %s9438_s23 }
  0x8f   : > { %s676_s16 = sshll.u32 %s669_s12, 4  ;;  %s9120_s7 = scalar_lea.hbm %s9557_s5, 512  ;;  %s9560_s16 = int_to_ptr.vmem [resolvable:$true] %s676_s16 }
  0x90   : > { %p9121_p7 = scmp.ne.s32.totalorder %s9557_s5, %s9120_s7  ;;  %s9125_s30 = scalar_lea.hbm %s10569_s13, 3072 }
  0x91   : > { %p9126_p6 = scmp.lt.u32.totalorder %s9557_s5, %s10569_s13  ;;  %p9127_p10 = scmp.lt.u32.totalorder %s9125_s30, %s9120_s7 }
  0x92   : > { %p9123_p3 = pnand %p9121_p7, %p9402_p12  ;;  %p9129_p13 = scmp.lt.u32.totalorder %s9120_s7, %s9557_s5 }
  0x93   : > { %p9128_p4 = por %p9127_p10, %p9126_p6 }
  0x94   : > { %p9124_p5 = pneg %p9123_p3 }
  0x95   : > { %p9130_p1 = por %p9129_p13, %p9128_p4 }
  0x97   : > { %p9131_p11 = pnand %p9130_p1, %p9124_p5 }
  0x99   : > { %9134 = shalt.err (!%p9131_p11)
}
  0x9a   : > { %s9135_s27 = scalar_lea.vmem %s9560_s16, 512  ;;  %s9234_s18 = smov [#allocation10]  }
  0x9b   : > { %p9136_p2 = scmp.ne.s32.totalorder %s9560_s16, %s9135_s27  ;;  %s9140_s11 = sshll.u32 %s9234_s18, 4  ;;  %s9141_s11 = int_to_ptr.vmem [resolvable:$false] %s9140_s11 }
  0x9c   : > { %s9142_s26 = scalar_lea.vmem %s9141_s11, 1024  ;;  %p9143_p7 = scmp.lt.s32.totalorder %s9560_s16, %s9141_s11 }
  0x9d   : > { %p9138_p9 = pnand %p9136_p2, %p9402_p12  ;;  %p9144_p3 = scmp.lt.s32.totalorder %s9142_s26, %s9135_s27 }
  0x9f   : > { %p9139_p0 = pneg %p9138_p9  ;;  %p9145_p6 = por %p9144_p3, %p9143_p7 }
  0xa1   : > { %p9146_p10 = pnand %p9145_p6, %p9139_p0 }
  0xa3   : > { %9149 = shalt.err (!%p9146_p10)
}
  0xa4   : > { %8773 = dma.hbm_to_vmem [thread:$0]  (!%p9376_p8), %s9557_s5, 512, %s9560_s16, %s9454_s20, %s10611_s14, %s10611_s14, %s10610_s8  }
  0xa5   : > { %s9591_s9 = scalar_lea.hbm %s10571_s15, %s9441_s0  ;;  %s696_s29 = scalar_lea.vmem [#allocation11], %s9438_s23 }
  0xa6   : > { %s703_s30 = sshll.u32 %s696_s29, 4  ;;  %s693_s17 = scalar_lea.sflag [#allocation12], %s9372_s1  ;;  %s9594_s30 = int_to_ptr.vmem [resolvable:$true] %s703_s30 }
  0xa7   : > { %s9150_s6 = scalar_lea.hbm %s9591_s9, 512  ;;  %s9155_s16 = scalar_lea.hbm %s10571_s15, 3072 }
  0xa8   : > { %p9151_p5 = scmp.ne.s32.totalorder %s9591_s9, %s9150_s6  ;;  %p9156_p1 = scmp.lt.u32.totalorder %s9591_s9, %s10571_s15 }
  0xa9   : > { %p9157_p11 = scmp.lt.u32.totalorder %s9155_s16, %s9150_s6  ;;  %p9159_p9 = scmp.lt.u32.totalorder %s9150_s6, %s9591_s9 }
  0xaa   : > { %p9153_p4 = pnand %p9151_p5, %p9402_p12 }
  0xab   : > { %p9158_p2 = por %p9157_p11, %p9156_p1 }
  0xac   : > { %p9154_p13 = pneg %p9153_p4 }
  0xad   : > { %p9160_p0 = por %p9159_p9, %p9158_p2 }
  0xaf   : > { %p9161_p7 = pnand %p9160_p0, %p9154_p13 }
  0xb1   : > { %9164 = shalt.err (!%p9161_p7)
}
  0xb2   : > { %s9165_s23 = scalar_lea.vmem %s9594_s30, 512  ;;  %s9235_s18 = smov [#allocation11]  }
  0xb3   : > { %p9166_p3 = scmp.ne.s32.totalorder %s9594_s30, %s9165_s23  ;;  %s9170_s11 = sshll.u32 %s9235_s18, 4  ;;  %s9171_s11 = int_to_ptr.vmem [resolvable:$false] %s9170_s11 }
  0xb4   : > { %s9172_s26 = scalar_lea.vmem %s9171_s11, 1024  ;;  %p9173_p5 = scmp.lt.s32.totalorder %s9594_s30, %s9171_s11 }
  0xb5   : > { %p9168_p6 = pnand %p9166_p3, %p9402_p12  ;;  %p9174_p4 = scmp.lt.s32.totalorder %s9172_s26, %s9165_s23 }
  0xb7   : > { %p9169_p10 = pneg %p9168_p6  ;;  %p9175_p1 = por %p9174_p4, %p9173_p5 }
  0xb9   : > { %p9176_p11 = pnand %p9175_p1, %p9169_p10 }
  0xbb   : > { %9179 = shalt.err (!%p9176_p11)
}
  0xbc   : > { %8776 = dma.hbm_to_vmem [thread:$0]  (!%p9376_p8), %s9591_s9, 512, %s9594_s30, %s693_s17, %s10611_s14, %s10611_s14, %s10610_s8  }
  0xbd   : > { %p10614_p12 = scmp.ne.s32.totalorder %s10607_s21, 0 }
  0xbe   : > { %s723_s24 = sand.u32 (!%p10614_p12), 1, %s9218_s25   ;;  %p10615_p13 = scmp.ne.s32.totalorder (!%p10614_p12), %s10601_s19, 0 }
  0xbf   : > { %721 = sbr.rel (%p10614_p12) target bundleno = 25837 (0x64ed), region = 88  ;;  %s7185_s12 = sshll.u32 (!%p10614_p12), %s723_s24, 4 }
  0xc0   : > { %s724_s7 = scalar_lea.sflag (!%p10614_p12), [#allocation4], %s723_s24  ;;  %s9626_s29 = scalar_lea.vmem (!%p10614_p12), [#allocation3], %s7185_s12 }
  0xc6   : > { %9197 = dma.done.wait (%p10615_p13), %s724_s7, 256  }
  0xc7   : > { %9199 = vsyncadd (%p10615_p13), %s724_s7, 4294967040  ;;  %s732_s1 = sand.u32 1, %s9350_s28   ;;  %s9633_s8 = scalar_lea.vmem [#allocation5], %s7185_s12 }
  0xc8   : > { %s733_s22 = scalar_lea.sflag [#allocation6], %s732_s1 }
  0xc9   : > { %9201 = dma.done.wait (%p10615_p13), %s733_s22, 768  }
  0xca   : > { %9203 = vsyncadd (%p10615_p13), %s733_s22, 4294966528  ;;  %s7187_s21 = sshll.u32 %s723_s24, 5  ;;  %s751_s9 = scalar_lea.sflag [#allocation9], %s732_s1 }
  0xcb   : > { %s9639_s14 = scalar_lea.vmem [#allocation7], %s7187_s21  ;;  %s9641_s30 = scalar_lea.vmem [#allocation8], %s7187_s21 }
  0xcc   : > { %9205 = dma.done.wait (%p10615_p13), %s751_s9, 1024  }
  0xcd   : > { %9207 = vsyncadd (%p10615_p13), %s751_s9, 4294966272  ;;  %s9647_s17 = scalar_lea.vmem [#allocation10], %s7187_s21  ;;  %s769_s6 = scalar_lea.sflag [#allocation12], %s723_s24 }
  0xce   : > { %s9649_s20 = scalar_lea.vmem [#allocation11], %s7187_s21 }
  0xcf   : > { %9209 = dma.done.wait (%p10615_p13), %s769_s6, 512  }
  0xd0   : > { %9211 = vsyncadd (%p10615_p13), %s769_s6, 4294966784  ;;  %p888_p8 = scmp.lt.s32.totalorder %s9350_s28, 5  ;;  %s10616_s27 = sld [smem:[#allocation21_spill]]  ;;  %vm941_vm0 = vcmask 261120   ;;  %v1039_v7 = vld [vmem:[%s9626_s29] sm:$0xff]  ;;  %v1040_v8 = vld [vmem:[%s9626_s29 + $0x8] sm:$0xff] }
  0xd1   : > { %s10617_s11 = sld [smem:[#allocation20_spill]]  ;;  %v8367_v9 = vpack.c.bf16 %v1040_v8, %v1039_v7  ;;  %v9236_v18 = vmov 0.0|0.0   ;;  %vm9237_vm1 = vmmov 0   ;;  %v9238_v20 = vmov 0.0   ;;  %s10618_s26 = sld [smem:[#allocation23_spill]] }
  0xd2   : > { %s10632_s28 = smov (!%p888_p8, %s9350_s28), 5  ;;  %vm1048_vm2 = vcmask 130048   ;;  %s10619_s1 = sld [smem:[#allocation22_spill]]  ;;  %vm3349_vm3 = vcmask 257024  }
  0xd3   : > { %s9660_s5 = sshll.u32 %s10632_s28, 5  ;;  %8368 = vmatprep.subr.bf16.mxu1 %v8367_v9  ;;  %s900_s0 = scalar_lea.vmem %s10560_s4, %s10632_s28 }
  0xd4   : > { %8370 = vmatpush3.bf16.msra.mxu1 %v8367_v9  ;;  %s897_s9 = scalar_lea.vmem %s10559_s3, %s9660_s5  ;;  %v7207_v25 = vld [vmem:[%s900_s0] ss:$0 sm:$0xff]  ;;  %s10621_s19 = sld [smem:[#allocation25_spill]] }
  0xd5   : > { %v1150_v13 = vld [vmem:[%s897_s9] sm:$0xff]  ;;  %v1151_v14 = vld [vmem:[%s897_s9 + $0x8] sm:$0xff]  ;;  %v1152_v16 = vld [vmem:[%s897_s9 + $0x10] sm:$0xff]  ;;  %8371 = vmatprep.subr.bf16.mxu1 %v9236_v18  ;;  %s10622_s12 = sld [smem:[#allocation27_spill]]  ;;  %s10625_s16 = sld [smem:[#allocation30_spill]] }
  0xd6   : > { %s892_s23 = scalar_lea.vmem %s10616_s27, %s9660_s5  ;;  %v9688_v15 = vpack.c.bf16 %v1151_v14, %v1150_v13  ;;  %v1153_v17 = vld [vmem:[%s897_s9 + $0x18] sm:$0xff]  ;;  %s9239_s27 = smov 64  }
  0xd7   : > { %v937_v0 = vld [vmem:[%s892_s23] sm:$0xff]  ;;  %v938_v1 = vld [vmem:[%s892_s23 + $0x8] sm:$0xff]  ;;  %v939_v3 = vld [vmem:[%s892_s23 + $0x10] sm:$0xff]  ;;  %v9694_v19 = vpack.c.bf16 %v1153_v17, %v1152_v16  ;;  %s910_s24 = scalar_lea.vmem %s10618_s26, %s9660_s5  ;;  %s10620_s9 = sld [smem:[#allocation24_spill]] }
  0xd8   : > { %v8359_v2 = vpack.c.bf16 %v938_v1, %v937_v0  ;;  %v940_v4 = vld [vmem:[%s892_s23 + $0x18] sm:$0xff]  ;;  %v933_v5 = vld [vmem:[%s10617_s11] sm:$0xff]  ;;  %v934_v10 = vld [vmem:[%s10617_s11 + $0x8] sm:$0xff]  ;;  %s9240_s23 = smov 32   ;;  %s905_s22 = scalar_lea.vmem %s10619_s1, %s9660_s5 }
  0xd9   : > { %v8363_v6 = vpack.c.bf16 %v940_v4, %v939_v3  ;;  %7645 = vmatprep.mubr.msk.f32.mxu0 %vm941_vm0, %v933_v5  ;;  %v935_v11 = vld [vmem:[%s10617_s11 + $0x10] sm:$0xff]  ;;  %v936_v12 = vld [vmem:[%s10617_s11 + $0x18] sm:$0xff]  ;;  %s10623_s1 = sld [smem:[#allocation29_spill]] }
  0xda   : > { %8360 = vmatprep.subr.bf16.mxu0 %v8359_v2  ;;  %s918_s18 = scalar_lea.vmem %s10621_s19, %s9660_s5 }
  0xdb   : > { %8362 = vmatpush3.bf16.msra.mxu0 %v8359_v2  ;;  %s10042_s7 = scalar_lea.vmem %s10622_s12, %s10632_s28  ;;  %s10155_s0 = scalar_lea.vmem %s10625_s16, %s10632_s28 }
  0xdc   : > { %8364 = vmatprep.subr.bf16.mxu0 %v8363_v6 }
  0xdd   : > { %s913_s6 = scalar_lea.vmem %s10620_s9, %s10632_s28  ;;  %s10624_s9 = sld [smem:[#allocation31_spill]] }
  0xdf   : > { %8366 = vmatpush3.bf16.msra.mxu0 %v8363_v6 }
  0xe0   : > { %8377 = vmatprep.subr.bf16.mxu0 %v9236_v18 }
  0xe2   : > { %7646 = vmatmul.mubr.msk.f32.vlgmr.msra.gmra.mrb[0].mxu0 %vm941_vm0, %v934_v10 }
  0xe3   : > { %7648 = vmatprep.mubr.msk.f32.mxu0 %vm941_vm0, %v935_v11  ;;  %8379 = vmatpush3.bf16.msra.mxu0 %v9688_v15 }
  0xe4   : > { %8380 = vmatprep.subr.bf16.mxu0 %v9236_v18 }
  0xe6   : > { %7649 = vmatmul.mubr.msk.f32.gmra.mrb[2].mxu0 %vm941_vm0, %v936_v12 }
  0xe7   : > { %7680 = vmatprep.mubr.msk.f32.mxu0 %vm9237_vm1, %v9238_v20  ;;  %8382 = vmatpush3.bf16.msra.mxu0 %v9694_v19 }
  0xe8   : > { %8389 = vmatprep.subr.bf16.mxu0 %v9236_v18 }
 0x1b5   : > { %v7647_v21 = vpop.f32.mrb[0].mxu0 }
 0x1b6   : > { %v1020_v22 = vpop.f32.mrb[1].mxu0 }
 0x1b7   : > { %7655 = vmatprep.mubr.msk.f32.mxu1 %vm1048_vm2, %v1020_v22 }
 0x1b8   : > { %7656 = vmatmul.mubr.msk.f32.vlgmr.msra.gmra.mrb[0].mxu1 %vm1048_vm2, %v7647_v21 }
 0x1b9   : > { %v7650_v23 = vpop.f32.mrb[2].mxu0  ;;  %8373 = vmatpush3.bf16.msra.mxu1 %v9688_v15 }
 0x1ba   : > { %v1030_v24 = vpop.f32.mrb[3].mxu0  ;;  %8374 = vmatprep.subr.bf16.mxu1 %v9236_v18 }
 0x1bb   : > { %7658 = vmatprep.mubr.msk.f32.mxu1 %vm1048_vm2, %v1030_v24 }
 0x1bc   : > { %7659 = vmatmul.mubr.msk.f32.gmra.mrb[2].mxu1 %vm1048_vm2, %v7650_v23 }
 0x1bd   : > { %8376 = vmatpush3.bf16.msra.mxu1 %v9694_v19  ;;  %7669 = vmatprep.mubr.msk.f32.mxu1 %vm9237_vm1, %v9238_v20 }
 0x1be   : > { %8383 = vmatprep.subr.bf16.mxu1 %v9236_v18 }
 0x1c0   : > { %7670 = vmatmul.mubr.f32.vlgmr.msra.gmra.mrb[4].mxu1 %v9238_v20 }
 0x1c1   : > { %8385 = vmatpush3.bf16.msra.mxu1 %v9688_v15  ;;  %7691 = vmatprep.mubr.msk.f32.mxu1 %vm9237_vm1, %v9238_v20 }
 0x1c2   : > { %8386 = vmatprep.subr.bf16.mxu1 %v9236_v18 }
 0x1c5   : > { %8388 = vmatpush3.bf16.msra.mxu1 %v9694_v19 }
 0x1c6   : > { %8395 = vmatprep.subr.bf16.mxu1 %v9236_v18 }
 0x28b   : > { %v7657_v26 = vpop.f32.mrb[0].mxu1 }
 0x28c   : > { %v1133_v27 = vadd.f32 %v7657_v26, %v7207_v25  ;;  %v1127_v28 = vpop.f32.mrb[1].mxu1 }
 0x28d   : > { %v1128_v29 = vadd.f32 %v7207_v25, %v1127_v28 }
 0x28e   : > { %1147 = vst [vmem:[#allocation2 + $0x8] sm:$0xff] %v1133_v27 }
 0x28f   : > { %1146 = vst [vmem:[#allocation2] sm:$0xff] %v1128_v29  ;;  %v7660_v30 = vpop.f32.mrb[2].mxu1 }
 0x290   : > { %v1143_v31 = vadd.f32 %v7660_v30, %v7207_v25  ;;  %v1137_v32 = vpop.f32.mrb[3].mxu1 }
 0x291   : > { %v1138_v33 = vadd.f32 %v7207_v25, %v1137_v32 }
 0x292   : > { %1149 = vst [vmem:[#allocation2 + $0x18] sm:$0xff] %v1143_v31 }
 0x293   : > { %1148 = vst [vmem:[#allocation2 + $0x10] sm:$0xff] %v1138_v33  ;;  %v1224_v34 = vpop.f32.mrb[4].mxu1 }
 0x294   : > { %v7671_v35 = vpop.f32.mrb[5].mxu1 }
 0x295   : > { %v1350_v6 = vld [vmem:[#allocation2 + $0x8] sm:$0xf]  ;;  %v1449_v28 = vld [vmem:[#allocation2 + $0xc] sm:$0xf] }
 0x296   : > { %v1154_v36 = vld [vmem:[#allocation2] sm:$0xf]  ;;  %v1251_v52 = vld [vmem:[#allocation2 + $0x4] sm:$0xf] }
 0x297   : > { %v1228_v37 = vadd.f32 %v1224_v34, %v1154_v36 }
 0x299   : > { %8817 = vtanh.f32 %v1228_v37  ;;  %v1229_v39 = vmul.f32 0.5, %v1228_v37 }
 0x29b   : > { %8819 = vtanh.f32 %v1229_v39 }
 0x2a3   : > { %v8818_v38 = vpop.eup %8817 }
 0x2a4   : > { %1236 = vrot.lane.b32.xlu0 %v8818_v38, %s9239_s27 }
 0x2a5   : > { %v8820_v40 = vpop.eup %8819 }
 0x2a6   : > { %v1231_v41 = vmul.f32 0.5, %v8820_v40 }
 0x2a8   : > { %v1232_v42 = vadd.f32 0.5, %v1231_v41 }
 0x2aa   : > { %v1234_v45 = vmul.f32 0.0, %v1232_v42 }
 0x316   : > { %v1237_v43 = vpop.permute.xlu0 %1236 }
 0x317   : > { %v1239_v44 = vmul.f32 %v1237_v43, %v1232_v42 }
 0x319   : > { %1241 = vrot.lane.b32.xlu0 %v1239_v44, %s9240_s23 }
 0x38b   : > { %v1242_v46 = vpop.permute.xlu0 %1241 }
 0x38c   : > { %v1244_v47 = vadd.f32 %v1242_v46, %v1234_v45  ;;  %v1548_v46 = vld [vmem:[#allocation2 + $0x10] sm:$0xf] }
 0x38e   : > { %8821 = vtanh.f32 %v1244_v47 }
 0x398   : > { %v8822_v48 = vpop.eup %8821 }
 0x399   : > { %1247 = vrot.lane.b32.xlu1 %v8822_v48, %s9239_s27 }
 0x40b   : > { %v1248_v49 = vpop.permute.xlu1 %1247 }
 0x40c   : > { %v1250_v50 = vmul.f32 %v1248_v49, %v1232_v42 }
 0x40e   : > { %1253 = vrot.lane.b32.xlu1 %v1250_v50, %s9240_s23 }
 0x480   : > { %v9725_v51 = vpop.permute.xlu1 %1253 }
 0x481   : > { %7681 = vmatmul.mubr.msk.f32.vlgmr.msra.gmra.mrb[4].mxu0 %vm941_vm0, %v9725_v51 }
 0x482   : > { %8391 = vmatpush3.bf16.msra.mxu0 %v9688_v15  ;;  %7702 = vmatprep.mubr.msk.f32.mxu0 %vm9237_vm1, %v9238_v20 }
 0x483   : > { %8392 = vmatprep.subr.bf16.mxu0 %v9236_v18 }
 0x486   : > { %8394 = vmatpush3.bf16.msra.mxu0 %v9694_v19 }
 0x487   : > { %8401 = vmatprep.subr.bf16.mxu0 %v9236_v18 }
 0x554   : > { %v1323_v53 = vpop.f32.mrb[4].mxu0 }
 0x555   : > { %v1327_v54 = vadd.f32 %v1323_v53, %v1251_v52  ;;  %v7682_v55 = vpop.f32.mrb[5].mxu0 }
 0x557   : > { %8823 = vtanh.f32 %v1327_v54  ;;  %v1328_v57 = vmul.f32 0.5, %v1327_v54 }
 0x559   : > { %8825 = vtanh.f32 %v1328_v57 }
 0x561   : > { %v8824_v56 = vpop.eup %8823 }
 0x562   : > { %1335 = vrot.lane.b32.xlu0 %v8824_v56, %s9239_s27 }
 0x563   : > { %v8826_v58 = vpop.eup %8825 }
 0x564   : > { %v1330_v59 = vmul.f32 0.5, %v8826_v58 }
 0x566   : > { %v1331_v60 = vadd.f32 0.5, %v1330_v59 }
 0x568   : > { %v1333_v63 = vmul.f32 %v1331_v60, %v1244_v47 }
 0x5d4   : > { %v1336_v61 = vpop.permute.xlu0 %1335 }
 0x5d5   : > { %v1338_v62 = vmul.f32 %v1336_v61, %v1331_v60 }
 0x5d7   : > { %1340 = vrot.lane.b32.xlu1 %v1338_v62, %s9240_s23 }
 0x649   : > { %v1341_v0 = vpop.permute.xlu1 %1340 }
 0x64a   : > { %v1343_v1 = vadd.f32 %v1341_v0, %v1333_v63 }
 0x64c   : > { %8827 = vtanh.f32 %v1343_v1 }
 0x656   : > { %v8828_v2 = vpop.eup %8827 }
 0x657   : > { %1346 = vrot.lane.b32.xlu0 %v8828_v2, %s9239_s27 }
 0x6c9   : > { %v1347_v3 = vpop.permute.xlu0 %1346 }
 0x6ca   : > { %v1349_v4 = vmul.f32 %v1347_v3, %v1331_v60 }
 0x6cc   : > { %1352 = vrot.lane.b32.xlu1 %v1349_v4, %s9240_s23 }
 0x73e   : > { %v9739_v5 = vpop.permute.xlu1 %1352 }
 0x73f   : > { %7692 = vmatmul.mubr.msk.f32.vlgmr.msra.gmra.mrb[6].mxu1 %vm941_vm0, %v9739_v5 }
 0x740   : > { %8397 = vmatpush3.bf16.msra.mxu1 %v9688_v15  ;;  %7713 = vmatprep.mubr.msk.f32.mxu1 %vm9237_vm1, %v9238_v20 }
 0x741   : > { %8398 = vmatprep.subr.bf16.mxu1 %v9236_v18 }
 0x744   : > { %8400 = vmatpush3.bf16.msra.mxu1 %v9694_v19 }
 0x745   : > { %8407 = vmatprep.subr.bf16.mxu1 %v9236_v18 }
 0x812   : > { %v1422_v7 = vpop.f32.mrb[6].mxu1 }
 0x813   : > { %v1426_v8 = vadd.f32 %v1422_v7, %v1350_v6  ;;  %v7693_v9 = vpop.f32.mrb[7].mxu1 }
 0x815   : > { %8829 = vtanh.f32 %v1426_v8  ;;  %v1427_v11 = vmul.f32 0.5, %v1426_v8 }
 0x817   : > { %8831 = vtanh.f32 %v1427_v11 }
 0x81f   : > { %v8830_v10 = vpop.eup %8829 }
 0x820   : > { %1434 = vrot.lane.b32.xlu0 %v8830_v10, %s9239_s27 }
 0x821   : > { %v8832_v12 = vpop.eup %8831 }
 0x822   : > { %v1429_v13 = vmul.f32 0.5, %v8832_v12 }
 0x824   : > { %v1430_v14 = vadd.f32 0.5, %v1429_v13 }
 0x826   : > { %v1432_v21 = vmul.f32 %v1430_v14, %v1343_v1  ;;  %v1647_v1 = vld [vmem:[#allocation2 + $0x14] sm:$0xf] }
 0x892   : > { %v1435_v16 = vpop.permute.xlu0 %1434 }
 0x893   : > { %v1437_v17 = vmul.f32 %v1435_v16, %v1430_v14 }
 0x895   : > { %1439 = vrot.lane.b32.xlu1 %v1437_v17, %s9240_s23 }
 0x907   : > { %v1440_v22 = vpop.permute.xlu1 %1439 }
 0x908   : > { %v1442_v23 = vadd.f32 %v1440_v22, %v1432_v21  ;;  %v1948_v21 = vld [vmem:[%s910_s24] sm:$0xff]  ;;  %v1949_v22 = vld [vmem:[%s910_s24 + $0x8] sm:$0xff] }
 0x90a   : > { %8833 = vtanh.f32 %v1442_v23 }
 0x914   : > { %v8834_v24 = vpop.eup %8833 }
 0x915   : > { %1445 = vrot.lane.b32.xlu0 %v8834_v24, %s9239_s27  ;;  %v1950_v24 = vld [vmem:[%s910_s24 + $0x10] sm:$0xff] }
 0x987   : > { %v1446_v25 = vpop.permute.xlu0 %1445 }
 0x988   : > { %v1448_v26 = vmul.f32 %v1446_v25, %v1430_v14  ;;  %v1951_v25 = vld [vmem:[%s910_s24 + $0x18] sm:$0xff] }
 0x98a   : > { %1451 = vrot.lane.b32.xlu1 %v1448_v26, %s9240_s23 }
 0x9fc   : > { %v9753_v27 = vpop.permute.xlu1 %1451 }
 0x9fd   : > { %7703 = vmatmul.mubr.msk.f32.vlgmr.msra.gmra.mrb[6].mxu0 %vm941_vm0, %v9753_v27 }
 0x9fe   : > { %8403 = vmatpush3.bf16.msra.mxu0 %v9688_v15  ;;  %7724 = vmatprep.mubr.msk.f32.mxu0 %vm9237_vm1, %v9238_v20 }
 0x9ff   : > { %8404 = vmatprep.subr.bf16.mxu0 %v9236_v18 }
 0xa02   : > { %8406 = vmatpush3.bf16.msra.mxu0 %v9694_v19 }
 0xa03   : > { %8413 = vmatprep.subr.bf16.mxu0 %v9236_v18 }
 0xad0   : > { %v1521_v29 = vpop.f32.mrb[6].mxu0 }
 0xad1   : > { %v1525_v30 = vadd.f32 %v1521_v29, %v1449_v28  ;;  %v7704_v31 = vpop.f32.mrb[7].mxu0  ;;  %v9805_v28 = vpack.c.bf16 %v1951_v25, %v1950_v24  ;;  %v1746_v29 = vld [vmem:[#allocation2 + $0x18] sm:$0xf] }
 0xad3   : > { %8835 = vtanh.f32 %v1525_v30  ;;  %v1526_v33 = vmul.f32 0.5, %v1525_v30 }
 0xad5   : > { %8837 = vtanh.f32 %v1526_v33 }
 0xadd   : > { %v8836_v32 = vpop.eup %8835 }
 0xade   : > { %1533 = vrot.lane.b32.xlu0 %v8836_v32, %s9239_s27 }
 0xadf   : > { %v8838_v34 = vpop.eup %8837 }
 0xae0   : > { %v1528_v35 = vmul.f32 0.5, %v8838_v34 }
 0xae2   : > { %v1529_v36 = vadd.f32 0.5, %v1528_v35 }
 0xae4   : > { %v1531_v39 = vmul.f32 %v1529_v36, %v1442_v23  ;;  %v9799_v23 = vpack.c.bf16 %v1949_v22, %v1948_v21 }
 0xb50   : > { %v1534_v37 = vpop.permute.xlu0 %1533 }
 0xb51   : > { %v1536_v38 = vmul.f32 %v1534_v37, %v1529_v36 }
 0xb53   : > { %1538 = vrot.lane.b32.xlu1 %v1536_v38, %s9240_s23 }
 0xbc5   : > { %v1539_v40 = vpop.permute.xlu1 %1538 }
 0xbc6   : > { %v1541_v41 = vadd.f32 %v1539_v40, %v1531_v39 }
 0xbc8   : > { %8839 = vtanh.f32 %v1541_v41 }
 0xbd2   : > { %v8840_v42 = vpop.eup %8839 }
 0xbd3   : > { %1544 = vrot.lane.b32.xlu0 %v8840_v42, %s9239_s27 }
 0xc45   : > { %v1545_v43 = vpop.permute.xlu0 %1544 }
 0xc46   : > { %v1547_v44 = vmul.f32 %v1545_v43, %v1529_v36 }
 0xc48   : > { %1550 = vrot.lane.b32.xlu1 %v1547_v44, %s9240_s23 }
 0xcba   : > { %v9767_v45 = vpop.permute.xlu1 %1550 }
 0xcbb   : > { %7714 = vmatmul.mubr.msk.f32.vlgmr.msra.gmra.mrb[8].mxu1 %vm941_vm0, %v9767_v45 }
 0xcbc   : > { %8409 = vmatpush3.bf16.msra.mxu1 %v9688_v15  ;;  %7735 = vmatprep.mubr.msk.f32.mxu1 %vm9237_vm1, %v9238_v20 }
 0xcbd   : > { %8410 = vmatprep.subr.bf16.mxu1 %v9236_v18 }
 0xcc0   : > { %8412 = vmatpush3.bf16.msra.mxu1 %v9694_v19 }
 0xcc1   : > { %8419 = vmatprep.subr.bf16.mxu1 %v9236_v18 }
 0xd8e   : > { %v1620_v47 = vpop.f32.mrb[8].mxu1 }
 0xd8f   : > { %v1624_v48 = vadd.f32 %v1620_v47, %v1548_v46  ;;  %v7715_v49 = vpop.f32.mrb[9].mxu1  ;;  %v1944_v47 = vld [vmem:[%s905_s22] sm:$0xff] }
 0xd91   : > { %8841 = vtanh.f32 %v1624_v48  ;;  %v1625_v52 = vmul.f32 0.5, %v1624_v48  ;;  %v1945_v48 = vld [vmem:[%s905_s22 + $0x8] sm:$0xff] }
 0xd92   : > { %v8426_v49 = vpack.c.bf16 %v1945_v48, %v1944_v47 }
 0xd93   : > { %8843 = vtanh.f32 %v1625_v52  ;;  %v1947_v52 = vld [vmem:[%s905_s22 + $0x18] sm:$0xff] }
 0xd9b   : > { %v8842_v50 = vpop.eup %8841 }
 0xd9c   : > { %1632 = vrot.lane.b32.xlu0 %v8842_v50, %s9239_s27  ;;  %v1946_v50 = vld [vmem:[%s905_s22 + $0x10] sm:$0xff]  ;;  %s10102_s22 = scalar_lea.vmem %s10623_s1, %s10632_s28 }
 0xd9d   : > { %v8844_v53 = vpop.eup %8843 }
 0xd9e   : > { %v1627_v54 = vmul.f32 0.5, %v8844_v53 }
 0xda0   : > { %v1628_v55 = vadd.f32 0.5, %v1627_v54  ;;  %v8429_v54 = vpack.c.bf16 %v1947_v52, %v1946_v50 }
 0xda2   : > { %v1630_v58 = vmul.f32 %v1628_v55, %v1541_v41 }
 0xe0e   : > { %v1633_v56 = vpop.permute.xlu0 %1632 }
 0xe0f   : > { %v1635_v57 = vmul.f32 %v1633_v56, %v1628_v55 }
 0xe11   : > { %1637 = vrot.lane.b32.xlu1 %v1635_v57, %s9240_s23 }
 0xe83   : > { %v1638_v59 = vpop.permute.xlu1 %1637 }
 0xe84   : > { %v1640_v60 = vadd.f32 %v1638_v59, %v1630_v58 }
 0xe86   : > { %8845 = vtanh.f32 %v1640_v60 }
 0xe90   : > { %v8846_v61 = vpop.eup %8845 }
 0xe91   : > { %1643 = vrot.lane.b32.xlu0 %v8846_v61, %s9239_s27 }
 0xf03   : > { %v1644_v62 = vpop.permute.xlu0 %1643 }
 0xf04   : > { %v1646_v63 = vmul.f32 %v1644_v62, %v1628_v55  ;;  %v9883_v55 = vld [vmem:[%s913_s6] ss:$0 sm:$0xff]  ;;  %s10131_s6 = scalar_lea.vmem %s10624_s9, %s9660_s5 }
 0xf05   : > { %3350 = vst.msk [vmem:[%s10131_s6] sm:$0xf] %vm3349_vm3, %v9238_v20 }
 0xf06   : > { %1649 = vrot.lane.b32.xlu1 %v1646_v63, %s9240_s23 }
 0xf78   : > { %v9781_v0 = vpop.permute.xlu1 %1649 }
 0xf79   : > { %7725 = vmatmul.mubr.msk.f32.vlgmr.msra.gmra.mrb[8].mxu0 %vm941_vm0, %v9781_v0 }
 0xf7a   : > { %8415 = vmatpush3.bf16.msra.mxu0 %v9688_v15  ;;  %7746 = vmatprep.mubr.msk.f32.mxu0 %vm9237_vm1, %v9238_v20 }
 0xf7b   : > { %8416 = vmatprep.subr.bf16.mxu0 %v9236_v18 }
 0xf7e   : > { %8418 = vmatpush3.bf16.msra.mxu0 %v9694_v19 }
 0xf7f   : > { %8425 = vmatprep.subr.bf16.mxu0 %v9236_v18 }
0x104c   : > { %v1719_v2 = vpop.f32.mrb[8].mxu0 }
0x104d   : > { %v1723_v3 = vadd.f32 %v1719_v2, %v1647_v1  ;;  %v7726_v4 = vpop.f32.mrb[9].mxu0 }
0x104f   : > { %8847 = vtanh.f32 %v1723_v3  ;;  %v1724_v7 = vmul.f32 0.5, %v1723_v3 }
0x1051   : > { %8849 = vtanh.f32 %v1724_v7 }
0x1059   : > { %v8848_v6 = vpop.eup %8847 }
0x105a   : > { %1731 = vrot.lane.b32.xlu0 %v8848_v6, %s9239_s27 }
0x105b   : > { %v8850_v15 = vpop.eup %8849 }
0x105c   : > { %v1726_v8 = vmul.f32 0.5, %v8850_v15 }
0x105e   : > { %v1727_v9 = vadd.f32 0.5, %v1726_v8 }
0x1060   : > { %v1729_v19 = vmul.f32 %v1727_v9, %v1640_v60 }
0x10cc   : > { %v1732_v10 = vpop.permute.xlu0 %1731 }
0x10cd   : > { %v1734_v11 = vmul.f32 %v1732_v10, %v1727_v9 }
0x10cf   : > { %1736 = vrot.lane.b32.xlu1 %v1734_v11, %s9240_s23 }
0x1141   : > { %v1737_v12 = vpop.permute.xlu1 %1736 }
0x1142   : > { %v1739_v13 = vadd.f32 %v1737_v12, %v1729_v19 }
0x1144   : > { %8851 = vtanh.f32 %v1739_v13 }
0x114e   : > { %v8852_v14 = vpop.eup %8851 }
0x114f   : > { %1742 = vrot.lane.b32.xlu0 %v8852_v14, %s9239_s27 }
0x11c1   : > { %v1743_v16 = vpop.permute.xlu0 %1742 }
0x11c2   : > { %v1745_v17 = vmul.f32 %v1743_v16, %v1727_v9 }
0x11c4   : > { %1748 = vrot.lane.b32.xlu1 %v1745_v17, %s9240_s23 }
0x1236   : > { %v9801_v26 = vpop.permute.xlu1 %1748 }
0x1237   : > { %7736 = vmatmul.mubr.msk.f32.vlgmr.msra.gmra.mrb[10].mxu1 %vm941_vm0, %v9801_v26 }
0x1238   : > { %8421 = vmatpush3.bf16.msra.mxu1 %v9799_v23  ;;  %7757 = vmatprep.mubr.msk.f32.mxu1 %vm9237_vm1, %v9238_v20 }
0x1239   : > { %8422 = vmatprep.subr.bf16.mxu1 %v9236_v18 }
0x123c   : > { %8424 = vmatpush3.bf16.msra.mxu1 %v9805_v28 }
0x123d   : > { %8431 = vmatprep.subr.bf16.mxu1 %v9236_v18 }
0x123f   : > { %7758 = vmatmul.mubr.f32.vlgmr.msra.gmra.mrb[12].mxu1 %v9238_v20 }
0x1240   : > { %8433 = vmatpush3.bf16.msra.mxu1 %v9799_v23  ;;  %7779 = vmatprep.mubr.msk.f32.mxu1 %vm9237_vm1, %v9238_v20 }
0x1241   : > { %8434 = vmatprep.subr.bf16.mxu1 %v9236_v18 }
0x1244   : > { %8436 = vmatpush3.bf16.msra.mxu1 %v9805_v28 }
0x1245   : > { %8443 = vmatprep.subr.bf16.mxu1 %v9236_v18 }
0x130a   : > { %v1818_v30 = vpop.f32.mrb[10].mxu1 }
0x130b   : > { %v1822_v31 = vadd.f32 %v1818_v30, %v1746_v29  ;;  %v7737_v32 = vpop.f32.mrb[11].mxu1 }
0x130d   : > { %8853 = vtanh.f32 %v1822_v31  ;;  %v1823_v34 = vmul.f32 0.5, %v1822_v31 }
0x130f   : > { %8855 = vtanh.f32 %v1823_v34 }
0x1317   : > { %v8854_v33 = vpop.eup %8853 }
0x1318   : > { %1830 = vrot.lane.b32.xlu0 %v8854_v33, %s9239_s27 }
0x1319   : > { %v8856_v35 = vpop.eup %8855 }
0x131a   : > { %v1825_v36 = vmul.f32 0.5, %v8856_v35 }
0x131c   : > { %v1826_v37 = vadd.f32 0.5, %v1825_v36 }
0x131e   : > { %v1828_v40 = vmul.f32 %v1826_v37, %v1739_v13 }
0x138a   : > { %v1831_v38 = vpop.permute.xlu0 %1830 }
0x138b   : > { %v1833_v39 = vmul.f32 %v1831_v38, %v1826_v37 }
0x138d   : > { %1835 = vrot.lane.b32.xlu1 %v1833_v39, %s9240_s23 }
0x13ff   : > { %v1836_v41 = vpop.permute.xlu1 %1835 }
0x1400   : > { %v9822_v42 = vadd.f32 %v1836_v41, %v1828_v40 }
0x1402   : > { %8857 = vtanh.f32 %v9822_v42 }
0x140c   : > { %v8858_v43 = vpop.eup %8857 }
0x140d   : > { %1841 = vrot.lane.b32.xlu0 %v8858_v43, %s9239_s27 }
0x147f   : > { %v1842_v44 = vpop.permute.xlu0 %1841 }
0x1480   : > { %v1844_v46 = vmul.f32 %v1842_v44, %v1826_v37 }
0x1482   : > { %1847 = vrot.lane.b32.xlu1 %v1844_v46, %s9240_s23 }
0x14f4   : > { %v1848_v53 = vpop.permute.xlu1 %1847 }
0x14f5   : > { %7747 = vmatmul.mubr.msk.f32.vlgmr.msra.gmra.mrb[10].mxu0 %vm941_vm0, %v1848_v53 }
0x14f6   : > { %8427 = vmatpush3.bf16.msra.mxu0 %v8426_v49  ;;  %7768 = vmatprep.mubr.msk.f32.mxu0 %vm9237_vm1, %v9238_v20 }
0x14f7   : > { %8428 = vmatprep.subr.bf16.mxu0 %v9236_v18 }
0x14fa   : > { %8430 = vmatpush3.bf16.msra.mxu0 %v8429_v54 }
0x14fb   : > { %8437 = vmatprep.subr.bf16.mxu0 %v9236_v18 }
0x14fd   : > { %7769 = vmatmul.mubr.msk.f32.vlgmr.msra.gmra.mrb[12].mxu0 %vm941_vm0, %v9725_v51  ;;  %v2025_v51 = vpop.f32.mrb[12].mxu1 }
0x14fe   : > { %8439 = vmatpush3.bf16.msra.mxu0 %v8426_v49  ;;  %7790 = vmatprep.mubr.msk.f32.mxu0 %vm9237_vm1, %v9238_v20 }
0x14ff   : > { %8440 = vmatprep.subr.bf16.mxu0 %v9236_v18 }
0x1502   : > { %8442 = vmatpush3.bf16.msra.mxu0 %v8429_v54 }
0x1503   : > { %8449 = vmatprep.subr.bf16.mxu0 %v9236_v18 }
0x1505   : > { %7791 = vmatmul.mubr.msk.f32.vlgmr.msra.gmra.mrb[14].mxu0 %vm941_vm0, %v9739_v5  ;;  %v7759_v5 = vpop.f32.mrb[13].mxu1 }
0x1506   : > { %8451 = vmatpush3.bf16.msra.mxu0 %v8426_v49  ;;  %7812 = vmatprep.mubr.msk.f32.mxu0 %vm9237_vm1, %v9238_v20 }
0x1507   : > { %8452 = vmatprep.subr.bf16.mxu0 %v9236_v18 }
0x150a   : > { %8454 = vmatpush3.bf16.msra.mxu0 %v8429_v54 }
0x150b   : > { %8461 = vmatprep.subr.bf16.mxu0 %v9236_v18 }
0x150d   : > { %7813 = vmatmul.mubr.msk.f32.vlgmr.msra.gmra.mrb[16].mxu0 %vm941_vm0, %v9753_v27 }
0x150e   : > { %8463 = vmatpush3.bf16.msra.mxu0 %v8426_v49  ;;  %7834 = vmatprep.mubr.msk.f32.mxu0 %vm9237_vm1, %v9238_v20 }
0x150f   : > { %8464 = vmatprep.subr.bf16.mxu0 %v9236_v18 }
0x1512   : > { %8466 = vmatpush3.bf16.msra.mxu0 %v8429_v54 }
0x1513   : > { %8473 = vmatprep.subr.bf16.mxu0 %v9236_v18 }
0x1515   : > { %7835 = vmatmul.mubr.msk.f32.vlgmr.msra.gmra.mrb[18].mxu0 %vm941_vm0, %v9767_v45 }
0x1516   : > { %8475 = vmatpush3.bf16.msra.mxu0 %v8426_v49  ;;  %7856 = vmatprep.mubr.msk.f32.mxu0 %vm9237_vm1, %v9238_v20 }
0x1517   : > { %8476 = vmatprep.subr.bf16.mxu0 %v9236_v18 }
0x151a   : > { %8478 = vmatpush3.bf16.msra.mxu0 %v8429_v54 }
0x151b   : > { %8485 = vmatprep.subr.bf16.mxu0 %v9236_v18 }
0x151d   : > { %7857 = vmatmul.mubr.msk.f32.vlgmr.msra.gmra.mrb[20].mxu0 %vm941_vm0, %v9781_v0 }
0x151e   : > { %8487 = vmatpush3.bf16.msra.mxu0 %v8426_v49  ;;  %7878 = vmatprep.mubr.msk.f32.mxu0 %vm9237_vm1, %v9238_v20 }
0x151f   : > { %8488 = vmatprep.subr.bf16.mxu0 %v9236_v18 }
0x1522   : > { %8490 = vmatpush3.bf16.msra.mxu0 %v8429_v54 }
0x1523   : > { %8497 = vmatprep.subr.bf16.mxu0 %v9236_v18 }
0x1525   : > { %7879 = vmatmul.mubr.msk.f32.vlgmr.msra.gmra.mrb[22].mxu0 %vm941_vm0, %v9801_v26 }
0x1526   : > { %8499 = vmatpush3.bf16.msra.mxu0 %v8426_v49  ;;  %7900 = vmatprep.mubr.msk.f32.mxu0 %vm9237_vm1, %v9238_v20 }
0x1527   : > { %8500 = vmatprep.subr.bf16.mxu0 %v9236_v18 }
0x152a   : > { %8502 = vmatpush3.bf16.msra.mxu0 %v8429_v54 }
0x152b   : > { %8509 = vmatprep.subr.bf16.mxu0 %v9236_v18 }
0x152d   : > { %7901 = vmatmul.mubr.msk.f32.vlgmr.msra.gmra.mrb[24].mxu0 %vm941_vm0, %v1848_v53 }
0x152e   : > { %8511 = vmatpush3.bf16.msra.mxu0 %v8426_v49  ;;  %7922 = vmatprep.mubr.msk.f32.mxu0 %vm9237_vm1, %v9238_v20 }
0x152f   : > { %8512 = vmatprep.subr.bf16.mxu0 %v9236_v18 }
0x1532   : > { %8514 = vmatpush3.bf16.msra.mxu0 %v8429_v54 }
0x1533   : > { %8521 = vmatprep.subr.bf16.mxu0 %v9236_v18 }
0x15c8   : > { %v9877_v27 = vpop.f32.mrb[10].mxu0 }
0x15c9   : > { %v7748_v45 = vpop.f32.mrb[11].mxu0 }
0x15d0   : > { %v2095_v56 = vpop.f32.mrb[12].mxu0 }
0x15d1   : > { %v2096_v57 = vadd.f32 %v2095_v56, %v2025_v51  ;;  %v7770_v58 = vpop.f32.mrb[13].mxu0 }
0x15d3   : > { %v2099_v59 = vadd.f32 %v9883_v55, %v2096_v57 }
0x15d5   : > { %8859 = vtanh.f32 %v2099_v59  ;;  %v2100_v9 = vmul.f32 0.5, %v2099_v59 }
0x15d7   : > { %8861 = vtanh.f32 %v2100_v9 }
0x15d8   : > { %v2263_v60 = vpop.f32.mrb[14].mxu0 }
0x15d9   : > { %v7792_v61 = vpop.f32.mrb[15].mxu0 }
0x15df   : > { %v8860_v62 = vpop.eup %8859 }
0x15e0   : > { %2107 = vrot.lane.b32.xlu0 %v8860_v62, %s9239_s27  ;;  %v9887_v63 = vpop.f32.mrb[16].mxu0 }
0x15e1   : > { %v7814_v0 = vpop.f32.mrb[17].mxu0  ;;  %v8862_v10 = vpop.eup %8861 }
0x15e2   : > { %v2102_v11 = vmul.f32 0.5, %v8862_v10 }
0x15e4   : > { %v2103_v19 = vadd.f32 0.5, %v2102_v11 }
0x15e6   : > { %v2105_v14 = vmul.f32 0.0, %v2103_v19 }
0x15e8   : > { %v9889_v1 = vpop.f32.mrb[18].mxu0 }
0x15e9   : > { %v7836_v2 = vpop.f32.mrb[19].mxu0 }
0x15f0   : > { %v9891_v3 = vpop.f32.mrb[20].mxu0 }
0x15f1   : > { %v7858_v4 = vpop.f32.mrb[21].mxu0 }
0x15f8   : > { %v9893_v6 = vpop.f32.mrb[22].mxu0 }
0x15f9   : > { %v7880_v7 = vpop.f32.mrb[23].mxu0 }
0x1600   : > { %v9895_v15 = vpop.f32.mrb[24].mxu0 }
0x1601   : > { %v7902_v8 = vpop.f32.mrb[25].mxu0 }
0x1652   : > { %v2108_v12 = vpop.permute.xlu0 %2107 }
0x1653   : > { %v2110_v13 = vmul.f32 %v2108_v12, %v2103_v19 }
0x1655   : > { %2112 = vrot.lane.b32.xlu1 %v2110_v13, %s9240_s23 }
0x16c7   : > { %v2113_v16 = vpop.permute.xlu1 %2112 }
0x16c8   : > { %v2115_v17 = vadd.f32 %v2113_v16, %v2105_v14 }
0x16ca   : > { %8863 = vtanh.f32 %v2115_v17 }
0x16d4   : > { %v8864_v21 = vpop.eup %8863 }
0x16d5   : > { %2118 = vrot.lane.b32.xlu0 %v8864_v21, %s9239_s27 }
0x1747   : > { %v2119_v22 = vpop.permute.xlu0 %2118 }
0x1748   : > { %v2121_v24 = vmul.f32 %v2119_v22, %v2103_v19 }
0x174a   : > { %2123 = vrot.lane.b32.xlu1 %v2121_v24, %s9240_s23 }
0x17bc   : > { %v2124_v25 = vpop.permute.xlu1 %2123 }
0x17bd   : > { %7780 = vmatmul.mubr.msk.f32.vlgmr.msra.gmra.mrb[14].mxu1 %vm941_vm0, %v2124_v25 }
0x17be   : > { %8445 = vmatpush3.bf16.msra.mxu1 %v9799_v23  ;;  %7801 = vmatprep.mubr.msk.f32.mxu1 %vm9237_vm1, %v9238_v20 }
0x17bf   : > { %8446 = vmatprep.subr.bf16.mxu1 %v9236_v18 }
0x17c2   : > { %8448 = vmatpush3.bf16.msra.mxu1 %v9805_v28 }
0x17c3   : > { %8455 = vmatprep.subr.bf16.mxu1 %v9236_v18 }
0x1890   : > { %v2193_v26 = vpop.f32.mrb[14].mxu1 }
0x1891   : > { %v2264_v29 = vadd.f32 %v2263_v60, %v2193_v26  ;;  %v7781_v30 = vpop.f32.mrb[15].mxu1 }
0x1893   : > { %v2267_v31 = vadd.f32 %v9883_v55, %v2264_v29 }
0x1895   : > { %8865 = vtanh.f32 %v2267_v31  ;;  %v2268_v33 = vmul.f32 0.5, %v2267_v31 }
0x1897   : > { %8867 = vtanh.f32 %v2268_v33 }
0x189f   : > { %v8866_v32 = vpop.eup %8865 }
0x18a0   : > { %2275 = vrot.lane.b32.xlu0 %v8866_v32, %s9239_s27 }
0x18a1   : > { %v8868_v34 = vpop.eup %8867 }
0x18a2   : > { %v2270_v35 = vmul.f32 0.5, %v8868_v34 }
0x18a4   : > { %v2271_v36 = vadd.f32 0.5, %v2270_v35 }
0x18a6   : > { %v2273_v39 = vmul.f32 %v2271_v36, %v2115_v17 }
0x1912   : > { %v2276_v37 = vpop.permute.xlu0 %2275 }
0x1913   : > { %v2278_v38 = vmul.f32 %v2276_v37, %v2271_v36 }
0x1915   : > { %2280 = vrot.lane.b32.xlu1 %v2278_v38, %s9240_s23 }
0x1987   : > { %v2281_v40 = vpop.permute.xlu1 %2280 }
0x1988   : > { %v2283_v41 = vadd.f32 %v2281_v40, %v2273_v39 }
0x198a   : > { %8869 = vtanh.f32 %v2283_v41 }
0x1994   : > { %v8870_v43 = vpop.eup %8869 }
0x1995   : > { %2286 = vrot.lane.b32.xlu0 %v8870_v43, %s9239_s27 }
0x1a07   : > { %v2287_v44 = vpop.permute.xlu0 %2286 }
0x1a08   : > { %v2289_v46 = vmul.f32 %v2287_v44, %v2271_v36 }
0x1a0a   : > { %2291 = vrot.lane.b32.xlu1 %v2289_v46, %s9240_s23 }
0x1a7c   : > { %v2292_v47 = vpop.permute.xlu1 %2291 }
0x1a7d   : > { %7802 = vmatmul.mubr.msk.f32.vlgmr.msra.gmra.mrb[16].mxu1 %vm941_vm0, %v2292_v47 }
0x1a7e   : > { %8457 = vmatpush3.bf16.msra.mxu1 %v9799_v23  ;;  %7823 = vmatprep.mubr.msk.f32.mxu1 %vm9237_vm1, %v9238_v20 }
0x1a7f   : > { %8458 = vmatprep.subr.bf16.mxu1 %v9236_v18 }
0x1a82   : > { %8460 = vmatpush3.bf16.msra.mxu1 %v9805_v28 }
0x1a83   : > { %8467 = vmatprep.subr.bf16.mxu1 %v9236_v18 }
0x1b50   : > { %v2361_v48 = vpop.f32.mrb[16].mxu1 }
0x1b51   : > { %v2432_v49 = vadd.f32 %v9887_v63, %v2361_v48  ;;  %v7803_v50 = vpop.f32.mrb[17].mxu1 }
0x1b53   : > { %v2435_v52 = vadd.f32 %v9883_v55, %v2432_v49 }
0x1b55   : > { %8871 = vtanh.f32 %v2435_v52  ;;  %v2436_v54 = vmul.f32 0.5, %v2435_v52 }
0x1b57   : > { %8873 = vtanh.f32 %v2436_v54 }
0x1b5f   : > { %v8872_v53 = vpop.eup %8871 }
0x1b60   : > { %2443 = vrot.lane.b32.xlu0 %v8872_v53, %s9239_s27 }
0x1b61   : > { %v8874_v51 = vpop.eup %8873 }
0x1b62   : > { %v2438_v5 = vmul.f32 0.5, %v8874_v51 }
0x1b64   : > { %v2439_v45 = vadd.f32 0.5, %v2438_v5 }
0x1b66   : > { %v2441_v58 = vmul.f32 %v2439_v45, %v2283_v41 }
0x1bd2   : > { %v2444_v56 = vpop.permute.xlu0 %2443 }
0x1bd3   : > { %v2446_v57 = vmul.f32 %v2444_v56, %v2439_v45 }
0x1bd5   : > { %2448 = vrot.lane.b32.xlu1 %v2446_v57, %s9240_s23 }
0x1c47   : > { %v2449_v59 = vpop.permute.xlu1 %2448 }
0x1c48   : > { %v2451_v60 = vadd.f32 %v2449_v59, %v2441_v58 }
0x1c4a   : > { %8875 = vtanh.f32 %v2451_v60 }
0x1c54   : > { %v8876_v61 = vpop.eup %8875 }
0x1c55   : > { %2454 = vrot.lane.b32.xlu0 %v8876_v61, %s9239_s27 }
0x1cc7   : > { %v2455_v62 = vpop.permute.xlu0 %2454 }
0x1cc8   : > { %v2457_v63 = vmul.f32 %v2455_v62, %v2439_v45 }
0x1cca   : > { %2459 = vrot.lane.b32.xlu1 %v2457_v63, %s9240_s23 }
0x1d3c   : > { %v2460_v0 = vpop.permute.xlu1 %2459 }
0x1d3d   : > { %7824 = vmatmul.mubr.msk.f32.vlgmr.msra.gmra.mrb[18].mxu1 %vm941_vm0, %v2460_v0 }
0x1d3e   : > { %8469 = vmatpush3.bf16.msra.mxu1 %v9799_v23  ;;  %7845 = vmatprep.mubr.msk.f32.mxu1 %vm9237_vm1, %v9238_v20 }
0x1d3f   : > { %8470 = vmatprep.subr.bf16.mxu1 %v9236_v18 }
0x1d42   : > { %8472 = vmatpush3.bf16.msra.mxu1 %v9805_v28 }
0x1d43   : > { %8479 = vmatprep.subr.bf16.mxu1 %v9236_v18 }
0x1e10   : > { %v2529_v2 = vpop.f32.mrb[18].mxu1 }
0x1e11   : > { %v2600_v4 = vadd.f32 %v9889_v1, %v2529_v2  ;;  %v7825_v7 = vpop.f32.mrb[19].mxu1 }
0x1e13   : > { %v2603_v8 = vadd.f32 %v9883_v55, %v2600_v4 }
0x1e15   : > { %8877 = vtanh.f32 %v2603_v8  ;;  %v2604_v10 = vmul.f32 0.5, %v2603_v8 }
0x1e17   : > { %8879 = vtanh.f32 %v2604_v10 }
0x1e1f   : > { %v8878_v9 = vpop.eup %8877 }
0x1e20   : > { %2611 = vrot.lane.b32.xlu0 %v8878_v9, %s9239_s27 }
0x1e21   : > { %v8880_v11 = vpop.eup %8879 }
0x1e22   : > { %v2606_v19 = vmul.f32 0.5, %v8880_v11 }
0x1e24   : > { %v2607_v12 = vadd.f32 0.5, %v2606_v19 }
0x1e26   : > { %v2609_v16 = vmul.f32 %v2607_v12, %v2451_v60 }
0x1e92   : > { %v2612_v13 = vpop.permute.xlu0 %2611 }
0x1e93   : > { %v2614_v14 = vmul.f32 %v2612_v13, %v2607_v12 }
0x1e95   : > { %2616 = vrot.lane.b32.xlu1 %v2614_v14, %s9240_s23 }
0x1f07   : > { %v2617_v17 = vpop.permute.xlu1 %2616 }
0x1f08   : > { %v2619_v21 = vadd.f32 %v2617_v17, %v2609_v16 }
0x1f0a   : > { %8881 = vtanh.f32 %v2619_v21 }
0x1f14   : > { %v8882_v1 = vpop.eup %8881 }
0x1f15   : > { %2622 = vrot.lane.b32.xlu0 %v8882_v1, %s9239_s27 }
0x1f87   : > { %v2623_v22 = vpop.permute.xlu0 %2622 }
0x1f88   : > { %v2625_v24 = vmul.f32 %v2623_v22, %v2607_v12 }
0x1f8a   : > { %2627 = vrot.lane.b32.xlu1 %v2625_v24, %s9240_s23 }
0x1ffc   : > { %v2628_v25 = vpop.permute.xlu1 %2627 }
0x1ffd   : > { %7846 = vmatmul.mubr.msk.f32.vlgmr.msra.gmra.mrb[20].mxu1 %vm941_vm0, %v2628_v25 }
0x1ffe   : > { %8481 = vmatpush3.bf16.msra.mxu1 %v9799_v23  ;;  %7867 = vmatprep.mubr.msk.f32.mxu1 %vm9237_vm1, %v9238_v20 }
0x1fff   : > { %8482 = vmatprep.subr.bf16.mxu1 %v9236_v18 }
0x2002   : > { %8484 = vmatpush3.bf16.msra.mxu1 %v9805_v28 }
0x2003   : > { %8491 = vmatprep.subr.bf16.mxu1 %v9236_v18 }
0x20d0   : > { %v2697_v26 = vpop.f32.mrb[20].mxu1 }
0x20d1   : > { %v2768_v29 = vadd.f32 %v9891_v3, %v2697_v26  ;;  %v7847_v30 = vpop.f32.mrb[21].mxu1 }
0x20d2   : > { %v3303_v30 = vld [vmem:[%s918_s18] sm:$0xff] }
0x20d3   : > { %v2771_v31 = vadd.f32 %v9883_v55, %v2768_v29 }
0x20d5   : > { %8883 = vtanh.f32 %v2771_v31  ;;  %v2772_v33 = vmul.f32 0.5, %v2771_v31  ;;  %v3304_v31 = vld [vmem:[%s918_s18 + $0x8] sm:$0xff] }
0x20d7   : > { %8885 = vtanh.f32 %v2772_v33  ;;  %v3305_v33 = vld [vmem:[%s918_s18 + $0x10] sm:$0xff] }
0x20df   : > { %v8884_v32 = vpop.eup %8883 }
0x20e0   : > { %2779 = vrot.lane.b32.xlu0 %v8884_v32, %s9239_s27  ;;  %v9987_v32 = vpack.c.bf16 %v3304_v31, %v3303_v30  ;;  %v3326_v30 = vld [vmem:[%s9647_s17 + $0x10] sm:$0xff]  ;;  %v3327_v31 = vld [vmem:[%s9647_s17 + $0x18] sm:$0xff] }
0x20e1   : > { %v8886_v34 = vpop.eup %8885 }
0x20e2   : > { %v2774_v35 = vmul.f32 0.5, %v8886_v34  ;;  %v3306_v34 = vld [vmem:[%s918_s18 + $0x18] sm:$0xff] }
0x20e4   : > { %v2775_v36 = vadd.f32 0.5, %v2774_v35 }
0x20e6   : > { %v2777_v39 = vmul.f32 %v2775_v36, %v2619_v21 }
0x2152   : > { %v2780_v37 = vpop.permute.xlu0 %2779 }
0x2153   : > { %v2782_v38 = vmul.f32 %v2780_v37, %v2775_v36 }
0x2155   : > { %2784 = vrot.lane.b32.xlu1 %v2782_v38, %s9240_s23 }
0x21c7   : > { %v2785_v40 = vpop.permute.xlu1 %2784 }
0x21c8   : > { %v2787_v41 = vadd.f32 %v2785_v40, %v2777_v39  ;;  %v3346_v40 = vld [vmem:[%s10617_s11] sm:$0xf] }
0x21ca   : > { %8887 = vtanh.f32 %v2787_v41 }
0x21d4   : > { %v8888_v3 = vpop.eup %8887 }
0x21d5   : > { %2790 = vrot.lane.b32.xlu0 %v8888_v3, %s9239_s27  ;;  %v3308_v3 = vld [vmem:[%s9633_s8 + $0x8] sm:$0xff] }
0x2247   : > { %v2791_v43 = vpop.permute.xlu0 %2790 }
0x2248   : > { %v2793_v44 = vmul.f32 %v2791_v43, %v2775_v36  ;;  %v9991_v36 = vpack.c.bf16 %v3306_v34, %v3305_v33  ;;  %v10068_v34 = vpack.c.bf16 %v3327_v31, %v3326_v30 }
0x224a   : > { %2795 = vrot.lane.b32.xlu1 %v2793_v44, %s9240_s23 }
0x22bc   : > { %v2796_v46 = vpop.permute.xlu1 %2795 }
0x22bd   : > { %7868 = vmatmul.mubr.msk.f32.vlgmr.msra.gmra.mrb[22].mxu1 %vm941_vm0, %v2796_v46 }
0x22be   : > { %8493 = vmatpush3.bf16.msra.mxu1 %v9799_v23  ;;  %7889 = vmatprep.mubr.msk.f32.mxu1 %vm9237_vm1, %v9238_v20 }
0x22bf   : > { %8494 = vmatprep.subr.bf16.mxu1 %v9236_v18 }
0x22c2   : > { %8496 = vmatpush3.bf16.msra.mxu1 %v9805_v28 }
0x22c3   : > { %8503 = vmatprep.subr.bf16.mxu1 %v9236_v18 }
0x2390   : > { %v2865_v47 = vpop.f32.mrb[22].mxu1 }
0x2391   : > { %v2936_v48 = vadd.f32 %v9893_v6, %v2865_v47  ;;  %v7869_v49 = vpop.f32.mrb[23].mxu1 }
0x2393   : > { %v2939_v50 = vadd.f32 %v9883_v55, %v2936_v48 }
0x2395   : > { %8889 = vtanh.f32 %v2939_v50  ;;  %v2940_v53 = vmul.f32 0.5, %v2939_v50 }
0x2397   : > { %8891 = vtanh.f32 %v2940_v53  ;;  %v3310_v53 = vld [vmem:[%s9639_s14 + $0x8] sm:$0xff] }
0x239f   : > { %v8890_v52 = vpop.eup %8889 }
0x23a0   : > { %2947 = vrot.lane.b32.xlu0 %v8890_v52, %s9239_s27  ;;  %v3309_v52 = vld [vmem:[%s9639_s14] sm:$0xff] }
0x23a1   : > { %v8892_v54 = vpop.eup %8891 }
0x23a2   : > { %v2942_v51 = vmul.f32 0.5, %v8892_v54  ;;  %v10021_v54 = vpack.c.bf16 %v3310_v53, %v3309_v52  ;;  %v10105_v53 = vld [vmem:[%s10102_s22] ss:$0 sm:$0xff] }
0x23a4   : > { %v2943_v5 = vadd.f32 0.5, %v2942_v51  ;;  %v3311_v51 = vld [vmem:[%s9639_s14 + $0x10] sm:$0xff] }
0x23a6   : > { %v2945_v57 = vmul.f32 %v2943_v5, %v2787_v41  ;;  %v3307_v41 = vld [vmem:[%s9633_s8] sm:$0xff] }
0x23a7   : > { %v10011_v43 = vpack.c.bf16 %v3308_v3, %v3307_v41 }
0x2412   : > { %v2948_v45 = vpop.permute.xlu0 %2947 }
0x2413   : > { %v2950_v56 = vmul.f32 %v2948_v45, %v2943_v5 }
0x2415   : > { %2952 = vrot.lane.b32.xlu1 %v2950_v56, %s9240_s23 }
0x2487   : > { %v2953_v58 = vpop.permute.xlu1 %2952 }
0x2488   : > { %v2955_v59 = vadd.f32 %v2953_v58, %v2945_v57 }
0x248a   : > { %8893 = vtanh.f32 %v2955_v59 }
0x2494   : > { %v8894_v6 = vpop.eup %8893 }
0x2495   : > { %2958 = vrot.lane.b32.xlu0 %v8894_v6, %s9239_s27 }
0x2507   : > { %v2959_v60 = vpop.permute.xlu0 %2958 }
0x2508   : > { %v2961_v61 = vmul.f32 %v2959_v60, %v2943_v5  ;;  %v3312_v5 = vld [vmem:[%s9639_s14 + $0x18] sm:$0xff] }
0x2509   : > { %v10027_v56 = vpack.c.bf16 %v3312_v5, %v3311_v51 }
0x250a   : > { %2963 = vrot.lane.b32.xlu1 %v2961_v61, %s9240_s23 }
0x257c   : > { %v2964_v62 = vpop.permute.xlu1 %2963 }
0x257d   : > { %7890 = vmatmul.mubr.msk.f32.vlgmr.msra.gmra.mrb[24].mxu1 %vm941_vm0, %v2964_v62  ;;  %v10045_v62 = vld [vmem:[%s10042_s7] ss:$0 sm:$0xff] }
0x257e   : > { %8505 = vmatpush3.bf16.msra.mxu1 %v9799_v23  ;;  %7911 = vmatprep.mubr.msk.f32.mxu1 %vm9237_vm1, %v9238_v20 }
0x257f   : > { %8506 = vmatprep.subr.bf16.mxu1 %v9236_v18 }
0x2582   : > { %8508 = vmatpush3.bf16.msra.mxu1 %v9805_v28 }
0x2583   : > { %8515 = vmatprep.subr.bf16.mxu1 %v9236_v18 }
0x2650   : > { %v3033_v63 = vpop.f32.mrb[24].mxu1 }
0x2651   : > { %v3104_v0 = vadd.f32 %v9895_v15, %v3033_v63  ;;  %v7891_v2 = vpop.f32.mrb[25].mxu1  ;;  %v1845_v15 = vld [vmem:[#allocation2 + $0x1c] sm:$0xf] }
0x2652   : > { %v1921_v14 = vadd.f32 %v9877_v27, %v1845_v15 }
0x2653   : > { %v3107_v4 = vadd.f32 %v9883_v55, %v3104_v0 }
0x2654   : > { %v1922_v21 = vmul.f32 0.5, %v1921_v14 }
0x2655   : > { %8895 = vtanh.f32 %v3107_v4  ;;  %v3108_v23 = vmul.f32 0.5, %v3107_v4 }
0x2657   : > { %8897 = vtanh.f32 %v3108_v23 }
0x265f   : > { %v8896_v7 = vpop.eup %8895 }
0x2660   : > { %3115 = vrot.lane.b32.xlu0 %v8896_v7, %s9239_s27 }
0x2661   : > { %v8898_v8 = vpop.eup %8897 }
0x2662   : > { %v3110_v9 = vmul.f32 0.5, %v8898_v8 }
0x2664   : > { %v3111_v10 = vadd.f32 0.5, %v3110_v9 }
0x2666   : > { %v3113_v28 = vmul.f32 %v3111_v10, %v2955_v59 }
0x26d2   : > { %v3116_v11 = vpop.permute.xlu0 %3115 }
0x26d3   : > { %v3118_v19 = vmul.f32 %v3116_v11, %v3111_v10 }
0x26d5   : > { %3120 = vrot.lane.b32.xlu1 %v3118_v19, %s9240_s23 }
0x2747   : > { %v3121_v12 = vpop.permute.xlu1 %3120 }
0x2748   : > { %v9975_v13 = vadd.f32 %v3121_v12, %v3113_v28 }
0x274a   : > { %8899 = vtanh.f32 %v9975_v13 }
0x274b   : > { %8901 = vtanh.f32 %v1921_v14 }
0x274c   : > { %8903 = vtanh.f32 %v1922_v21 }
0x2754   : > { %v8900_v16 = vpop.eup %8899 }
0x2755   : > { %3126 = vrot.lane.b32.xlu0 %v8900_v16, %s9239_s27  ;;  %v8902_v17 = vpop.eup %8901 }
0x2756   : > { %v8904_v1 = vpop.eup %8903 }
0x2757   : > { %v1924_v22 = vmul.f32 0.5, %v8904_v1 }
0x2759   : > { %1929 = vrot.lane.b32.xlu0 %v8902_v17, %s9239_s27  ;;  %v1925_v26 = vadd.f32 0.5, %v1924_v22 }
0x275b   : > { %v1927_v37 = vmul.f32 %v1925_v26, %v9822_v42 }
0x27c7   : > { %v3127_v24 = vpop.permute.xlu0 %3126 }
0x27c8   : > { %v3129_v25 = vmul.f32 %v3127_v24, %v3111_v10 }
0x27ca   : > { %3131 = vrot.lane.b32.xlu1 %v3129_v25, %s9240_s23 }
0x27cb   : > { %v1930_v27 = vpop.permute.xlu0 %1929 }
0x27cc   : > { %v1932_v29 = vmul.f32 %v1930_v27, %v1925_v26  ;;  %v3324_v27 = vld [vmem:[%s9647_s17] sm:$0xff] }
0x27ce   : > { %1934 = vrot.lane.b32.xlu1 %v1932_v29, %s9240_s23  ;;  %v3325_v29 = vld [vmem:[%s9647_s17 + $0x8] sm:$0xff] }
0x283c   : > { %v3132_v35 = vpop.permute.xlu1 %3131 }
0x283d   : > { %7912 = vmatmul.mubr.msk.f32.vlgmr.msra.gmra.mrb[26].mxu1 %vm941_vm0, %v3132_v35 }
0x283e   : > { %8517 = vmatpush3.bf16.msra.mxu1 %v9987_v32  ;;  %7933 = vmatprep.mubr.msk.f32.mxu1 %vm9237_vm1, %v9238_v20 }
0x283f   : > { %8518 = vmatprep.subr.bf16.mxu1 %v9236_v18 }
0x2840   : > { %v1935_v38 = vpop.permute.xlu1 %1934 }
0x2841   : > { %v9997_v39 = vadd.f32 %v1935_v38, %v1927_v37  ;;  %v3320_v37 = vld [vmem:[%s9641_s30] sm:$0xff]  ;;  %v3321_v38 = vld [vmem:[%s9641_s30 + $0x8] sm:$0xff] }
0x2842   : > { %8520 = vmatpush3.bf16.msra.mxu1 %v9991_v36 }
0x2843   : > { %8905 = vtanh.f32 %v9997_v39  ;;  %8527 = vmatprep.subr.bf16.mxu1 %v9236_v18 }
0x2845   : > { %7934 = vmatmul.mubr.msk.f32.vlgmr.msra.gmra.mrb[28].mxu1 %vm941_vm0, %v3346_v40  ;;  %v3322_v40 = vld [vmem:[%s9641_s30 + $0x10] sm:$0xff] }
0x2846   : > { %7951 = vmatprep.mubr.msk.f32.mxu1 %vm9237_vm1, %v9238_v20  ;;  %8529 = vmatpush3.bf16.msra.mxu1 %v10011_v43 }
0x2847   : > { %8536 = vmatprep.subr.bf16.mxu1 %v9236_v18 }
0x284d   : > { %v8906_v42 = vpop.eup %8905 }
0x284e   : > { %1940 = vrot.lane.b32.xlu0 %v8906_v42, %s9239_s27  ;;  %v3323_v42 = vld [vmem:[%s9641_s30 + $0x18] sm:$0xff] }
0x284f   : > { %v10081_v41 = vpack.c.bf16 %v3323_v42, %v3322_v40 }
0x28c0   : > { %v1941_v44 = vpop.permute.xlu0 %1940 }
0x28c1   : > { %v1943_v46 = vmul.f32 %v1941_v44, %v1925_v26 }
0x28c3   : > { %3206 = vrot.lane.b32.xlu1 %v1943_v46, %s9240_s23 }
0x2910   : > { %v3201_v47 = vpop.f32.mrb[26].mxu1 }
0x2911   : > { %v7913_v48 = vpop.f32.mrb[27].mxu1 }
0x2918   : > { %v3420_v49 = vpop.f32.mrb[28].mxu1 }
0x2919   : > { %v7935_v50 = vpop.f32.mrb[29].mxu1  ;;  %7952 = vmatmul.mubr.msk.f32.vlgmr.msra.gmra.mrb[30].mxu1 %vm1048_vm2, %v3420_v49 }
0x291a   : > { %7973 = vmatprep.mubr.msk.f32.mxu1 %vm9237_vm1, %v9238_v20 }
0x2935   : > { %v3207_v45 = vpop.permute.xlu1 %3206 }
0x2936   : > { %7923 = vmatmul.mubr.msk.f32.vlgmr.msra.gmra.mrb[26].mxu0 %vm941_vm0, %v3207_v45 }
0x2937   : > { %8523 = vmatpush3.bf16.msra.mxu0 %v10021_v54  ;;  %7944 = vmatprep.mubr.msk.f32.mxu0 %vm9237_vm1, %v9238_v20 }
0x2938   : > { %8524 = vmatprep.subr.bf16.mxu0 %v9236_v18 }
0x293b   : > { %8526 = vmatpush3.bf16.msra.mxu0 %v10027_v56 }
0x293c   : > { %8530 = vmatprep.subr.bf16.mxu0 %v9236_v18 }
0x293e   : > { %7945 = vmatmul.mubr.msk.f32.vlgmr.msra.gmra.mrb[28].mxu0 %vm941_vm0, %v3207_v45 }
0x293f   : > { %7962 = vmatprep.mubr.msk.f32.mxu0 %vm9237_vm1, %v9238_v20 }
0x29ec   : > { %v3563_v57 = vpop.f32.mrb[30].mxu1 }
0x29ed   : > { %v7953_v58 = vpop.f32.mrb[31].mxu1 }
0x2a09   : > { %v3276_v59 = vpop.f32.mrb[26].mxu0 }
0x2a0a   : > { %v3277_v6 = vadd.f32 %v3276_v59, %v3201_v47  ;;  %v7924_v60 = vpop.f32.mrb[27].mxu0 }
0x2a0c   : > { %v3280_v61 = vadd.f32 %v9883_v55, %v3277_v6 }
0x2a0e   : > { %8907 = vtanh.f32 %v3280_v61  ;;  %v3281_v55 = vmul.f32 0.5, %v3280_v61 }
0x2a11   : > { %v3490_v63 = vpop.f32.mrb[28].mxu0 }
0x2a12   : > { %v3564_v0 = vadd.f32 %v3563_v57, %v3490_v63  ;;  %v7946_v2 = vpop.f32.mrb[29].mxu0 }
0x2a14   : > { %v3567_v4 = vadd.f32 %v10045_v62, %v3564_v0 }
0x2a16   : > { %8909 = vtanh.f32 %v3567_v4  ;;  %v3568_v8 = vmul.f32 0.5, %v3567_v4 }
0x2a17   : > { %8911 = vtanh.f32 %v3281_v55  ;;  %v3336_v55 = vld [vmem:[%s9649_s20 + $0x8] sm:$0xff] }
0x2a18   : > { %v8908_v7 = vpop.eup %8907  ;;  %8913 = vtanh.f32 %v3568_v8  ;;  %v3337_v8 = vld [vmem:[%s9649_s20 + $0x10] sm:$0xff] }
0x2a19   : > { %3288 = vrot.lane.b32.xlu0 %v8908_v7, %s9239_s27 }
0x2a20   : > { %v8910_v23 = vpop.eup %8909 }
0x2a21   : > { %3575 = vrot.lane.b32.xlu1 %v8910_v23, %s9239_s27  ;;  %v8912_v9 = vpop.eup %8911  ;;  %v3335_v23 = vld [vmem:[%s9649_s20] sm:$0xff] }
0x2a22   : > { %v3283_v10 = vmul.f32 0.5, %v8912_v9  ;;  %v8914_v19 = vpop.eup %8913  ;;  %v10117_v9 = vpack.c.bf16 %v3336_v55, %v3335_v23 }
0x2a23   : > { %v3570_v15 = vmul.f32 0.5, %v8914_v19 }
0x2a24   : > { %v3284_v11 = vadd.f32 0.5, %v3283_v10  ;;  %v3338_v10 = vld [vmem:[%s9649_s20 + $0x18] sm:$0xff] }
0x2a25   : > { %v3571_v14 = vadd.f32 0.5, %v3570_v15 }
0x2a26   : > { %v3286_v21 = vmul.f32 %v3284_v11, %v9975_v13  ;;  %v10063_v13 = vpack.c.bf16 %v3325_v29, %v3324_v27 }
0x2a27   : > { %v3573_v24 = vmul.f32 %v3571_v14, %v9997_v39  ;;  %v10076_v39 = vpack.c.bf16 %v3321_v38, %v3320_v37 }
0x2a28   : > { %8532 = vmatpush3.bf16.msra.mxu0 %v10063_v13 }
0x2a29   : > { %8533 = vmatprep.subr.bf16.mxu0 %v9236_v18  ;;  %8538 = vmatpush3.bf16.msra.mxu1 %v10076_v39 }
0x2a2a   : > { %8539 = vmatprep.subr.bf16.mxu1 %v9236_v18 }
0x2a2c   : > { %8535 = vmatpush3.bf16.msra.mxu0 %v10068_v34 }
0x2a2d   : > { %8542 = vmatprep.subr.bf16.mxu0 %v9236_v18  ;;  %8541 = vmatpush3.bf16.msra.mxu1 %v10081_v41 }
0x2a2e   : > { %8548 = vmatprep.subr.bf16.mxu1 %v9236_v18 }
0x2a8b   : > { %v3289_v28 = vpop.permute.xlu0 %3288 }
0x2a8c   : > { %v3291_v12 = vmul.f32 %v3289_v28, %v3284_v11 }
0x2a8e   : > { %3293 = vrot.lane.b32.xlu0 %v3291_v12, %s9240_s23 }
0x2a93   : > { %v3576_v16 = vpop.permute.xlu1 %3575 }
0x2a94   : > { %v3578_v17 = vmul.f32 %v3576_v16, %v3571_v14 }
0x2a96   : > { %3580 = vrot.lane.b32.xlu1 %v3578_v17, %s9240_s23 }
0x2b00   : > { %v3294_v1 = vpop.permute.xlu0 %3293 }
0x2b01   : > { %v10053_v22 = vadd.f32 %v3294_v1, %v3286_v21 }
0x2b03   : > { %8915 = vtanh.f32 %v10053_v22 }
0x2b08   : > { %v3581_v25 = vpop.permute.xlu1 %3580 }
0x2b09   : > { %v10057_v26 = vadd.f32 %v3581_v25, %v3573_v24  ;;  %v3347_v25 = vlaneseq }
0x2b0b   : > { %8917 = vtanh.f32 %v10057_v26  ;;  %v10164_v27 = vand.u32 127, %v3347_v25 }
0x2b0d   : > { %v8916_v33 = vpop.eup %8915 }
0x2b0e   : > { %3299 = vrot.lane.b32.xlu0 %v8916_v33, %s9239_s27 }
0x2b15   : > { %v8918_v35 = vpop.eup %8917 }
0x2b16   : > { %3586 = vrot.lane.b32.xlu1 %v8918_v35, %s9239_s27 }
0x2b80   : > { %v3300_v3 = vpop.permute.xlu0 %3299 }
0x2b81   : > { %v3302_v44 = vmul.f32 %v3300_v3, %v3284_v11  ;;  %v10121_v11 = vpack.c.bf16 %v3338_v10, %v3337_v8 }
0x2b83   : > { %3591 = vrot.lane.b32.xlu0 %v3302_v44, %s9240_s23 }
0x2b88   : > { %v3587_v46 = vpop.permute.xlu1 %3586 }
0x2b89   : > { %v3589_v47 = vmul.f32 %v3587_v46, %v3571_v14  ;;  %v10158_v14 = vld [vmem:[%s10155_s0] ss:$0 sm:$0xff] }
0x2b8b   : > { %3666 = vrot.lane.b32.xlu1 %v3589_v47, %s9240_s23 }
0x2bf5   : > { %v3592_v48 = vpop.permute.xlu0 %3591 }
0x2bf6   : > { %7963 = vmatmul.mubr.msk.f32.vlgmr.msra.gmra.mrb[30].mxu0 %vm941_vm0, %v3592_v48 }
0x2bf7   : > { %7984 = vmatprep.mubr.msk.f32.mxu0 %vm9237_vm1, %v9238_v20  ;;  %8544 = vmatpush3.bf16.msra.mxu0 %v10117_v9 }
0x2bf8   : > { %8545 = vmatprep.subr.bf16.mxu0 %v9236_v18 }
0x2bfb   : > { %8547 = vmatpush3.bf16.msra.mxu0 %v10121_v11 }
0x2bfc   : > { %8554 = vmatprep.subr.bf16.mxu0 %v9236_v18 }
0x2bfd   : > { %v3667_v49 = vpop.permute.xlu1 %3666 }
0x2bfe   : > { %7974 = vmatmul.mubr.msk.f32.vlgmr.msra.gmra.mrb[32].mxu1 %vm941_vm0, %v3667_v49 }
0x2bff   : > { %8550 = vmatpush3.bf16.msra.mxu1 %v9987_v32  ;;  %7995 = vmatprep.mubr.msk.f32.mxu1 %vm9237_vm1, %v9238_v20 }
0x2c00   : > { %8551 = vmatprep.subr.bf16.mxu1 %v9236_v18 }
0x2c03   : > { %8553 = vmatpush3.bf16.msra.mxu1 %v9991_v36 }
0x2c04   : > { %8560 = vmatprep.subr.bf16.mxu1 %v9236_v18 }
0x2cc9   : > { %v3661_v50 = vpop.f32.mrb[30].mxu0 }
0x2cca   : > { %v7964_v52 = vpop.f32.mrb[31].mxu0 }
0x2cd1   : > { %v3736_v51 = vpop.f32.mrb[32].mxu1 }
0x2cd2   : > { %v3737_v5 = vadd.f32 %v3736_v51, %v3661_v50  ;;  %v7975_v45 = vpop.f32.mrb[33].mxu1 }
0x2cd4   : > { %v3740_v57 = vadd.f32 %v10105_v53, %v3737_v5 }
0x2cd6   : > { %8919 = vtanh.f32 %v3740_v57  ;;  %v3741_v59 = vmul.f32 0.5, %v3740_v57 }
0x2cd8   : > { %8921 = vtanh.f32 %v3741_v59 }
0x2ce0   : > { %v8920_v58 = vpop.eup %8919 }
0x2ce1   : > { %3748 = vrot.lane.b32.xlu0 %v8920_v58, %s9239_s27 }
0x2ce2   : > { %v8922_v6 = vpop.eup %8921 }
0x2ce3   : > { %v3743_v60 = vmul.f32 0.5, %v8922_v6 }
0x2ce5   : > { %v3744_v61 = vadd.f32 0.5, %v3743_v60 }
0x2ce7   : > { %v3746_v2 = vmul.f32 %v3744_v61, %v10053_v22 }
0x2d53   : > { %v3749_v63 = vpop.permute.xlu0 %3748 }
0x2d54   : > { %v3751_v0 = vmul.f32 %v3749_v63, %v3744_v61 }
0x2d56   : > { %3753 = vrot.lane.b32.xlu1 %v3751_v0, %s9240_s23 }
0x2dc8   : > { %v3754_v4 = vpop.permute.xlu1 %3753 }
0x2dc9   : > { %v10111_v7 = vadd.f32 %v3754_v4, %v3746_v2 }
0x2dcb   : > { %8923 = vtanh.f32 %v10111_v7 }
0x2dd5   : > { %v8924_v19 = vpop.eup %8923 }
0x2dd6   : > { %3759 = vrot.lane.b32.xlu0 %v8924_v19, %s9239_s27 }
0x2e48   : > { %v3760_v28 = vpop.permute.xlu0 %3759 }
0x2e49   : > { %v3762_v12 = vmul.f32 %v3760_v28, %v3744_v61 }
0x2e4b   : > { %3764 = vrot.lane.b32.xlu1 %v3762_v12, %s9240_s23 }
0x2ebd   : > { %v3765_v15 = vpop.permute.xlu1 %3764 }
0x2ebe   : > { %7985 = vmatmul.mubr.msk.f32.vlgmr.msra.gmra.mrb[32].mxu0 %vm941_vm0, %v3765_v15 }
0x2ebf   : > { %8556 = vmatpush3.bf16.msra.mxu0 %v10021_v54  ;;  %8006 = vmatprep.mubr.msk.f32.mxu0 %vm9237_vm1, %v9238_v20 }
0x2ec0   : > { %8557 = vmatprep.subr.bf16.mxu0 %v9236_v18 }
0x2ec3   : > { %8559 = vmatpush3.bf16.msra.mxu0 %v10027_v56 }
0x2ec4   : > { %8569 = vmatprep.subr.bf16.mxu0 %v9236_v18 }
0x2ec6   : > { %8007 = vmatmul.mubr.msk.f32.vlgmr.msra.gmra.mrb[34].mxu0 %vm941_vm0, %v3667_v49 }
0x2ec7   : > { %8571 = vmatpush3.bf16.msra.mxu0 %v10076_v39  ;;  %8035 = vmatprep.mubr.msk.f32.mxu0 %vm9237_vm1, %v9238_v20 }
0x2ec8   : > { %8572 = vmatprep.subr.bf16.mxu0 %v9236_v18 }
0x2ecb   : > { %8574 = vmatpush3.bf16.msra.mxu0 %v10081_v41 }
0x2ecc   : > { %8581 = vmatprep.subr.bf16.mxu0 %v9236_v18 }
0x2f91   : > { %v3834_v16 = vpop.f32.mrb[32].mxu0 }
0x2f92   : > { %v3835_v17 = vadd.f32 %v10158_v14, %v3834_v16  ;;  %v7986_v21 = vpop.f32.mrb[33].mxu0 }
0x2f94   : > { %7244 = vst.msk [vmem:[%s10131_s6 + $0x4] sm:$0xf] %vm3349_vm3, %v3835_v17  ;;  %v3840_v1 = vsel %vm3349_vm3, %v3835_v17, -inf }
0x2f95   : > { %3841 = vmax.xlane.f32.xlu0 %v3840_v1 }
0x2f99   : > { %v4002_v22 = vpop.f32.mrb[34].mxu0 }
0x2f9a   : > { %v8008_v24 = vpop.f32.mrb[35].mxu0 }
0x3022   : > { %v3842_v29 = vpop.xlane.xlu0 %3841 }
0x3023   : > { %vm3843_vm4 = vcmp.eq.f32.partialorder %v3835_v17, %v3842_v29 }
0x3024   : > { %v3844_v30 = vsel %vm3843_vm4, %v10164_v27, 32 }
0x3025   : > { %v3845_v31 = vsel %vm3349_vm3, %v3844_v30, 2147483647 }
0x3026   : > { %v3847_v33 = vshra.s32 %v3845_v31, 16  ;;  %v3846_v37 = vand.u32 65535, %v3845_v31 }
0x3028   : > { %v3849_v35 = vcvt.s32.f32 %v3847_v33  ;;  %v3848_v40 = vcvt.s32.f32 %v3846_v37 }
0x302a   : > { %3850 = vmin.xlane.f32.xlu1 %v3849_v35 }
0x30b7   : > { %v3851_v38 = vpop.xlane.xlu1 %3850 }
0x30b8   : > { %vm3852_vm5 = vcmp.eq.f32.partialorder %v3849_v35, %v3851_v38  ;;  %v3857_v3 = vcvt.f32.s32 %v3851_v38 }
0x30b9   : > { %v3853_v42 = vsel %vm3852_vm5, %v3848_v40, inf }
0x30ba   : > { %3854 = vmin.xlane.f32.xlu0 %v3853_v42  ;;  %v3858_v46 = vshll.u32 %v3857_v3, 16 }
0x3147   : > { %v3855_v44 = vpop.xlane.xlu0 %3854 }
0x3148   : > { %v3856_v47 = vcvt.f32.s32 %v3855_v44 }
0x314a   : > { %v3859_v48 = vadd.s32 %v3858_v46, %v3856_v47 }
0x314c   : > { %vm3860_vm6 = vcmp.eq.s32.totalorder %v10164_v27, %v3859_v48 }
0x314d   : > { %v7245_v49 = vsel %vm3860_vm6, 1.0, %v9238_v20 }
0x314e   : > { %7996 = vmatmul.mubr.msk.f32.vlgmr.msra.gmra.mrb[34].mxu1 %vm941_vm0, %v7245_v49 }
0x314f   : > { %8562 = vmatpush3.bf16.msra.mxu1 %v10011_v43  ;;  %8013 = vmatprep.mubr.msk.f32.mxu1 %vm9237_vm1, %v9238_v20 }
0x3150   : > { %8563 = vmatprep.subr.bf16.mxu1 %v9236_v18 }
0x3221   : > { %v3932_v50 = vpop.f32.mrb[34].mxu1 }
0x3222   : > { %v7997_v52 = vpop.f32.mrb[35].mxu1  ;;  %8014 = vmatmul.mubr.msk.f32.vlgmr.msra.gmra.mrb[36].mxu1 %vm1048_vm2, %v3932_v50 }
0x3223   : > { %8565 = vmatpush3.bf16.msra.mxu1 %v10063_v13  ;;  %8024 = vmatprep.mubr.msk.f32.mxu1 %vm9237_vm1, %v9238_v20 }
0x3224   : > { %8566 = vmatprep.subr.bf16.mxu1 %v9236_v18 }
0x3227   : > { %8568 = vmatpush3.bf16.msra.mxu1 %v10068_v34 }
0x3228   : > { %8575 = vmatprep.subr.bf16.mxu1 %v9236_v18 }
0x322a   : > { %8025 = vmatmul.mubr.msk.f32.vlgmr.msra.gmra.mrb[38].mxu1 %vm941_vm0, %v3765_v15 }
0x322b   : > { %8577 = vmatpush3.bf16.msra.mxu1 %v10117_v9  ;;  %8046 = vmatprep.mubr.msk.f32.mxu1 %vm9237_vm1, %v9238_v20 }
0x322c   : > { %8578 = vmatprep.subr.bf16.mxu1 %v9236_v18 }
0x322f   : > { %8580 = vmatpush3.bf16.msra.mxu1 %v10121_v11 }
0x3230   : > { %8587 = vmatprep.subr.bf16.mxu1 %v9236_v18 }
0x32f5   : > { %v4075_v51 = vpop.f32.mrb[36].mxu1 }
0x32f6   : > { %v4076_v5 = vadd.f32 %v4075_v51, %v4002_v22  ;;  %v8015_v45 = vpop.f32.mrb[37].mxu1 }
0x32f8   : > { %v4079_v57 = vadd.f32 %v10045_v62, %v4076_v5 }
0x32fa   : > { %8925 = vtanh.f32 %v4079_v57  ;;  %v4080_v60 = vmul.f32 0.5, %v4079_v57 }
0x32fc   : > { %8927 = vtanh.f32 %v4080_v60 }
0x32fd   : > { %v4168_v58 = vpop.f32.mrb[38].mxu1 }
0x32fe   : > { %v8026_v59 = vpop.f32.mrb[39].mxu1 }
0x3304   : > { %v8926_v6 = vpop.eup %8925 }
0x3305   : > { %4087 = vrot.lane.b32.xlu0 %v8926_v6, %s9239_s27 }
0x3306   : > { %v8928_v61 = vpop.eup %8927 }
0x3307   : > { %v4082_v63 = vmul.f32 0.5, %v8928_v61 }
0x3309   : > { %v4083_v0 = vadd.f32 0.5, %v4082_v63 }
0x330b   : > { %v4085_v23 = vmul.f32 %v4083_v0, %v10057_v26 }
0x3377   : > { %v4088_v2 = vpop.permute.xlu0 %4087 }
0x3378   : > { %v4090_v4 = vmul.f32 %v4088_v2, %v4083_v0 }
0x337a   : > { %4092 = vrot.lane.b32.xlu1 %v4090_v4, %s9240_s23 }
0x33ec   : > { %v4093_v55 = vpop.permute.xlu1 %4092 }
0x33ed   : > { %v10193_v8 = vadd.f32 %v4093_v55, %v4085_v23 }
0x33ef   : > { %8929 = vtanh.f32 %v10193_v8 }
0x33f9   : > { %v8930_v10 = vpop.eup %8929 }
0x33fa   : > { %4098 = vrot.lane.b32.xlu1 %v8930_v10, %s9239_s27 }
0x346c   : > { %v4099_v19 = vpop.permute.xlu1 %4098 }
0x346d   : > { %v4101_v28 = vmul.f32 %v4099_v19, %v4083_v0 }
0x346f   : > { %4173 = vrot.lane.b32.xlu0 %v4101_v28, %s9240_s23 }
0x34e1   : > { %v4174_v12 = vpop.permute.xlu0 %4173 }
0x34e2   : > { %8036 = vmatmul.mubr.msk.f32.vlgmr.msra.gmra.mrb[36].mxu0 %vm941_vm0, %v4174_v12 }
0x34e3   : > { %8583 = vmatpush3.bf16.msra.mxu0 %v9987_v32  ;;  %8057 = vmatprep.mubr.msk.f32.mxu0 %vm9237_vm1, %v9238_v20 }
0x34e4   : > { %8584 = vmatprep.subr.bf16.mxu0 %v9236_v18 }
0x34e7   : > { %8586 = vmatpush3.bf16.msra.mxu0 %v9991_v36 }
0x34e8   : > { %8596 = vmatprep.subr.bf16.mxu0 %v9236_v18 }
0x35b5   : > { %v4243_v26 = vpop.f32.mrb[36].mxu0 }
0x35b6   : > { %v4244_v15 = vadd.f32 %v4243_v26, %v4168_v58  ;;  %v8037_v16 = vpop.f32.mrb[37].mxu0 }
0x35b8   : > { %v4247_v17 = vadd.f32 %v10105_v53, %v4244_v15 }
0x35ba   : > { %8931 = vtanh.f32 %v4247_v17  ;;  %v4248_v1 = vmul.f32 0.5, %v4247_v17 }
0x35bc   : > { %8933 = vtanh.f32 %v4248_v1 }
0x35c4   : > { %v8932_v21 = vpop.eup %8931 }
0x35c5   : > { %4255 = vrot.lane.b32.xlu1 %v8932_v21, %s9239_s27 }
0x35c6   : > { %v8934_v22 = vpop.eup %8933 }
0x35c7   : > { %v4250_v24 = vmul.f32 0.5, %v8934_v22 }
0x35c9   : > { %v4251_v25 = vadd.f32 0.5, %v4250_v24 }
0x35cb   : > { %v4253_v31 = vmul.f32 %v4251_v25, %v10111_v7 }
0x3637   : > { %v4256_v29 = vpop.permute.xlu1 %4255 }
0x3638   : > { %v4258_v30 = vmul.f32 %v4256_v29, %v4251_v25 }
0x363a   : > { %4260 = vrot.lane.b32.xlu0 %v4258_v30, %s9240_s23 }
0x36ac   : > { %v4261_v33 = vpop.permute.xlu0 %4260 }
0x36ad   : > { %v10209_v35 = vadd.f32 %v4261_v33, %v4253_v31 }
0x36af   : > { %8935 = vtanh.f32 %v10209_v35 }
0x36b9   : > { %v8936_v37 = vpop.eup %8935 }
0x36ba   : > { %4266 = vrot.lane.b32.xlu1 %v8936_v37, %s9239_s27 }
0x372c   : > { %v4267_v38 = vpop.permute.xlu1 %4266 }
0x372d   : > { %v4269_v40 = vmul.f32 %v4267_v38, %v4251_v25 }
0x372f   : > { %4271 = vrot.lane.b32.xlu0 %v4269_v40, %s9240_s23 }
0x37a1   : > { %v4272_v42 = vpop.permute.xlu0 %4271 }
0x37a2   : > { %8047 = vmatmul.mubr.msk.f32.vlgmr.msra.gmra.mrb[40].mxu1 %vm941_vm0, %v4272_v42 }
0x37a3   : > { %8589 = vmatpush3.bf16.msra.mxu1 %v10021_v54  ;;  %8068 = vmatprep.mubr.msk.f32.mxu1 %vm9237_vm1, %v9238_v20 }
0x37a4   : > { %8590 = vmatprep.subr.bf16.mxu1 %v9236_v18 }
0x37a7   : > { %8592 = vmatpush3.bf16.msra.mxu1 %v10027_v56 }
0x37a8   : > { %8593 = vmatprep.subr.bf16.mxu1 %v9236_v18 }
0x37aa   : > { %8069 = vmatmul.mubr.msk.f32.vlgmr.msra.gmra.mrb[42].mxu1 %vm941_vm0, %v4174_v12 }
0x37ab   : > { %8595 = vmatpush3.bf16.msra.mxu1 %v10011_v43  ;;  %8075 = vmatprep.mubr.msk.f32.mxu1 %vm9237_vm1, %v9238_v20 }
0x37ac   : > { %8602 = vmatprep.subr.bf16.mxu1 %v9236_v18 }
0x3875   : > { %v4341_v7 = vpop.f32.mrb[40].mxu1 }
0x3876   : > { %v4342_v3 = vadd.f32 %v10158_v14, %v4341_v7  ;;  %v8048_v44 = vpop.f32.mrb[41].mxu1 }
0x3878   : > { %7252 = vst.msk [vmem:[%s10131_s6 + $0x8] sm:$0xf] %vm3349_vm3, %v4342_v3  ;;  %v4347_v46 = vsel %vm3349_vm3, %v4342_v3, -inf }
0x3879   : > { %4348 = vmax.xlane.f32.xlu1 %v4347_v46 }
0x387d   : > { %v4509_v47 = vpop.f32.mrb[42].mxu1 }
0x387e   : > { %v8070_v48 = vpop.f32.mrb[43].mxu1 }
0x3906   : > { %v4349_v49 = vpop.xlane.xlu1 %4348 }
0x3907   : > { %vm4350_vm7 = vcmp.eq.f32.partialorder %v4342_v3, %v4349_v49 }
0x3908   : > { %v4351_v50 = vsel %vm4350_vm7, %v10164_v27, 32 }
0x3909   : > { %v4352_v52 = vsel %vm3349_vm3, %v4351_v50, 2147483647 }
0x390a   : > { %v4354_v51 = vshra.s32 %v4352_v52, 16  ;;  %v4353_v45 = vand.u32 65535, %v4352_v52 }
0x390c   : > { %v4356_v5 = vcvt.s32.f32 %v4354_v51  ;;  %v4355_v58 = vcvt.s32.f32 %v4353_v45 }
0x390e   : > { %4357 = vmin.xlane.f32.xlu0 %v4356_v5 }
0x399b   : > { %v4358_v57 = vpop.xlane.xlu0 %4357 }
0x399c   : > { %vm4359_vm8 = vcmp.eq.f32.partialorder %v4356_v5, %v4358_v57  ;;  %v4364_v6 = vcvt.f32.s32 %v4358_v57 }
0x399d   : > { %v4360_v59 = vsel %vm4359_vm8, %v4355_v58, inf }
0x399e   : > { %4361 = vmin.xlane.f32.xlu0 %v4360_v59  ;;  %v4365_v61 = vshll.u32 %v4364_v6, 16 }
0x3a2b   : > { %v4362_v60 = vpop.xlane.xlu0 %4361 }
0x3a2c   : > { %v4363_v63 = vcvt.f32.s32 %v4362_v60 }
0x3a2e   : > { %v4366_v0 = vadd.s32 %v4365_v61, %v4363_v63 }
0x3a30   : > { %vm4367_vm9 = vcmp.eq.s32.totalorder %v10164_v27, %v4366_v0 }
0x3a31   : > { %v7253_v2 = vsel %vm4367_vm9, 1.0, %v9238_v20 }
0x3a32   : > { %8058 = vmatmul.mubr.msk.f32.vlgmr.msra.gmra.mrb[38].mxu0 %vm941_vm0, %v7253_v2 }
0x3a33   : > { %8598 = vmatpush3.bf16.msra.mxu0 %v10063_v13  ;;  %8086 = vmatprep.mubr.msk.f32.mxu0 %vm9237_vm1, %v9238_v20 }
0x3a34   : > { %8599 = vmatprep.subr.bf16.mxu0 %v9236_v18 }
0x3a37   : > { %8601 = vmatpush3.bf16.msra.mxu0 %v10068_v34 }
0x3a38   : > { %8608 = vmatprep.subr.bf16.mxu0 %v9236_v18 }
0x3a3a   : > { %8087 = vmatmul.mubr.msk.f32.vlgmr.msra.gmra.mrb[40].mxu0 %vm941_vm0, %v4272_v42 }
0x3a3b   : > { %8610 = vmatpush3.bf16.msra.mxu0 %v10117_v9  ;;  %8108 = vmatprep.mubr.msk.f32.mxu0 %vm9237_vm1, %v9238_v20 }
0x3a3c   : > { %8611 = vmatprep.subr.bf16.mxu0 %v9236_v18 }
0x3a3f   : > { %8613 = vmatpush3.bf16.msra.mxu0 %v10121_v11 }
0x3a40   : > { %8620 = vmatprep.subr.bf16.mxu0 %v9236_v18 }
0x3b05   : > { %v4439_v4 = vpop.f32.mrb[38].mxu0 }
0x3b06   : > { %v8059_v23 = vpop.f32.mrb[39].mxu0  ;;  %8076 = vmatmul.mubr.msk.f32.vlgmr.msra.gmra.mrb[44].mxu1 %vm1048_vm2, %v4439_v4 }
0x3b07   : > { %8604 = vmatpush3.bf16.msra.mxu1 %v10076_v39  ;;  %8097 = vmatprep.mubr.msk.f32.mxu1 %vm9237_vm1, %v9238_v20 }
0x3b08   : > { %8605 = vmatprep.subr.bf16.mxu1 %v9236_v18 }
0x3b0b   : > { %8607 = vmatpush3.bf16.msra.mxu1 %v10081_v41 }
0x3b0c   : > { %8614 = vmatprep.subr.bf16.mxu1 %v9236_v18 }
0x3b0d   : > { %v4675_v55 = vpop.f32.mrb[40].mxu0 }
0x3b0e   : > { %v8088_v10 = vpop.f32.mrb[41].mxu0 }
0x3bd9   : > { %v4582_v19 = vpop.f32.mrb[44].mxu1 }
0x3bda   : > { %v4583_v28 = vadd.f32 %v4582_v19, %v4509_v47  ;;  %v8077_v12 = vpop.f32.mrb[45].mxu1 }
0x3bdc   : > { %v4586_v26 = vadd.f32 %v10045_v62, %v4583_v28 }
0x3bde   : > { %8937 = vtanh.f32 %v4586_v26  ;;  %v4587_v16 = vmul.f32 0.5, %v4586_v26 }
0x3be0   : > { %8939 = vtanh.f32 %v4587_v16 }
0x3be8   : > { %v8938_v15 = vpop.eup %8937 }
0x3be9   : > { %4594 = vrot.lane.b32.xlu1 %v8938_v15, %s9239_s27 }
0x3bea   : > { %v8940_v17 = vpop.eup %8939 }
0x3beb   : > { %v4589_v21 = vmul.f32 0.5, %v8940_v17 }
0x3bed   : > { %v4590_v1 = vadd.f32 0.5, %v4589_v21 }
0x3bef   : > { %v4592_v25 = vmul.f32 %v4590_v1, %v10193_v8 }
0x3c5b   : > { %v4595_v22 = vpop.permute.xlu1 %4594 }
0x3c5c   : > { %v4597_v24 = vmul.f32 %v4595_v22, %v4590_v1 }
0x3c5e   : > { %4599 = vrot.lane.b32.xlu0 %v4597_v24, %s9240_s23 }
0x3cd0   : > { %v4600_v29 = vpop.permute.xlu0 %4599 }
0x3cd1   : > { %v10259_v30 = vadd.f32 %v4600_v29, %v4592_v25 }
0x3cd3   : > { %8941 = vtanh.f32 %v10259_v30 }
0x3cdd   : > { %v8942_v31 = vpop.eup %8941 }
0x3cde   : > { %4605 = vrot.lane.b32.xlu1 %v8942_v31, %s9239_s27 }
0x3d50   : > { %v4606_v33 = vpop.permute.xlu1 %4605 }
0x3d51   : > { %v4608_v37 = vmul.f32 %v4606_v33, %v4590_v1 }
0x3d53   : > { %4680 = vrot.lane.b32.xlu1 %v4608_v37, %s9240_s23 }
0x3dc5   : > { %v4681_v38 = vpop.permute.xlu1 %4680 }
0x3dc6   : > { %8098 = vmatmul.mubr.msk.f32.vlgmr.msra.gmra.mrb[46].mxu1 %vm941_vm0, %v4681_v38 }
0x3dc7   : > { %8616 = vmatpush3.bf16.msra.mxu1 %v9987_v32  ;;  %8119 = vmatprep.mubr.msk.f32.mxu1 %vm9237_vm1, %v9238_v20 }
0x3dc8   : > { %8617 = vmatprep.subr.bf16.mxu1 %v9236_v18 }
0x3dcb   : > { %8619 = vmatpush3.bf16.msra.mxu1 %v9991_v36 }
0x3dcc   : > { %8626 = vmatprep.subr.bf16.mxu1 %v9236_v18 }
0x3e99   : > { %v4750_v8 = vpop.f32.mrb[46].mxu1 }
0x3e9a   : > { %v4751_v40 = vadd.f32 %v4750_v8, %v4675_v55  ;;  %v8099_v42 = vpop.f32.mrb[47].mxu1 }
0x3e9c   : > { %v4754_v7 = vadd.f32 %v10105_v53, %v4751_v40 }
0x3e9e   : > { %8943 = vtanh.f32 %v4754_v7  ;;  %v4755_v44 = vmul.f32 0.5, %v4754_v7 }
0x3ea0   : > { %8945 = vtanh.f32 %v4755_v44 }
0x3ea8   : > { %v8944_v3 = vpop.eup %8943 }
0x3ea9   : > { %4762 = vrot.lane.b32.xlu0 %v8944_v3, %s9239_s27 }
0x3eaa   : > { %v8946_v46 = vpop.eup %8945 }
0x3eab   : > { %v4757_v47 = vmul.f32 0.5, %v8946_v46 }
0x3ead   : > { %v4758_v48 = vadd.f32 0.5, %v4757_v47 }
0x3eaf   : > { %v4760_v52 = vmul.f32 %v4758_v48, %v10209_v35 }
0x3f1b   : > { %v4763_v49 = vpop.permute.xlu0 %4762 }
0x3f1c   : > { %v4765_v50 = vmul.f32 %v4763_v49, %v4758_v48 }
0x3f1e   : > { %4767 = vrot.lane.b32.xlu1 %v4765_v50, %s9240_s23 }
0x3f90   : > { %v4768_v51 = vpop.permute.xlu1 %4767 }
0x3f91   : > { %v10275_v5 = vadd.f32 %v4768_v51, %v4760_v52 }
0x3f93   : > { %8947 = vtanh.f32 %v10275_v5 }
0x3f9d   : > { %v8948_v45 = vpop.eup %8947 }
0x3f9e   : > { %4773 = vrot.lane.b32.xlu0 %v8948_v45, %s9239_s27 }
0x4010   : > { %v4774_v57 = vpop.permute.xlu0 %4773 }
0x4011   : > { %v4776_v58 = vmul.f32 %v4774_v57, %v4758_v48 }
0x4013   : > { %4778 = vrot.lane.b32.xlu1 %v4776_v58, %s9240_s23 }
0x4085   : > { %v4779_v59 = vpop.permute.xlu1 %4778 }
0x4086   : > { %8109 = vmatmul.mubr.msk.f32.vlgmr.msra.gmra.mrb[42].mxu0 %vm941_vm0, %v4779_v59 }
0x4087   : > { %8622 = vmatpush3.bf16.msra.mxu0 %v10021_v54  ;;  %8130 = vmatprep.mubr.msk.f32.mxu0 %vm9237_vm1, %v9238_v20 }
0x4088   : > { %8623 = vmatprep.subr.bf16.mxu0 %v9236_v18 }
0x408b   : > { %8625 = vmatpush3.bf16.msra.mxu0 %v10027_v56 }
0x408c   : > { %8635 = vmatprep.subr.bf16.mxu0 %v9236_v18 }
0x408e   : > { %8131 = vmatmul.mubr.msk.f32.vlgmr.msra.gmra.mrb[44].mxu0 %vm941_vm0, %v4681_v38 }
0x408f   : > { %8637 = vmatpush3.bf16.msra.mxu0 %v10076_v39  ;;  %8159 = vmatprep.mubr.msk.f32.mxu0 %vm9237_vm1, %v9238_v20 }
0x4090   : > { %8638 = vmatprep.subr.bf16.mxu0 %v9236_v18 }
0x4093   : > { %8640 = vmatpush3.bf16.msra.mxu0 %v10081_v41 }
0x4094   : > { %8647 = vmatprep.subr.bf16.mxu0 %v9236_v18 }
0x4159   : > { %v4848_v35 = vpop.f32.mrb[42].mxu0 }
0x415a   : > { %v4849_v6 = vadd.f32 %v10158_v14, %v4848_v35  ;;  %v8110_v60 = vpop.f32.mrb[43].mxu0 }
0x415c   : > { %7260 = vst.msk [vmem:[%s10131_s6 + $0xc] sm:$0xf] %vm3349_vm3, %v4849_v6  ;;  %v4854_v61 = vsel %vm3349_vm3, %v4849_v6, -inf }
0x415d   : > { %4855 = vmax.xlane.f32.xlu0 %v4854_v61 }
0x4161   : > { %v5016_v63 = vpop.f32.mrb[44].mxu0 }
0x4162   : > { %v8132_v0 = vpop.f32.mrb[45].mxu0 }
0x41ea   : > { %v4856_v2 = vpop.xlane.xlu0 %4855 }
0x41eb   : > { %vm4857_vm10 = vcmp.eq.f32.partialorder %v4849_v6, %v4856_v2 }
0x41ec   : > { %v4858_v4 = vsel %vm4857_vm10, %v10164_v27, 32 }
0x41ed   : > { %v4859_v23 = vsel %vm3349_vm3, %v4858_v4, 2147483647 }
0x41ee   : > { %v4861_v55 = vshra.s32 %v4859_v23, 16  ;;  %v4860_v19 = vand.u32 65535, %v4859_v23 }
0x41f0   : > { %v4863_v10 = vcvt.s32.f32 %v4861_v55  ;;  %v4862_v12 = vcvt.s32.f32 %v4860_v19 }
0x41f2   : > { %4864 = vmin.xlane.f32.xlu1 %v4863_v10 }
0x427f   : > { %v4865_v28 = vpop.xlane.xlu1 %4864 }
0x4280   : > { %vm4866_vm11 = vcmp.eq.f32.partialorder %v4863_v10, %v4865_v28  ;;  %v4871_v15 = vcvt.f32.s32 %v4865_v28 }
0x4281   : > { %v4867_v26 = vsel %vm4866_vm11, %v4862_v12, inf }
0x4282   : > { %4868 = vmin.xlane.f32.xlu0 %v4867_v26  ;;  %v4872_v17 = vshll.u32 %v4871_v15, 16 }
0x430f   : > { %v4869_v16 = vpop.xlane.xlu0 %4868 }
0x4310   : > { %v4870_v21 = vcvt.f32.s32 %v4869_v16 }
0x4312   : > { %v4873_v1 = vadd.s32 %v4872_v17, %v4870_v21 }
0x4314   : > { %vm4874_vm12 = vcmp.eq.s32.totalorder %v10164_v27, %v4873_v1 }
0x4315   : > { %v7261_v22 = vsel %vm4874_vm12, 1.0, %v9238_v20 }
0x4316   : > { %8120 = vmatmul.mubr.msk.f32.vlgmr.msra.gmra.mrb[48].mxu1 %vm941_vm0, %v7261_v22 }
0x4317   : > { %8628 = vmatpush3.bf16.msra.mxu1 %v10011_v43  ;;  %8137 = vmatprep.mubr.msk.f32.mxu1 %vm9237_vm1, %v9238_v20 }
0x4318   : > { %8629 = vmatprep.subr.bf16.mxu1 %v9236_v18 }
0x43e9   : > { %v4946_v24 = vpop.f32.mrb[48].mxu1 }
0x43ea   : > { %v8121_v25 = vpop.f32.mrb[49].mxu1  ;;  %8138 = vmatmul.mubr.msk.f32.vlgmr.msra.gmra.mrb[50].mxu1 %vm1048_vm2, %v4946_v24 }
0x43eb   : > { %8631 = vmatpush3.bf16.msra.mxu1 %v10063_v13  ;;  %8148 = vmatprep.mubr.msk.f32.mxu1 %vm9237_vm1, %v9238_v20 }
0x43ec   : > { %8632 = vmatprep.subr.bf16.mxu1 %v9236_v18 }
0x43ef   : > { %8634 = vmatpush3.bf16.msra.mxu1 %v10068_v34 }
0x43f0   : > { %8641 = vmatprep.subr.bf16.mxu1 %v9236_v18 }
0x43f2   : > { %8149 = vmatmul.mubr.msk.f32.vlgmr.msra.gmra.mrb[52].mxu1 %vm941_vm0, %v4779_v59 }
0x43f3   : > { %8643 = vmatpush3.bf16.msra.mxu1 %v10117_v9  ;;  %8170 = vmatprep.mubr.msk.f32.mxu1 %vm9237_vm1, %v9238_v20 }
0x43f4   : > { %8644 = vmatprep.subr.bf16.mxu1 %v9236_v18 }
0x43f7   : > { %8646 = vmatpush3.bf16.msra.mxu1 %v10121_v11 }
0x43f8   : > { %8653 = vmatprep.subr.bf16.mxu1 %v9236_v18 }
0x44bd   : > { %v5089_v29 = vpop.f32.mrb[50].mxu1 }
0x44be   : > { %v5090_v31 = vadd.f32 %v5089_v29, %v5016_v63  ;;  %v8139_v33 = vpop.f32.mrb[51].mxu1 }
0x44c0   : > { %v5093_v37 = vadd.f32 %v10045_v62, %v5090_v31 }
0x44c2   : > { %8949 = vtanh.f32 %v5093_v37  ;;  %v5094_v42 = vmul.f32 0.5, %v5093_v37 }
0x44c4   : > { %8951 = vtanh.f32 %v5094_v42 }
0x44c5   : > { %v5182_v38 = vpop.f32.mrb[52].mxu1 }
0x44c6   : > { %v8150_v8 = vpop.f32.mrb[53].mxu1 }
0x44cc   : > { %v8950_v40 = vpop.eup %8949 }
0x44cd   : > { %5101 = vrot.lane.b32.xlu0 %v8950_v40, %s9239_s27 }
0x44ce   : > { %v8952_v7 = vpop.eup %8951 }
0x44cf   : > { %v5096_v3 = vmul.f32 0.5, %v8952_v7 }
0x44d1   : > { %v5097_v44 = vadd.f32 0.5, %v5096_v3 }
0x44d3   : > { %v5099_v48 = vmul.f32 %v5097_v44, %v10259_v30 }
0x453f   : > { %v5102_v46 = vpop.permute.xlu0 %5101 }
0x4540   : > { %v5104_v47 = vmul.f32 %v5102_v46, %v5097_v44 }
0x4542   : > { %5106 = vrot.lane.b32.xlu1 %v5104_v47, %s9240_s23 }
0x45b4   : > { %v5107_v49 = vpop.permute.xlu1 %5106 }
0x45b5   : > { %v10325_v50 = vadd.f32 %v5107_v49, %v5099_v48 }
0x45b7   : > { %8953 = vtanh.f32 %v10325_v50 }
0x45c1   : > { %v8954_v62 = vpop.eup %8953 }
0x45c2   : > { %5112 = vrot.lane.b32.xlu1 %v8954_v62, %s9239_s27 }
0x4634   : > { %v5113_v52 = vpop.permute.xlu1 %5112 }
0x4635   : > { %v5115_v51 = vmul.f32 %v5113_v52, %v5097_v44  ;;  %v10388_v52 = vld [vmem:[%s10042_s7] ss:$0 sm:$0xff] }
0x4637   : > { %5187 = vrot.lane.b32.xlu0 %v5115_v51, %s9240_s23 }
0x46a9   : > { %v5188_v45 = vpop.permute.xlu0 %5187 }
0x46aa   : > { %8160 = vmatmul.mubr.msk.f32.vlgmr.msra.gmra.mrb[46].mxu0 %vm941_vm0, %v5188_v45 }
0x46ab   : > { %8649 = vmatpush3.bf16.msra.mxu0 %v9987_v32  ;;  %8181 = vmatprep.mubr.msk.f32.mxu0 %vm9237_vm1, %v9238_v20 }
0x46ac   : > { %8650 = vmatprep.subr.bf16.mxu0 %v9236_v18 }
0x46af   : > { %8652 = vmatpush3.bf16.msra.mxu0 %v9991_v36 }
0x46b0   : > { %8659 = vmatprep.subr.bf16.mxu0 %v9236_v18 }
0x477d   : > { %v5257_v30 = vpop.f32.mrb[46].mxu0 }
0x477e   : > { %v5258_v57 = vadd.f32 %v5257_v30, %v5182_v38  ;;  %v8161_v58 = vpop.f32.mrb[47].mxu0 }
0x4780   : > { %v5261_v59 = vadd.f32 %v10105_v53, %v5258_v57 }
0x4782   : > { %8955 = vtanh.f32 %v5261_v59  ;;  %v5262_v6 = vmul.f32 0.5, %v5261_v59 }
0x4784   : > { %8957 = vtanh.f32 %v5262_v6 }
0x478c   : > { %v8956_v35 = vpop.eup %8955 }
0x478d   : > { %5269 = vrot.lane.b32.xlu1 %v8956_v35, %s9239_s27 }
0x478e   : > { %v8958_v60 = vpop.eup %8957 }
0x478f   : > { %v5264_v61 = vmul.f32 0.5, %v8958_v60 }
0x4791   : > { %v5265_v63 = vadd.f32 0.5, %v5264_v61 }
0x4793   : > { %v5267_v4 = vmul.f32 %v5265_v63, %v10275_v5 }
0x47ff   : > { %v5270_v0 = vpop.permute.xlu1 %5269 }
0x4800   : > { %v5272_v2 = vmul.f32 %v5270_v0, %v5265_v63 }
0x4802   : > { %5274 = vrot.lane.b32.xlu0 %v5272_v2, %s9240_s23 }
0x4874   : > { %v5275_v23 = vpop.permute.xlu0 %5274 }
0x4875   : > { %v10341_v55 = vadd.f32 %v5275_v23, %v5267_v4 }
0x4877   : > { %8959 = vtanh.f32 %v10341_v55 }
0x4881   : > { %v8960_v10 = vpop.eup %8959 }
0x4882   : > { %5280 = vrot.lane.b32.xlu1 %v8960_v10, %s9239_s27 }
0x48f4   : > { %v5281_v19 = vpop.permute.xlu1 %5280 }
0x48f5   : > { %v5283_v28 = vmul.f32 %v5281_v19, %v5265_v63 }
0x48f7   : > { %5285 = vrot.lane.b32.xlu0 %v5283_v28, %s9240_s23 }
0x4969   : > { %v5286_v12 = vpop.permute.xlu0 %5285 }
0x496a   : > { %8171 = vmatmul.mubr.msk.f32.vlgmr.msra.gmra.mrb[54].mxu1 %vm941_vm0, %v5286_v12 }
0x496b   : > { %8655 = vmatpush3.bf16.msra.mxu1 %v10021_v54  ;;  %8192 = vmatprep.mubr.msk.f32.mxu1 %vm9237_vm1, %v9238_v20 }
0x496c   : > { %8656 = vmatprep.subr.bf16.mxu1 %v9236_v18 }
0x496f   : > { %8658 = vmatpush3.bf16.msra.mxu1 %v10027_v56 }
0x4970   : > { %8668 = vmatprep.subr.bf16.mxu1 %v9236_v18 }
0x4972   : > { %8193 = vmatmul.mubr.msk.f32.vlgmr.msra.gmra.mrb[56].mxu1 %vm941_vm0, %v5188_v45 }
0x4973   : > { %8670 = vmatpush3.bf16.msra.mxu1 %v10076_v39  ;;  %8221 = vmatprep.mubr.msk.f32.mxu1 %vm9237_vm1, %v9238_v20 }
0x4974   : > { %8671 = vmatprep.subr.bf16.mxu1 %v9236_v18 }
0x4977   : > { %8673 = vmatpush3.bf16.msra.mxu1 %v10081_v41 }
0x4978   : > { %8680 = vmatprep.subr.bf16.mxu1 %v9236_v18 }
0x4a3d   : > { %v5355_v5 = vpop.f32.mrb[54].mxu1 }
0x4a3e   : > { %v5356_v26 = vadd.f32 %v10158_v14, %v5355_v5  ;;  %v8172_v15 = vpop.f32.mrb[55].mxu1 }
0x4a40   : > { %7268 = vst.msk [vmem:[%s10131_s6 + $0x10] sm:$0xf] %vm3349_vm3, %v5356_v26  ;;  %v5361_v16 = vsel %vm3349_vm3, %v5356_v26, -inf }
0x4a41   : > { %5362 = vmax.xlane.f32.xlu1 %v5361_v16 }
0x4a45   : > { %v5523_v17 = vpop.f32.mrb[56].mxu1 }
0x4a46   : > { %v8194_v21 = vpop.f32.mrb[57].mxu1 }
0x4ace   : > { %v5363_v1 = vpop.xlane.xlu1 %5362 }
0x4acf   : > { %vm5364_vm13 = vcmp.eq.f32.partialorder %v5356_v26, %v5363_v1 }
0x4ad0   : > { %v5365_v22 = vsel %vm5364_vm13, %v10164_v27, 32 }
0x4ad1   : > { %v5366_v24 = vsel %vm3349_vm3, %v5365_v22, 2147483647 }
0x4ad2   : > { %v5368_v25 = vshra.s32 %v5366_v24, 16  ;;  %v5367_v31 = vand.u32 65535, %v5366_v24 }
0x4ad4   : > { %v5370_v29 = vcvt.s32.f32 %v5368_v25  ;;  %v5369_v37 = vcvt.s32.f32 %v5367_v31 }
0x4ad6   : > { %5371 = vmin.xlane.f32.xlu0 %v5370_v29 }
0x4b63   : > { %v5372_v33 = vpop.xlane.xlu0 %5371 }
0x4b64   : > { %vm5373_vm14 = vcmp.eq.f32.partialorder %v5370_v29, %v5372_v33  ;;  %v5378_v8 = vcvt.f32.s32 %v5372_v33 }
0x4b65   : > { %v5374_v38 = vsel %vm5373_vm14, %v5369_v37, inf }
0x4b66   : > { %5375 = vmin.xlane.f32.xlu0 %v5374_v38  ;;  %v5379_v42 = vshll.u32 %v5378_v8, 16 }
0x4bf3   : > { %v5376_v40 = vpop.xlane.xlu0 %5375 }
0x4bf4   : > { %v5377_v7 = vcvt.f32.s32 %v5376_v40 }
0x4bf6   : > { %v5380_v3 = vadd.s32 %v5379_v42, %v5377_v7 }
0x4bf8   : > { %vm5381_vm15 = vcmp.eq.s32.totalorder %v10164_v27, %v5380_v3 }
0x4bf9   : > { %v7269_v44 = vsel %vm5381_vm15, 1.0, %v9238_v20 }
0x4bfa   : > { %8182 = vmatmul.mubr.msk.f32.vlgmr.msra.gmra.mrb[48].mxu0 %vm941_vm0, %v7269_v44 }
0x4bfb   : > { %8661 = vmatpush3.bf16.msra.mxu0 %v10011_v43  ;;  %8199 = vmatprep.mubr.msk.f32.mxu0 %vm9237_vm1, %v9238_v20 }
0x4bfc   : > { %8662 = vmatprep.subr.bf16.mxu0 %v9236_v18 }
0x4ccd   : > { %v5453_v46 = vpop.f32.mrb[48].mxu0 }
0x4cce   : > { %v8183_v47 = vpop.f32.mrb[49].mxu0  ;;  %8200 = vmatmul.mubr.msk.f32.vlgmr.msra.gmra.mrb[50].mxu0 %vm1048_vm2, %v5453_v46 }
0x4ccf   : > { %8664 = vmatpush3.bf16.msra.mxu0 %v10063_v13  ;;  %8210 = vmatprep.mubr.msk.f32.mxu0 %vm9237_vm1, %v9238_v20 }
0x4cd0   : > { %8665 = vmatprep.subr.bf16.mxu0 %v9236_v18 }
0x4cd3   : > { %8667 = vmatpush3.bf16.msra.mxu0 %v10068_v34 }
0x4cd4   : > { %8674 = vmatprep.subr.bf16.mxu0 %v9236_v18 }
0x4cd6   : > { %8211 = vmatmul.mubr.msk.f32.vlgmr.msra.gmra.mrb[52].mxu0 %vm941_vm0, %v5286_v12 }
0x4cd7   : > { %8676 = vmatpush3.bf16.msra.mxu0 %v10117_v9  ;;  %8232 = vmatprep.mubr.msk.f32.mxu0 %vm9237_vm1, %v9238_v20 }
0x4cd8   : > { %8677 = vmatprep.subr.bf16.mxu0 %v9236_v18 }
0x4cdb   : > { %8679 = vmatpush3.bf16.msra.mxu0 %v10121_v11 }
0x4cdc   : > { %8686 = vmatprep.subr.bf16.mxu0 %v9236_v18 }
0x4da1   : > { %v5596_v48 = vpop.f32.mrb[50].mxu0 }
0x4da2   : > { %v5597_v49 = vadd.f32 %v5596_v48, %v5523_v17  ;;  %v8201_v62 = vpop.f32.mrb[51].mxu0 }
0x4da4   : > { %v5600_v51 = vadd.f32 %v10388_v52, %v5597_v49 }
0x4da6   : > { %8961 = vtanh.f32 %v5600_v51  ;;  %v5601_v58 = vmul.f32 0.5, %v5600_v51 }
0x4da8   : > { %8963 = vtanh.f32 %v5601_v58 }
0x4da9   : > { %v5689_v45 = vpop.f32.mrb[52].mxu0 }
0x4daa   : > { %v8212_v30 = vpop.f32.mrb[53].mxu0 }
0x4db0   : > { %v8962_v57 = vpop.eup %8961 }
0x4db1   : > { %5608 = vrot.lane.b32.xlu1 %v8962_v57, %s9239_s27 }
0x4db2   : > { %v8964_v59 = vpop.eup %8963 }
0x4db3   : > { %v5603_v35 = vmul.f32 0.5, %v8964_v59 }
0x4db5   : > { %v5604_v6 = vadd.f32 0.5, %v5603_v35 }
0x4db7   : > { %v5606_v63 = vmul.f32 %v5604_v6, %v10325_v50 }
0x4e23   : > { %v5609_v60 = vpop.permute.xlu1 %5608 }
0x4e24   : > { %v5611_v61 = vmul.f32 %v5609_v60, %v5604_v6 }
0x4e26   : > { %5613 = vrot.lane.b32.xlu0 %v5611_v61, %s9240_s23 }
0x4e98   : > { %v5614_v0 = vpop.permute.xlu0 %5613 }
0x4e99   : > { %v10394_v2 = vadd.f32 %v5614_v0, %v5606_v63 }
0x4e9b   : > { %8965 = vtanh.f32 %v10394_v2 }
0x4ea5   : > { %v8966_v4 = vpop.eup %8965 }
0x4ea6   : > { %5619 = vrot.lane.b32.xlu1 %v8966_v4, %s9239_s27 }
0x4f18   : > { %v5620_v23 = vpop.permute.xlu1 %5619 }
0x4f19   : > { %v5622_v10 = vmul.f32 %v5620_v23, %v5604_v6 }
0x4f1b   : > { %5694 = vrot.lane.b32.xlu1 %v5622_v10, %s9240_s23 }
0x4f8d   : > { %v5695_v19 = vpop.permute.xlu1 %5694 }
0x4f8e   : > { %8222 = vmatmul.mubr.msk.f32.vlgmr.msra.gmra.mrb[58].mxu1 %vm941_vm0, %v5695_v19 }
0x4f8f   : > { %8682 = vmatpush3.bf16.msra.mxu1 %v9987_v32  ;;  %8243 = vmatprep.mubr.msk.f32.mxu1 %vm9237_vm1, %v9238_v20 }
0x4f90   : > { %8683 = vmatprep.subr.bf16.mxu1 %v9236_v18 }
0x4f93   : > { %8685 = vmatpush3.bf16.msra.mxu1 %v9991_v36 }
0x4f94   : > { %8692 = vmatprep.subr.bf16.mxu1 %v9236_v18 }
0x5061   : > { %v5764_v50 = vpop.f32.mrb[58].mxu1 }
0x5062   : > { %v5765_v28 = vadd.f32 %v5764_v50, %v5689_v45  ;;  %v8223_v12 = vpop.f32.mrb[59].mxu1 }
0x5064   : > { %v5768_v5 = vadd.f32 %v10105_v53, %v5765_v28 }
0x5066   : > { %8967 = vtanh.f32 %v5768_v5  ;;  %v5769_v15 = vmul.f32 0.5, %v5768_v5 }
0x5068   : > { %8969 = vtanh.f32 %v5769_v15 }
0x5070   : > { %v8968_v26 = vpop.eup %8967 }
0x5071   : > { %5776 = vrot.lane.b32.xlu0 %v8968_v26, %s9239_s27 }
0x5072   : > { %v8970_v16 = vpop.eup %8969 }
0x5073   : > { %v5771_v17 = vmul.f32 0.5, %v8970_v16 }
0x5075   : > { %v5772_v21 = vadd.f32 0.5, %v5771_v17 }
0x5077   : > { %v5774_v24 = vmul.f32 %v5772_v21, %v10341_v55 }
0x50e3   : > { %v5777_v1 = vpop.permute.xlu0 %5776 }
0x50e4   : > { %v5779_v22 = vmul.f32 %v5777_v1, %v5772_v21 }
0x50e6   : > { %5781 = vrot.lane.b32.xlu1 %v5779_v22, %s9240_s23 }
0x5158   : > { %v5782_v25 = vpop.permute.xlu1 %5781 }
0x5159   : > { %v10410_v29 = vadd.f32 %v5782_v25, %v5774_v24 }
0x515b   : > { %8971 = vtanh.f32 %v10410_v29 }
0x5165   : > { %v8972_v53 = vpop.eup %8971 }
0x5166   : > { %5787 = vrot.lane.b32.xlu0 %v8972_v53, %s9239_s27 }
0x51d8   : > { %v5788_v31 = vpop.permute.xlu0 %5787 }
0x51d9   : > { %v5790_v33 = vmul.f32 %v5788_v31, %v5772_v21 }
0x51db   : > { %5792 = vrot.lane.b32.xlu1 %v5790_v33, %s9240_s23  ;;  %v10473_v33 = vld [vmem:[%s10102_s22] ss:$0 sm:$0xff] }
0x524d   : > { %v5793_v37 = vpop.permute.xlu1 %5792 }
0x524e   : > { %8233 = vmatmul.mubr.msk.f32.vlgmr.msra.gmra.mrb[54].mxu0 %vm941_vm0, %v5793_v37 }
0x524f   : > { %8688 = vmatpush3.bf16.msra.mxu0 %v10021_v54  ;;  %8254 = vmatprep.mubr.msk.f32.mxu0 %vm9237_vm1, %v9238_v20 }
0x5250   : > { %8689 = vmatprep.subr.bf16.mxu0 %v9236_v18 }
0x5253   : > { %8691 = vmatpush3.bf16.msra.mxu0 %v10027_v56 }
0x5254   : > { %8701 = vmatprep.subr.bf16.mxu0 %v9236_v18 }
0x5256   : > { %8255 = vmatmul.mubr.msk.f32.vlgmr.msra.gmra.mrb[56].mxu0 %vm941_vm0, %v5695_v19 }
0x5257   : > { %8703 = vmatpush3.bf16.msra.mxu0 %v10076_v39  ;;  %8283 = vmatprep.mubr.msk.f32.mxu0 %vm9237_vm1, %v9238_v20 }
0x5258   : > { %8704 = vmatprep.subr.bf16.mxu0 %v9236_v18 }
0x525b   : > { %8706 = vmatpush3.bf16.msra.mxu0 %v10081_v41 }
0x525c   : > { %8713 = vmatprep.subr.bf16.mxu0 %v9236_v18 }
0x5321   : > { %v5862_v55 = vpop.f32.mrb[54].mxu0 }
0x5322   : > { %v5863_v38 = vadd.f32 %v10158_v14, %v5862_v55  ;;  %v8234_v8 = vpop.f32.mrb[55].mxu0 }
0x5324   : > { %7276 = vst.msk [vmem:[%s10131_s6 + $0x14] sm:$0xf] %vm3349_vm3, %v5863_v38  ;;  %v5868_v40 = vsel %vm3349_vm3, %v5863_v38, -inf }
0x5325   : > { %5869 = vmax.xlane.f32.xlu0 %v5868_v40 }
0x5329   : > { %v6030_v42 = vpop.f32.mrb[56].mxu0 }
0x532a   : > { %v8256_v7 = vpop.f32.mrb[57].mxu0 }
0x53b2   : > { %v5870_v3 = vpop.xlane.xlu0 %5869 }
0x53b3   : > { %vm5871_vm4 = vcmp.eq.f32.partialorder %v5863_v38, %v5870_v3 }
0x53b4   : > { %v5872_v44 = vsel %vm5871_vm4, %v10164_v27, 32 }
0x53b5   : > { %v5873_v46 = vsel %vm3349_vm3, %v5872_v44, 2147483647 }
0x53b6   : > { %v5875_v47 = vshra.s32 %v5873_v46, 16  ;;  %v5874_v49 = vand.u32 65535, %v5873_v46 }
0x53b8   : > { %v5877_v48 = vcvt.s32.f32 %v5875_v47  ;;  %v5876_v14 = vcvt.s32.f32 %v5874_v49 }
0x53ba   : > { %5878 = vmin.xlane.f32.xlu1 %v5877_v48 }
0x5447   : > { %v5879_v62 = vpop.xlane.xlu1 %5878 }
0x5448   : > { %vm5880_vm5 = vcmp.eq.f32.partialorder %v5877_v48, %v5879_v62  ;;  %v5885_v45 = vcvt.f32.s32 %v5879_v62 }
0x5449   : > { %v5881_v51 = vsel %vm5880_vm5, %v5876_v14, inf }
0x544a   : > { %5882 = vmin.xlane.f32.xlu0 %v5881_v51  ;;  %v5886_v57 = vshll.u32 %v5885_v45, 16 }
0x54d7   : > { %v5883_v30 = vpop.xlane.xlu0 %5882 }
0x54d8   : > { %v5884_v58 = vcvt.f32.s32 %v5883_v30 }
0x54da   : > { %v5887_v59 = vadd.s32 %v5886_v57, %v5884_v58 }
0x54dc   : > { %vm5888_vm6 = vcmp.eq.s32.totalorder %v10164_v27, %v5887_v59 }
0x54dd   : > { %v7277_v35 = vsel %vm5888_vm6, 1.0, %v9238_v20 }
0x54de   : > { %8244 = vmatmul.mubr.msk.f32.vlgmr.msra.gmra.mrb[60].mxu1 %vm941_vm0, %v7277_v35 }
0x54df   : > { %8694 = vmatpush3.bf16.msra.mxu1 %v10011_v43  ;;  %8261 = vmatprep.mubr.msk.f32.mxu1 %vm9237_vm1, %v9238_v20 }
0x54e0   : > { %8695 = vmatprep.subr.bf16.mxu1 %v9236_v18 }
0x55b1   : > { %v5960_v6 = vpop.f32.mrb[60].mxu1 }
0x55b2   : > { %v8245_v60 = vpop.f32.mrb[61].mxu1  ;;  %8262 = vmatmul.mubr.msk.f32.vlgmr.msra.gmra.mrb[62].mxu1 %vm1048_vm2, %v5960_v6 }
0x55b3   : > { %8697 = vmatpush3.bf16.msra.mxu1 %v10063_v13  ;;  %8272 = vmatprep.mubr.msk.f32.mxu1 %vm9237_vm1, %v9238_v20 }
0x55b4   : > { %8698 = vmatprep.subr.bf16.mxu1 %v9236_v18 }
0x55b7   : > { %8700 = vmatpush3.bf16.msra.mxu1 %v10068_v34 }
0x55b8   : > { %8707 = vmatprep.subr.bf16.mxu1 %v9236_v18 }
0x55ba   : > { %8273 = vmatmul.mubr.msk.f32.vlgmr.msra.gmra.mrb[64].mxu1 %vm941_vm0, %v5793_v37 }
0x55bb   : > { %8709 = vmatpush3.bf16.msra.mxu1 %v10117_v9  ;;  %8294 = vmatprep.mubr.msk.f32.mxu1 %vm9237_vm1, %v9238_v20 }
0x55bc   : > { %8710 = vmatprep.subr.bf16.mxu1 %v9236_v18 }
0x55bf   : > { %8712 = vmatpush3.bf16.msra.mxu1 %v10121_v11 }
0x55c0   : > { %8719 = vmatprep.subr.bf16.mxu1 %v9236_v18 }
0x5685   : > { %v6103_v61 = vpop.f32.mrb[62].mxu1 }
0x5686   : > { %v6104_v63 = vadd.f32 %v6103_v61, %v6030_v42  ;;  %v8263_v0 = vpop.f32.mrb[63].mxu1 }
0x5688   : > { %v6107_v4 = vadd.f32 %v10388_v52, %v6104_v63 }
0x568a   : > { %8973 = vtanh.f32 %v6107_v4  ;;  %v6108_v50 = vmul.f32 0.5, %v6107_v4 }
0x568c   : > { %8975 = vtanh.f32 %v6108_v50 }
0x568d   : > { %v6196_v23 = vpop.f32.mrb[64].mxu1 }
0x568e   : > { %v8274_v10 = vpop.f32.mrb[65].mxu1 }
0x5694   : > { %v8974_v19 = vpop.eup %8973 }
0x5695   : > { %6115 = vrot.lane.b32.xlu0 %v8974_v19, %s9239_s27 }
0x5696   : > { %v8976_v28 = vpop.eup %8975 }
0x5697   : > { %v6110_v12 = vmul.f32 0.5, %v8976_v28 }
0x5699   : > { %v6111_v5 = vadd.f32 0.5, %v6110_v12 }
0x569b   : > { %v6113_v16 = vmul.f32 %v6111_v5, %v10394_v2 }
0x5707   : > { %v6116_v26 = vpop.permute.xlu0 %6115 }
0x5708   : > { %v6118_v15 = vmul.f32 %v6116_v26, %v6111_v5 }
0x570a   : > { %6120 = vrot.lane.b32.xlu1 %v6118_v15, %s9240_s23 }
0x577c   : > { %v6121_v17 = vpop.permute.xlu1 %6120 }
0x577d   : > { %v10460_v21 = vadd.f32 %v6121_v17, %v6113_v16 }
0x577f   : > { %8977 = vtanh.f32 %v10460_v21 }
0x5789   : > { %v8978_v1 = vpop.eup %8977 }
0x578a   : > { %6126 = vrot.lane.b32.xlu1 %v8978_v1, %s9239_s27 }
0x57fc   : > { %v6127_v22 = vpop.permute.xlu1 %6126 }
0x57fd   : > { %v6129_v24 = vmul.f32 %v6127_v22, %v6111_v5 }
0x57ff   : > { %6201 = vrot.lane.b32.xlu0 %v6129_v24, %s9240_s23 }
0x5871   : > { %v6202_v25 = vpop.permute.xlu0 %6201 }
0x5872   : > { %8284 = vmatmul.mubr.msk.f32.vlgmr.msra.gmra.mrb[58].mxu0 %vm941_vm0, %v6202_v25 }
0x5873   : > { %8715 = vmatpush3.bf16.msra.mxu0 %v9987_v32  ;;  %8305 = vmatprep.mubr.msk.f32.mxu0 %vm9237_vm1, %v9238_v20 }
0x5874   : > { %8716 = vmatprep.subr.bf16.mxu0 %v9236_v18 }
0x5877   : > { %8718 = vmatpush3.bf16.msra.mxu0 %v9991_v36 }
0x5878   : > { %8725 = vmatprep.subr.bf16.mxu0 %v9236_v18 }
0x5945   : > { %v6271_v2 = vpop.f32.mrb[58].mxu0 }
0x5946   : > { %v6272_v53 = vadd.f32 %v6271_v2, %v6196_v23  ;;  %v8285_v31 = vpop.f32.mrb[59].mxu0 }
0x5948   : > { %v6275_v37 = vadd.f32 %v10473_v33, %v6272_v53 }
0x594a   : > { %8979 = vtanh.f32 %v6275_v37  ;;  %v6276_v32 = vmul.f32 0.5, %v6275_v37 }
0x594c   : > { %8981 = vtanh.f32 %v6276_v32 }
0x5954   : > { %v8980_v55 = vpop.eup %8979 }
0x5955   : > { %6283 = vrot.lane.b32.xlu1 %v8980_v55, %s9239_s27 }
0x5956   : > { %v8982_v38 = vpop.eup %8981 }
0x5957   : > { %v6278_v8 = vmul.f32 0.5, %v8982_v38 }
0x5959   : > { %v6279_v40 = vadd.f32 0.5, %v6278_v8 }
0x595b   : > { %v6281_v7 = vmul.f32 %v6279_v40, %v10410_v29  ;;  %v10498_v29 = vld [vmem:[%s10155_s0] ss:$0 sm:$0xff] }
0x59c7   : > { %v6284_v42 = vpop.permute.xlu1 %6283 }
0x59c8   : > { %v6286_v36 = vmul.f32 %v6284_v42, %v6279_v40 }
0x59ca   : > { %6288 = vrot.lane.b32.xlu0 %v6286_v36, %s9240_s23 }
0x5a3c   : > { %v6289_v3 = vpop.permute.xlu0 %6288 }
0x5a3d   : > { %v10479_v44 = vadd.f32 %v6289_v3, %v6281_v7 }
0x5a3f   : > { %8983 = vtanh.f32 %v10479_v44 }
0x5a49   : > { %v8984_v46 = vpop.eup %8983 }
0x5a4a   : > { %6294 = vrot.lane.b32.xlu1 %v8984_v46, %s9239_s27 }
0x5abc   : > { %v6295_v47 = vpop.permute.xlu1 %6294 }
0x5abd   : > { %v6297_v48 = vmul.f32 %v6295_v47, %v6279_v40 }
0x5abf   : > { %6299 = vrot.lane.b32.xlu0 %v6297_v48, %s9240_s23 }
0x5b31   : > { %v6300_v49 = vpop.permute.xlu0 %6299 }
0x5b32   : > { %8295 = vmatmul.mubr.msk.f32.vlgmr.msra.gmra.mrb[66].mxu1 %vm941_vm0, %v6300_v49 }
0x5b33   : > { %8721 = vmatpush3.bf16.msra.mxu1 %v10021_v54  ;;  %8316 = vmatprep.mubr.msk.f32.mxu1 %vm9237_vm1, %v9238_v20 }
0x5b34   : > { %8722 = vmatprep.subr.bf16.mxu1 %v9236_v18 }
0x5b37   : > { %8724 = vmatpush3.bf16.msra.mxu1 %v10027_v56 }
0x5b38   : > { %8734 = vmatprep.subr.bf16.mxu1 %v9236_v18 }
0x5b3a   : > { %8317 = vmatmul.mubr.msk.f32.vlgmr.msra.gmra.mrb[68].mxu1 %vm941_vm0, %v6202_v25 }
0x5b3b   : > { %8736 = vmatpush3.bf16.msra.mxu1 %v10076_v39  ;;  %8345 = vmatprep.mubr.msk.f32.mxu1 %vm9237_vm1, %v9238_v20 }
0x5b3c   : > { %8737 = vmatprep.subr.bf16.mxu1 %v9236_v18 }
0x5b3f   : > { %8739 = vmatpush3.bf16.msra.mxu1 %v10081_v41 }
0x5c05   : > { %v6369_v54 = vpop.f32.mrb[66].mxu1 }
0x5c06   : > { %v6370_v62 = vadd.f32 %v10498_v29, %v6369_v54  ;;  %v8296_v14 = vpop.f32.mrb[67].mxu1 }
0x5c08   : > { %7284 = vst.msk [vmem:[%s10131_s6 + $0x18] sm:$0xf] %vm3349_vm3, %v6370_v62  ;;  %v6375_v56 = vsel %vm3349_vm3, %v6370_v62, -inf }
0x5c09   : > { %6376 = vmax.xlane.f32.xlu1 %v6375_v56 }
0x5c0d   : > { %v6537_v51 = vpop.f32.mrb[68].mxu1 }
0x5c0e   : > { %v8318_v39 = vpop.f32.mrb[69].mxu1 }
0x5c96   : > { %v6377_v45 = vpop.xlane.xlu1 %6376 }
0x5c97   : > { %vm6378_vm7 = vcmp.eq.f32.partialorder %v6370_v62, %v6377_v45 }
0x5c98   : > { %v6379_v30 = vsel %vm6378_vm7, %v10164_v27, 32 }
0x5c99   : > { %v6380_v57 = vsel %vm3349_vm3, %v6379_v30, 2147483647 }
0x5c9a   : > { %v6382_v41 = vshra.s32 %v6380_v57, 16  ;;  %v6381_v59 = vand.u32 65535, %v6380_v57 }
0x5c9c   : > { %v6384_v58 = vcvt.s32.f32 %v6382_v41  ;;  %v6383_v6 = vcvt.s32.f32 %v6381_v59 }
0x5c9e   : > { %6385 = vmin.xlane.f32.xlu0 %v6384_v58 }
0x5d2b   : > { %v6386_v35 = vpop.xlane.xlu0 %6385 }
0x5d2c   : > { %vm6387_vm8 = vcmp.eq.f32.partialorder %v6384_v58, %v6386_v35  ;;  %v6392_v61 = vcvt.f32.s32 %v6386_v35 }
0x5d2d   : > { %v6388_v60 = vsel %vm6387_vm8, %v6383_v6, inf }
0x5d2e   : > { %6389 = vmin.xlane.f32.xlu0 %v6388_v60  ;;  %v6393_v0 = vshll.u32 %v6392_v61, 16 }
0x5dbb   : > { %v6390_v63 = vpop.xlane.xlu0 %6389 }
0x5dbc   : > { %v6391_v4 = vcvt.f32.s32 %v6390_v63 }
0x5dbe   : > { %v6394_v23 = vadd.s32 %v6393_v0, %v6391_v4 }
0x5dc0   : > { %vm6395_vm9 = vcmp.eq.s32.totalorder %v10164_v27, %v6394_v23 }
0x5dc1   : > { %v7285_v10 = vsel %vm6395_vm9, 1.0, %v9238_v20 }
0x5dc2   : > { %8306 = vmatmul.mubr.msk.f32.vlgmr.msra.gmra.mrb[60].mxu0 %vm941_vm0, %v7285_v10 }
0x5dc3   : > { %8727 = vmatpush3.bf16.msra.mxu0 %v10011_v43  ;;  %8323 = vmatprep.mubr.msk.f32.mxu0 %vm9237_vm1, %v9238_v20 }
0x5dc4   : > { %8728 = vmatprep.subr.bf16.mxu0 %v9236_v18 }
0x5e95   : > { %v6467_v19 = vpop.f32.mrb[60].mxu0 }
0x5e96   : > { %v8307_v50 = vpop.f32.mrb[61].mxu0  ;;  %8324 = vmatmul.mubr.msk.f32.vlgmr.msra.gmra.mrb[62].mxu0 %vm1048_vm2, %v6467_v19 }
0x5e97   : > { %8730 = vmatpush3.bf16.msra.mxu0 %v10063_v13  ;;  %8334 = vmatprep.mubr.msk.f32.mxu0 %vm9237_vm1, %v9238_v20 }
0x5e98   : > { %8731 = vmatprep.subr.bf16.mxu0 %v9236_v18 }
0x5e9b   : > { %8733 = vmatpush3.bf16.msra.mxu0 %v10068_v34 }
0x5e9c   : > { %8740 = vmatprep.subr.bf16.mxu0 %v9236_v18 }
0x5e9e   : > { %8335 = vmatmul.mubr.msk.f32.vlgmr.msra.gmra.mrb[64].mxu0 %vm941_vm0, %v6300_v49 }
0x5e9f   : > { %8742 = vmatpush3.bf16.msra.mxu0 %v10117_v9  ;;  %8356 = vmatprep.mubr.msk.f32.mxu0 %vm9237_vm1, %v9238_v20 }
0x5ea0   : > { %8743 = vmatprep.subr.bf16.mxu0 %v9236_v18 }
0x5ea3   : > { %8745 = vmatpush3.bf16.msra.mxu0 %v10121_v11 }
0x5f69   : > { %v6610_v43 = vpop.f32.mrb[62].mxu0 }
0x5f6a   : > { %v6611_v13 = vadd.f32 %v6610_v43, %v6537_v51  ;;  %v8325_v27 = vpop.f32.mrb[63].mxu0 }
0x5f6c   : > { %v6614_v28 = vadd.f32 %v10388_v52, %v6611_v13 }
0x5f6e   : > { %8985 = vtanh.f32 %v6614_v28  ;;  %v6615_v26 = vmul.f32 0.5, %v6614_v28 }
0x5f70   : > { %8987 = vtanh.f32 %v6615_v26 }
0x5f71   : > { %v6703_v34 = vpop.f32.mrb[64].mxu0 }
0x5f72   : > { %v8336_v12 = vpop.f32.mrb[65].mxu0 }
0x5f78   : > { %v8986_v5 = vpop.eup %8985 }
0x5f79   : > { %6622 = vrot.lane.b32.xlu1 %v8986_v5, %s9239_s27 }
0x5f7a   : > { %v8988_v9 = vpop.eup %8987 }
0x5f7b   : > { %v6617_v15 = vmul.f32 0.5, %v8988_v9 }
0x5f7d   : > { %v6618_v20 = vadd.f32 0.5, %v6617_v15 }
0x5f7f   : > { %v6620_v11 = vmul.f32 %v6618_v20, %v10460_v21 }
0x5feb   : > { %v6623_v16 = vpop.permute.xlu1 %6622 }
0x5fec   : > { %v6625_v18 = vmul.f32 %v6623_v16, %v6618_v20 }
0x5fee   : > { %6627 = vrot.lane.b32.xlu0 %v6625_v18, %s9240_s23 }
0x6060   : > { %v6628_v17 = vpop.permute.xlu0 %6627 }
0x6061   : > { %v6630_v1 = vadd.f32 %v6628_v17, %v6620_v11 }
0x6063   : > { %8989 = vtanh.f32 %v6630_v1 }
0x606d   : > { %v8990_v52 = vpop.eup %8989 }
0x606e   : > { %6633 = vrot.lane.b32.xlu1 %v8990_v52, %s9239_s27 }
0x60e0   : > { %v6634_v22 = vpop.permute.xlu1 %6633 }
0x60e1   : > { %v6636_v24 = vmul.f32 %v6634_v22, %v6618_v20 }
0x60e3   : > { %6708 = vrot.lane.b32.xlu1 %v6636_v24, %s9240_s23 }
0x6155   : > { %v6709_v25 = vpop.permute.xlu1 %6708 }
0x6156   : > { %8346 = vmatmul.mubr.msk.f32.vlgmr.msra.gmra.mrb[70].mxu1 %vm941_vm0, %v6709_v25 }
0x6229   : > { %v6778_v2 = vpop.f32.mrb[70].mxu1 }
0x622a   : > { %v6779_v53 = vadd.f32 %v6778_v2, %v6703_v34  ;;  %v8347_v31 = vpop.f32.mrb[71].mxu1 }
0x622c   : > { %v6782_v37 = vadd.f32 %v10473_v33, %v6779_v53 }
0x622e   : > { %8991 = vtanh.f32 %v6782_v37  ;;  %v6783_v55 = vmul.f32 0.5, %v6782_v37 }
0x6230   : > { %8993 = vtanh.f32 %v6783_v55 }
0x6238   : > { %v8992_v21 = vpop.eup %8991 }
0x6239   : > { %6790 = vrot.lane.b32.xlu0 %v8992_v21, %s9239_s27 }
0x623a   : > { %v8994_v32 = vpop.eup %8993 }
0x623b   : > { %v6785_v38 = vmul.f32 0.5, %v8994_v32 }
0x623d   : > { %v6786_v8 = vadd.f32 0.5, %v6785_v38 }
0x623f   : > { %v6788_v36 = vmul.f32 %v6786_v8, %v10479_v44 }
0x62ab   : > { %v6791_v40 = vpop.permute.xlu0 %6790 }
0x62ac   : > { %v6793_v42 = vmul.f32 %v6791_v40, %v6786_v8 }
0x62ae   : > { %6795 = vrot.lane.b32.xlu1 %v6793_v42, %s9240_s23 }
0x6320   : > { %v6796_v7 = vpop.permute.xlu1 %6795 }
0x6321   : > { %v6798_v3 = vadd.f32 %v6796_v7, %v6788_v36 }
0x6323   : > { %8995 = vtanh.f32 %v6798_v3 }
0x632d   : > { %v8996_v33 = vpop.eup %8995 }
0x632e   : > { %6801 = vrot.lane.b32.xlu0 %v8996_v33, %s9239_s27 }
0x63a0   : > { %v6802_v46 = vpop.permute.xlu0 %6801 }
0x63a1   : > { %v6804_v47 = vmul.f32 %v6802_v46, %v6786_v8 }
0x63a3   : > { %6806 = vrot.lane.b32.xlu1 %v6804_v47, %s9240_s23 }
0x6415   : > { %v6807_v48 = vpop.permute.xlu1 %6806 }
0x6416   : > { %8357 = vmatmul.mubr.msk.f32.vlgmr.msra.gmra.mrb[66].mxu0 %vm941_vm0, %v6807_v48 }
0x64e9   : > { %v6876_v49 = vpop.f32.mrb[66].mxu0 }
0x64ea   : > { %v6877_v54 = vadd.f32 %v10498_v29, %v6876_v49  ;;  %v8358_v62 = vpop.f32.mrb[67].mxu0 }
0x64ec   : > { %7292 = vst.msk [vmem:[%s10131_s6 + $0x1c] sm:$0xf] %vm3349_vm3, %v6877_v54 }
0x64ed PF: > { %s10626_s27 = sld [smem:[#allocation18_spill]]  ;;  %s10627_s28 = sld [smem:[#allocation17_spill]] }
0x64ee   : > { %s10628_s26 = sld [smem:[#allocation19_spill]]  ;;  %s10629_s24 = smov %s9218_s25 }
0x64f3   : > { %p36_p2 = scmp.ge.s32.totalorder %s10626_s27, 8   ;;  %s10630_s25 = smov %s10627_s28 }
0x64f5   :  { %38 = sbr.rel (!%p36_p2) target bundleno = 22 (0x16), region = 226 }
0x64fc   :  { %6903 = vsyncpa [#allocation4], 1 }
0x64fd   :  { %6905 = vsyncpa [#allocation4 + $0x1], 1 }
0x64fe   :  { %6906 = vsyncpa [#allocation6], 1 }
0x64ff   :  { %6908 = vsyncpa [#allocation6 + $0x1], 1 }
0x6500   :  { %6909 = vsyncpa [#allocation9], 1 }
0x6501   :  { %6911 = vsyncpa [#allocation9 + $0x1], 1 }
0x6502   :  { %6912 = vsyncpa [#allocation12], 1 }
0x6503   :  { %6914 = vsyncpa [#allocation12 + $0x1], 1 }

</bundles_post_ra>
